<compile_context>
chip_gen: v6e
topology: v6e:2x2x1
jax: 0.10.0
libtpu: 0.0.40
codegen_flags: <defaults>
</compile_context>

<pallas_src>
import functools

import jax
import jax.numpy as jnp
import numpy as np
from jax import lax
from jax.experimental import pallas as pl
from jax.experimental.pallas import tpu as pltpu

# ----- configuration (ActEnc(chn, dims, dim_action, dim_state, dim_latent=True,
#                              norm="none", activation="relu")) -----
CHN = [8, 8, 16, 16, 32, 32]
DIMS = [64, 32, 32, 16, 16, 8]
DIM_ACTION = 4
DIM_STATE = 3
DIM_LATENT = 1                       # dim_latent=True -> 1 extra channel
C = CHN[5]                           # 32  (conv3 / lstm hidden channels)
H = W = DIMS[5]                      # 8
HW = H * W                           # 64
CIN1 = C + DIM_ACTION + DIM_STATE + DIM_LATENT   # 40 conv3 input channels
K = 5                                # ConvLSTM kernel size
PAD = 2                              # ConvLSTM padding
KK2C = K * K * 2 * C                 # 1600 im2col contraction size
LN_EPS = 1e-5


# ------------------------------- kernel -------------------------------------
def act_enc_kernel(x_ref, hprev_ref, cprev_ref,
                   w1_ref, b1_ref, wg_ref, bg_ref, gamma_ref, beta_ref,
                   out_ref, hstate_ref, cstate_ref,
                   pad_ref, col_ref):
    bt = x_ref.shape[0]              # batch tile
    M = bt * HW

    x = x_ref[...].reshape(M, CIN1)            # bf16, (M, 40)
    h_prev = hprev_ref[...].reshape(M, C)      # f32
    c_prev = cprev_ref[...].reshape(M, C)      # f32

    # ---- conv3: 1x1 conv == matmul + bias, then ReLU (norm="none") ----
    enc = jnp.dot(x, w1_ref[...], preferred_element_type=jnp.float32)
    enc = jnp.maximum(enc + b1_ref[...], 0.0)                       # (M, C) f32

    # ---- padded halo buffer for the 5x5 gate conv -------------------------
    # Re-zeroed every step: cheap, and safe under "parallel" megacore split.
    pad_ref[...] = jnp.zeros(pad_ref.shape, pad_ref.dtype)
    # write enc_tc / h_prev directly at channel offsets 0 and C (no concat)
    pad_ref[:, PAD:PAD + H, PAD:PAD + W, 0:C] = enc.reshape(bt, H, W, C)
    pad_ref[:, PAD:PAD + H, PAD:PAD + W, C:2 * C] = h_prev.reshape(bt, H, W, C)

    # ---- im2col: build (M, K*K*2C) slab with 5 sublane-shifted reads -------
    for kx in range(K):
        shifted = pad_ref[:, :, kx:kx + W, :]            # (bt, H+4, W, 2C), 1 shift
        for ky in range(K):
            tap = ky * K + kx
            col = shifted[:, ky:ky + H, :, :].reshape(M, 2 * C)   # tile-granular
            col_ref[:, tap * 2 * C:(tap + 1) * 2 * C] = col.astype(jnp.bfloat16)

    # ---- single fused gate matmul: (M, 1600) @ (1600, 4C) ------------------
    gates = jnp.dot(col_ref[...], wg_ref[...], preferred_element_type=jnp.float32)
    gates = gates + bg_ref[...]                                     # (M, 4C)

    i_g = jax.nn.sigmoid(gates[:, 0 * C:1 * C])
    f_g = jax.nn.sigmoid(gates[:, 1 * C:2 * C])
    o_g = jax.nn.sigmoid(gates[:, 2 * C:3 * C])
    g_g = jnp.tanh(gates[:, 3 * C:4 * C])
    cell = f_g * c_prev + i_g * g_g
    hidden = o_g * jnp.tanh(cell)                                   # (M, C)

    # ---- per-sample LayerNorm over [C, H, W], single-pass stats ------------
    h3 = hidden.reshape(bt, HW, C)
    n = float(HW * C)
    s1 = jnp.sum(jnp.sum(h3, axis=2, keepdims=True), axis=1, keepdims=True)
    s2 = jnp.sum(jnp.sum(h3 * h3, axis=2, keepdims=True), axis=1, keepdims=True)
    mean = s1 / n
    var = s2 / n - mean * mean
    inv = lax.rsqrt(var + LN_EPS)
    normed = (h3 - mean) * inv * gamma_ref[...][None] + beta_ref[...][None]

    out_ref[...] = normed
    hstate_ref[...] = h3
    cstate_ref[...] = cell.reshape(bt, HW, C)


# ------------------------------- wrapper -------------------------------------
@functools.partial(jax.jit, static_argnames=("b_tile",))
def act_enc_forward(enc_t, action, state, latent, params, lstm_states=None,
                    b_tile=8):
    """enc_t: (B, C, H, W) NCHW, action: (B, A), state: (B, S), latent: (B, 1, H, W).
    Returns (hidden5_nchw, [ (h_nchw, c_nchw) ])."""
    B = enc_t.shape[0]

    # glue: build conv3 input in kernel layout (B, HW, CIN1), bf16 matmul operand
    x_enc = jnp.transpose(enc_t, (0, 2, 3, 1)).reshape(B, HW, C)
    action_state = jnp.concatenate([action, state], axis=1)               # (B, A+S)
    asm = jnp.broadcast_to(action_state[:, None, :], (B, HW, DIM_ACTION + DIM_STATE))
    lat = jnp.transpose(latent, (0, 2, 3, 1)).reshape(B, HW, DIM_LATENT)
    x_in = jnp.concatenate([x_enc, asm, lat], axis=-1).astype(jnp.bfloat16)

    if lstm_states is None or lstm_states[0] is None:
        h_prev = jnp.zeros((B, HW, C), jnp.float32)
        c_prev = jnp.zeros((B, HW, C), jnp.float32)
    else:
        h_nchw, c_nchw = lstm_states[0]
        h_prev = jnp.transpose(h_nchw, (0, 2, 3, 1)).reshape(B, HW, C).astype(jnp.float32)
        c_prev = jnp.transpose(c_nchw, (0, 2, 3, 1)).reshape(B, HW, C).astype(jnp.float32)

    # batch tiling: bt samples per grid step (whole batch for small B)
    bt = min(b_tile, B)
    n_blocks = (B + bt - 1) // bt
    Bp = n_blocks * bt
    if Bp != B:
        padn = Bp - B
        x_in = jnp.pad(x_in, ((0, padn), (0, 0), (0, 0)))
        h_prev = jnp.pad(h_prev, ((0, padn), (0, 0), (0, 0)))
        c_prev = jnp.pad(c_prev, ((0, padn), (0, 0), (0, 0)))

    out_shapes = (
        jax.ShapeDtypeStruct((Bp, HW, C), jnp.float32),   # layer-normed hidden
        jax.ShapeDtypeStruct((Bp, HW, C), jnp.float32),   # lstm hidden state
        jax.ShapeDtypeStruct((Bp, HW, C), jnp.float32),   # lstm cell state
    )
    grid_spec = pltpu.PrefetchScalarGridSpec(
        num_scalar_prefetch=0,
        grid=(n_blocks,),
        in_specs=[
            pl.BlockSpec((bt, HW, CIN1), lambda b: (b, 0, 0)),       # x_in (bf16)
            pl.BlockSpec((bt, HW, C), lambda b: (b, 0, 0)),          # h_prev
            pl.BlockSpec((bt, HW, C), lambda b: (b, 0, 0)),          # c_prev
            pl.BlockSpec((CIN1, C), lambda b: (0, 0)),               # w1 (bf16)
            pl.BlockSpec((1, C), lambda b: (0, 0)),                  # b1
            pl.BlockSpec((KK2C, 4 * C), lambda b: (0, 0)),           # wg (bf16, fused)
            pl.BlockSpec((1, 4 * C), lambda b: (0, 0)),              # bg
            pl.BlockSpec((HW, C), lambda b: (0, 0)),                 # layernorm gamma
            pl.BlockSpec((HW, C), lambda b: (0, 0)),                 # layernorm beta
        ],
        out_specs=[
            pl.BlockSpec((bt, HW, C), lambda b: (b, 0, 0)),
            pl.BlockSpec((bt, HW, C), lambda b: (b, 0, 0)),
            pl.BlockSpec((bt, HW, C), lambda b: (b, 0, 0)),
        ],
        scratch_shapes=[
            pltpu.VMEM((bt, H + 2 * PAD, W + 2 * PAD, 2 * C), jnp.float32),  # halo
            pltpu.VMEM((bt * HW, KK2C), jnp.bfloat16),                       # im2col
        ],
    )
    normed, h_new, c_new = pl.pallas_call(
        act_enc_kernel,
        out_shape=out_shapes,
        grid_spec=grid_spec,
        compiler_params=pltpu.CompilerParams(
            dimension_semantics=("parallel",)),        # use both TCs on v7x
    )(x_in, h_prev, c_prev,
      params["w1_k"], params["b1_k"], params["wg_k"], params["bg_k"],
      params["gamma_k"], params["beta_k"])

    def to_nchw(a):
        return jnp.transpose(a[:B].reshape(B, H, W, C), (0, 3, 1, 2))

    hidden5 = to_nchw(normed)
    new_states = [(to_nchw(h_new), to_nchw(c_new))]
    return hidden5, new_states


# -------------------------- deterministic parameters -------------------------
def init_params(key):
    ks = jax.random.split(key, 6)
    w1_t = jax.random.normal(ks[0], (C, CIN1, 1, 1), jnp.float32) * 0.1   # conv3 weight (OIHW)
    b1_t = jax.random.normal(ks[1], (C,), jnp.float32) * 0.1              # conv3 bias
    wg_t = jax.random.normal(ks[2], (4 * C, 2 * C, K, K), jnp.float32) * 0.05  # lstm gates conv (OIHW)
    bg_t = jax.random.normal(ks[3], (4 * C,), jnp.float32) * 0.1
    gamma_t = 1.0 + 0.1 * jax.random.normal(ks[4], (C, H, W), jnp.float32)  # LayerNorm([C,H,W]) weight
    beta_t = 0.1 * jax.random.normal(ks[5], (C, H, W), jnp.float32)         # LayerNorm([C,H,W]) bias

    params = dict(w1_t=w1_t, b1_t=b1_t, wg_t=wg_t, bg_t=bg_t,
                  gamma_t=gamma_t, beta_t=beta_t)
    # kernel-layout variants (matmul weights in bf16)
    params["w1_k"] = jnp.transpose(w1_t[:, :, 0, 0], (1, 0)).astype(jnp.bfloat16)   # (CIN1, C)
    params["b1_k"] = b1_t.reshape(1, C)
    params["wg_k"] = (jnp.transpose(wg_t, (2, 3, 1, 0))                             # (ky,kx,2C,4C)
                      .reshape(KK2C, 4 * C).astype(jnp.bfloat16))                   # (1600, 128)
    params["bg_k"] = bg_t.reshape(1, 4 * C)
    params["gamma_k"] = jnp.transpose(gamma_t, (1, 2, 0)).reshape(HW, C)
    params["beta_k"] = jnp.transpose(beta_t, (1, 2, 0)).reshape(HW, C)
    return params


# ------------------------------ pure-JAX reference ---------------------------
def ref_forward(enc_t, action, state, latent, params):
    """Reference forward. Matmul/conv operands are rounded to bf16 (matching the
    kernel's bf16 MXU operands) but accumulated with HIGHEST f32 precision, so
    kernel-vs-ref differences are only summation-order level."""
    B = enc_t.shape[0]

    def bf16_round(a):
        return a.astype(jnp.bfloat16).astype(jnp.float32)

    action_state = jnp.concatenate([action, state], axis=1)
    asm = jnp.ones((B, DIM_ACTION + DIM_STATE, H, W), jnp.float32) * action_state[:, :, None, None]
    asm = jnp.concatenate([asm, latent], axis=1)
    x = jnp.concatenate([enc_t, asm], axis=1)
    dn = ("NCHW", "OIHW", "NCHW")

    # conv3 (weights taken from the same bf16 values the kernel uses)
    w1 = jnp.transpose(params["w1_k"].astype(jnp.float32), (1, 0))[:, :, None, None]
    y = lax.conv_general_dilated(bf16_round(x), w1, (1, 1), "VALID",
                                 dimension_numbers=dn, precision=lax.Precision.HIGHEST)
    y = jnp.maximum(y + params["b1_t"][None, :, None, None], 0.0)

    h0 = jnp.zeros((B, C, H, W), jnp.float32)
    c0 = jnp.zeros((B, C, H, W), jnp.float32)
    stacked = jnp.concatenate([y, h0], axis=1)
    wg = jnp.transpose(params["wg_k"].astype(jnp.float32).reshape(K, K, 2 * C, 4 * C),
                       (3, 2, 0, 1))                                  # back to OIHW
    gates = lax.conv_general_dilated(bf16_round(stacked), wg, (1, 1),
                                     ((PAD, PAD), (PAD, PAD)),
                                     dimension_numbers=dn, precision=lax.Precision.HIGHEST)
    gates = gates + params["bg_t"][None, :, None, None]
    i_g = jax.nn.sigmoid(gates[:, 0 * C:1 * C])
    f_g = jax.nn.sigmoid(gates[:, 1 * C:2 * C])
    o_g = jax.nn.sigmoid(gates[:, 2 * C:3 * C])
    g_g = jnp.tanh(gates[:, 3 * C:4 * C])
    cell = f_g * c0 + i_g * g_g
    hidden = o_g * jnp.tanh(cell)
    mu = jnp.mean(hidden, axis=(1, 2, 3), keepdims=True)
    var = jnp.mean((hidden - mu) ** 2, axis=(1, 2, 3), keepdims=True)
    normed = (hidden - mu) / jnp.sqrt(var + LN_EPS) * params["gamma_t"][None] + params["beta_t"][None]
    return normed, [(hidden, cell)]


# ----------------------------------- main -------------------------------------
if __name__ == "__main__":
    key = jax.random.PRNGKey(0)
    kp, k1, k2, k3, k4 = jax.random.split(key, 5)
    params = init_params(kp)

    B = 2
    enc_t = jax.random.normal(k1, (B, C, H, W), jnp.float32)
    action = jax.random.normal(k2, (B, DIM_ACTION), jnp.float32)
    state = jax.random.normal(k3, (B, DIM_STATE), jnp.float32)
    latent = jax.random.normal(k4, (B, DIM_LATENT, H, W), jnp.float32)

    hidden5, lstm_states = act_enc_forward(enc_t, action, state, latent, params)
    jax.block_until_ready(hidden5)
    jax.block_until_ready(lstm_states)

    ref_hidden, ref_states = ref_forward(enc_t, action, state, latent, params)
    np.testing.assert_allclose(np.asarray(hidden5), np.asarray(ref_hidden),
                               atol=5e-3, rtol=1e-2)
    np.testing.assert_allclose(np.asarray(lstm_states[0][0]), np.asarray(ref_states[0][0]),
                               atol=5e-3, rtol=1e-2)
    np.testing.assert_allclose(np.asarray(lstm_states[0][1]), np.asarray(ref_states[0][1]),
                               atol=5e-3, rtol=1e-2)
    print("KERNEL_OK")
</pallas_src>

<mosaic_0001>
module attributes {stable_mosaic.version = 11 : i64} {
  func.func @act_enc_kernel(%arg0: i32, %arg1: memref<2x64x40xbf16, #tpu.memory_space<vmem>>, %arg2: memref<2x64x32xf32, #tpu.memory_space<vmem>>, %arg3: memref<2x64x32xf32, #tpu.memory_space<vmem>>, %arg4: memref<40x32xbf16, #tpu.memory_space<vmem>>, %arg5: memref<1x32xf32, #tpu.memory_space<vmem>>, %arg6: memref<1600x128xbf16, #tpu.memory_space<vmem>>, %arg7: memref<1x128xf32, #tpu.memory_space<vmem>>, %arg8: memref<64x32xf32, #tpu.memory_space<vmem>>, %arg9: memref<64x32xf32, #tpu.memory_space<vmem>>, %arg10: memref<2x64x32xf32, #tpu.memory_space<vmem>>, %arg11: memref<2x64x32xf32, #tpu.memory_space<vmem>>, %arg12: memref<2x64x32xf32, #tpu.memory_space<vmem>>, %arg13: memref<2x12x12x64xf32, #tpu.memory_space<vmem>>, %arg14: memref<128x1600xbf16, #tpu.memory_space<vmem>>) attributes {dimension_semantics = [#tpu.dimension_semantics<parallel>], iteration_bounds = array<i64: 1>, scalar_prefetch = 0 : i64, scratch_operands = 2 : i64, tpu.core_type = #tpu.core_type<tc>, window_params = [{transform_indices = @transform_0, window_bounds = array<i64: 2, 64, 40>}, {transform_indices = @transform_1, window_bounds = array<i64: 2, 64, 32>}, {transform_indices = @transform_2, window_bounds = array<i64: 2, 64, 32>}, {pipeline_mode = #tpu.pipeline_mode<synchronous>, transform_indices = @transform_3, window_bounds = array<i64: 40, 32>}, {pipeline_mode = #tpu.pipeline_mode<synchronous>, transform_indices = @transform_4, window_bounds = array<i64: 1, 32>}, {pipeline_mode = #tpu.pipeline_mode<synchronous>, transform_indices = @transform_5, window_bounds = array<i64: 1600, 128>}, {pipeline_mode = #tpu.pipeline_mode<synchronous>, transform_indices = @transform_6, window_bounds = array<i64: 1, 128>}, {pipeline_mode = #tpu.pipeline_mode<synchronous>, transform_indices = @transform_7, window_bounds = array<i64: 64, 32>}, {pipeline_mode = #tpu.pipeline_mode<synchronous>, transform_indices = @transform_8, window_bounds = array<i64: 64, 32>}, {transform_indices = @transform_9, window_bounds = array<i64: 2, 64, 32>}, {transform_indices = @transform_10, window_bounds = array<i64: 2, 64, 32>}, {transform_indices = @transform_11, window_bounds = array<i64: 2, 64, 32>}]} {
    %c0 = arith.constant 0 : index
    %c0_0 = arith.constant 0 : index
    %c0_1 = arith.constant 0 : index
    %0 = vector.load %arg1[%c0, %c0_0, %c0_1] : memref<2x64x40xbf16, #tpu.memory_space<vmem>>, vector<2x64x40xbf16>
    %1 = vector.shape_cast %0 : vector<2x64x40xbf16> to vector<128x40xbf16>
    %c0_2 = arith.constant 0 : index
    %c0_3 = arith.constant 0 : index
    %c0_4 = arith.constant 0 : index
    %2 = vector.load %arg2[%c0_2, %c0_3, %c0_4] : memref<2x64x32xf32, #tpu.memory_space<vmem>>, vector<2x64x32xf32>
    %3 = vector.shape_cast %2 : vector<2x64x32xf32> to vector<128x32xf32>
    %c0_5 = arith.constant 0 : index
    %c0_6 = arith.constant 0 : index
    %c0_7 = arith.constant 0 : index
    %4 = vector.load %arg3[%c0_5, %c0_6, %c0_7] : memref<2x64x32xf32, #tpu.memory_space<vmem>>, vector<2x64x32xf32>
    %5 = vector.shape_cast %4 : vector<2x64x32xf32> to vector<128x32xf32>
    %c0_8 = arith.constant 0 : index
    %c0_9 = arith.constant 0 : index
    %6 = vector.load %arg4[%c0_8, %c0_9] : memref<40x32xbf16, #tpu.memory_space<vmem>>, vector<40x32xbf16>
    %cst = arith.constant dense<0.000000e+00> : vector<128x32xf32>
    %7 = tpu.matmul %1, %6, %cst {dimension_numbers = #tpu.dot_dimension_numbers<[1], [0], [0], [1], [0, 0, 1, 1], [], []>} : vector<128x40xbf16>, vector<40x32xbf16>, vector<128x32xf32> -> vector<128x32xf32>
    %c0_10 = arith.constant 0 : index
    %c0_11 = arith.constant 0 : index
    %8 = vector.load %arg5[%c0_10, %c0_11] : memref<1x32xf32, #tpu.memory_space<vmem>>, vector<1x32xf32>
    %9 = vector.broadcast %8 : vector<1x32xf32> to vector<128x32xf32>
    %10 = arith.addf %7, %9 : vector<128x32xf32>
    %cst_12 = arith.constant 0.000000e+00 : f32
    %11 = vector.broadcast %cst_12 : f32 to vector<128x32xf32>
    %12 = arith.maximumf %10, %11 : vector<128x32xf32>
    %cst_13 = arith.constant 0.000000e+00 : f32
    %13 = vector.broadcast %cst_13 : f32 to vector<2x12x12x64xf32>
    %c0_14 = arith.constant 0 : index
    %c0_15 = arith.constant 0 : index
    %c0_16 = arith.constant 0 : index
    %c0_17 = arith.constant 0 : index
    %14 = vector.load %arg13[%c0_14, %c0_15, %c0_16, %c0_17] : memref<2x12x12x64xf32, #tpu.memory_space<vmem>>, vector<2x12x12x64xf32>
    tpu.vector_store %arg13[%c0_14, %c0_15, %c0_16, %c0_17], %13 {strides = array<i32>} : memref<2x12x12x64xf32, #tpu.memory_space<vmem>>, vector<2x12x12x64xf32>,
    %15 = vector.shape_cast %12 : vector<128x32xf32> to vector<2x8x8x32xf32>
    %c0_18 = arith.constant 0 : index
    %c2 = arith.constant 2 : index
    %c2_19 = arith.constant 2 : index
    %c0_20 = arith.constant 0 : index
    %16 = vector.load %arg13[%c0_18, %c2, %c2_19, %c0_20] : memref<2x12x12x64xf32, #tpu.memory_space<vmem>>, vector<2x8x8x32xf32>
    tpu.vector_store %arg13[%c0_18, %c2, %c2_19, %c0_20], %15 {strides = array<i32>} : memref<2x12x12x64xf32, #tpu.memory_space<vmem>>, vector<2x8x8x32xf32>,
    %17 = vector.shape_cast %3 : vector<128x32xf32> to vector<2x8x8x32xf32>
    %c0_21 = arith.constant 0 : index
    %c2_22 = arith.constant 2 : index
    %c2_23 = arith.constant 2 : index
    %c32 = arith.constant 32 : index
    %18 = vector.load %arg13[%c0_21, %c2_22, %c2_23, %c32] : memref<2x12x12x64xf32, #tpu.memory_space<vmem>>, vector<2x8x8x32xf32>
    tpu.vector_store %arg13[%c0_21, %c2_22, %c2_23, %c32], %17 {strides = array<i32>} : memref<2x12x12x64xf32, #tpu.memory_space<vmem>>, vector<2x8x8x32xf32>,
    %c0_24 = arith.constant 0 : index
    %c0_25 = arith.constant 0 : index
    %c0_26 = arith.constant 0 : index
    %c0_27 = arith.constant 0 : index
    %19 = vector.load %arg13[%c0_24, %c0_25, %c0_26, %c0_27] : memref<2x12x12x64xf32, #tpu.memory_space<vmem>>, vector<2x12x8x64xf32>
    %20 = vector.extract_strided_slice %19 {offsets = [0, 0, 0, 0], sizes = [2, 8, 8, 64], strides = [1, 1, 1, 1]} : vector<2x12x8x64xf32> to vector<2x8x8x64xf32>
    %21 = vector.shape_cast %20 : vector<2x8x8x64xf32> to vector<128x64xf32>
    %22 = arith.truncf %21 : vector<128x64xf32> to vector<128x64xbf16>
    %c0_28 = arith.constant 0 : index
    %c0_29 = arith.constant 0 : index
    %23 = vector.load %arg14[%c0_28, %c0_29] : memref<128x1600xbf16, #tpu.memory_space<vmem>>, vector<128x64xbf16>
    tpu.vector_store %arg14[%c0_28, %c0_29], %22 {strides = array<i32>} : memref<128x1600xbf16, #tpu.memory_space<vmem>>, vector<128x64xbf16>,
    %24 = vector.extract_strided_slice %19 {offsets = [0, 1, 0, 0], sizes = [2, 8, 8, 64], strides = [1, 1, 1, 1]} : vector<2x12x8x64xf32> to vector<2x8x8x64xf32>
    %25 = vector.shape_cast %24 : vector<2x8x8x64xf32> to vector<128x64xf32>
    %26 = arith.truncf %25 : vector<128x64xf32> to vector<128x64xbf16>
    %c0_30 = arith.constant 0 : index
    %c320 = arith.constant 320 : index
    %27 = vector.load %arg14[%c0_30, %c320] : memref<128x1600xbf16, #tpu.memory_space<vmem>>, vector<128x64xbf16>
    tpu.vector_store %arg14[%c0_30, %c320], %26 {strides = array<i32>} : memref<128x1600xbf16, #tpu.memory_space<vmem>>, vector<128x64xbf16>,
    %28 = vector.extract_strided_slice %19 {offsets = [0, 2, 0, 0], sizes = [2, 8, 8, 64], strides = [1, 1, 1, 1]} : vector<2x12x8x64xf32> to vector<2x8x8x64xf32>
    %29 = vector.shape_cast %28 : vector<2x8x8x64xf32> to vector<128x64xf32>
    %30 = arith.truncf %29 : vector<128x64xf32> to vector<128x64xbf16>
    %c0_31 = arith.constant 0 : index
    %c640 = arith.constant 640 : index
    %31 = vector.load %arg14[%c0_31, %c640] : memref<128x1600xbf16, #tpu.memory_space<vmem>>, vector<128x64xbf16>
    tpu.vector_store %arg14[%c0_31, %c640], %30 {strides = array<i32>} : memref<128x1600xbf16, #tpu.memory_space<vmem>>, vector<128x64xbf16>,
    %32 = vector.extract_strided_slice %19 {offsets = [0, 3, 0, 0], sizes = [2, 8, 8, 64], strides = [1, 1, 1, 1]} : vector<2x12x8x64xf32> to vector<2x8x8x64xf32>
    %33 = vector.shape_cast %32 : vector<2x8x8x64xf32> to vector<128x64xf32>
    %34 = arith.truncf %33 : vector<128x64xf32> to vector<128x64xbf16>
    %c0_32 = arith.constant 0 : index
    %c960 = arith.constant 960 : index
    %35 = vector.load %arg14[%c0_32, %c960] : memref<128x1600xbf16, #tpu.memory_space<vmem>>, vector<128x64xbf16>
    tpu.vector_store %arg14[%c0_32, %c960], %34 {strides = array<i32>} : memref<128x1600xbf16, #tpu.memory_space<vmem>>, vector<128x64xbf16>,
    %36 = vector.extract_strided_slice %19 {offsets = [0, 4, 0, 0], sizes = [2, 8, 8, 64], strides = [1, 1, 1, 1]} : vector<2x12x8x64xf32> to vector<2x8x8x64xf32>
    %37 = vector.shape_cast %36 : vector<2x8x8x64xf32> to vector<128x64xf32>
    %38 = arith.truncf %37 : vector<128x64xf32> to vector<128x64xbf16>
    %c0_33 = arith.constant 0 : index
    %c1280 = arith.constant 1280 : index
    %39 = vector.load %arg14[%c0_33, %c1280] : memref<128x1600xbf16, #tpu.memory_space<vmem>>, vector<128x64xbf16>
    tpu.vector_store %arg14[%c0_33, %c1280], %38 {strides = array<i32>} : memref<128x1600xbf16, #tpu.memory_space<vmem>>, vector<128x64xbf16>,
    %c0_34 = arith.constant 0 : index
    %c0_35 = arith.constant 0 : index
    %c1 = arith.constant 1 : index
    %c0_36 = arith.constant 0 : index
    %40 = vector.load %arg13[%c0_34, %c0_35, %c1, %c0_36] : memref<2x12x12x64xf32, #tpu.memory_space<vmem>>, vector<2x12x8x64xf32>
    %41 = vector.extract_strided_slice %40 {offsets = [0, 0, 0, 0], sizes = [2, 8, 8, 64], strides = [1, 1, 1, 1]} : vector<2x12x8x64xf32> to vector<2x8x8x64xf32>
    %42 = vector.shape_cast %41 : vector<2x8x8x64xf32> to vector<128x64xf32>
    %43 = arith.truncf %42 : vector<128x64xf32> to vector<128x64xbf16>
    %c0_37 = arith.constant 0 : index
    %c64 = arith.constant 64 : index
    %44 = vector.load %arg14[%c0_37, %c64] : memref<128x1600xbf16, #tpu.memory_space<vmem>>, vector<128x64xbf16>
    tpu.vector_store %arg14[%c0_37, %c64], %43 {strides = array<i32>} : memref<128x1600xbf16, #tpu.memory_space<vmem>>, vector<128x64xbf16>,
    %45 = vector.extract_strided_slice %40 {offsets = [0, 1, 0, 0], sizes = [2, 8, 8, 64], strides = [1, 1, 1, 1]} : vector<2x12x8x64xf32> to vector<2x8x8x64xf32>
    %46 = vector.shape_cast %45 : vector<2x8x8x64xf32> to vector<128x64xf32>
    %47 = arith.truncf %46 : vector<128x64xf32> to vector<128x64xbf16>
    %c0_38 = arith.constant 0 : index
    %c384 = arith.constant 384 : index
    %48 = vector.load %arg14[%c0_38, %c384] : memref<128x1600xbf16, #tpu.memory_space<vmem>>, vector<128x64xbf16>
    tpu.vector_store %arg14[%c0_38, %c384], %47 {strides = array<i32>} : memref<128x1600xbf16, #tpu.memory_space<vmem>>, vector<128x64xbf16>,
    %49 = vector.extract_strided_slice %40 {offsets = [0, 2, 0, 0], sizes = [2, 8, 8, 64], strides = [1, 1, 1, 1]} : vector<2x12x8x64xf32> to vector<2x8x8x64xf32>
    %50 = vector.shape_cast %49 : vector<2x8x8x64xf32> to vector<128x64xf32>
    %51 = arith.truncf %50 : vector<128x64xf32> to vector<128x64xbf16>
    %c0_39 = arith.constant 0 : index
    %c704 = arith.constant 704 : index
    %52 = vector.load %arg14[%c0_39, %c704] : memref<128x1600xbf16, #tpu.memory_space<vmem>>, vector<128x64xbf16>
    tpu.vector_store %arg14[%c0_39, %c704], %51 {strides = array<i32>} : memref<128x1600xbf16, #tpu.memory_space<vmem>>, vector<128x64xbf16>,
    %53 = vector.extract_strided_slice %40 {offsets = [0, 3, 0, 0], sizes = [2, 8, 8, 64], strides = [1, 1, 1, 1]} : vector<2x12x8x64xf32> to vector<2x8x8x64xf32>
    %54 = vector.shape_cast %53 : vector<2x8x8x64xf32> to vector<128x64xf32>
    %55 = arith.truncf %54 : vector<128x64xf32> to vector<128x64xbf16>
    %c0_40 = arith.constant 0 : index
    %c1024 = arith.constant 1024 : index
    %56 = vector.load %arg14[%c0_40, %c1024] : memref<128x1600xbf16, #tpu.memory_space<vmem>>, vector<128x64xbf16>
    tpu.vector_store %arg14[%c0_40, %c1024], %55 {strides = array<i32>} : memref<128x1600xbf16, #tpu.memory_space<vmem>>, vector<128x64xbf16>,
    %57 = vector.extract_strided_slice %40 {offsets = [0, 4, 0, 0], sizes = [2, 8, 8, 64], strides = [1, 1, 1, 1]} : vector<2x12x8x64xf32> to vector<2x8x8x64xf32>
    %58 = vector.shape_cast %57 : vector<2x8x8x64xf32> to vector<128x64xf32>
    %59 = arith.truncf %58 : vector<128x64xf32> to vector<128x64xbf16>
    %c0_41 = arith.constant 0 : index
    %c1344 = arith.constant 1344 : index
    %60 = vector.load %arg14[%c0_41, %c1344] : memref<128x1600xbf16, #tpu.memory_space<vmem>>, vector<128x64xbf16>
    tpu.vector_store %arg14[%c0_41, %c1344], %59 {strides = array<i32>} : memref<128x1600xbf16, #tpu.memory_space<vmem>>, vector<128x64xbf16>,
    %c0_42 = arith.constant 0 : index
    %c0_43 = arith.constant 0 : index
    %c2_44 = arith.constant 2 : index
    %c0_45 = arith.constant 0 : index
    %61 = vector.load %arg13[%c0_42, %c0_43, %c2_44, %c0_45] : memref<2x12x12x64xf32, #tpu.memory_space<vmem>>, vector<2x12x8x64xf32>
    %62 = vector.extract_strided_slice %61 {offsets = [0, 0, 0, 0], sizes = [2, 8, 8, 64], strides = [1, 1, 1, 1]} : vector<2x12x8x64xf32> to vector<2x8x8x64xf32>
    %63 = vector.shape_cast %62 : vector<2x8x8x64xf32> to vector<128x64xf32>
    %64 = arith.truncf %63 : vector<128x64xf32> to vector<128x64xbf16>
    %c0_46 = arith.constant 0 : index
    %c128 = arith.constant 128 : index
    %65 = vector.load %arg14[%c0_46, %c128] : memref<128x1600xbf16, #tpu.memory_space<vmem>>, vector<128x64xbf16>
    tpu.vector_store %arg14[%c0_46, %c128], %64 {strides = array<i32>} : memref<128x1600xbf16, #tpu.memory_space<vmem>>, vector<128x64xbf16>,
    %66 = vector.extract_strided_slice %61 {offsets = [0, 1, 0, 0], sizes = [2, 8, 8, 64], strides = [1, 1, 1, 1]} : vector<2x12x8x64xf32> to vector<2x8x8x64xf32>
    %67 = vector.shape_cast %66 : vector<2x8x8x64xf32> to vector<128x64xf32>
    %68 = arith.truncf %67 : vector<128x64xf32> to vector<128x64xbf16>
    %c0_47 = arith.constant 0 : index
    %c448 = arith.constant 448 : index
    %69 = vector.load %arg14[%c0_47, %c448] : memref<128x1600xbf16, #tpu.memory_space<vmem>>, vector<128x64xbf16>
    tpu.vector_store %arg14[%c0_47, %c448], %68 {strides = array<i32>} : memref<128x1600xbf16, #tpu.memory_space<vmem>>, vector<128x64xbf16>,
    %70 = vector.extract_strided_slice %61 {offsets = [0, 2, 0, 0], sizes = [2, 8, 8, 64], strides = [1, 1, 1, 1]} : vector<2x12x8x64xf32> to vector<2x8x8x64xf32>
    %71 = vector.shape_cast %70 : vector<2x8x8x64xf32> to vector<128x64xf32>
    %72 = arith.truncf %71 : vector<128x64xf32> to vector<128x64xbf16>
    %c0_48 = arith.constant 0 : index
    %c768 = arith.constant 768 : index
    %73 = vector.load %arg14[%c0_48, %c768] : memref<128x1600xbf16, #tpu.memory_space<vmem>>, vector<128x64xbf16>
    tpu.vector_store %arg14[%c0_48, %c768], %72 {strides = array<i32>} : memref<128x1600xbf16, #tpu.memory_space<vmem>>, vector<128x64xbf16>,
    %74 = vector.extract_strided_slice %61 {offsets = [0, 3, 0, 0], sizes = [2, 8, 8, 64], strides = [1, 1, 1, 1]} : vector<2x12x8x64xf32> to vector<2x8x8x64xf32>
    %75 = vector.shape_cast %74 : vector<2x8x8x64xf32> to vector<128x64xf32>
    %76 = arith.truncf %75 : vector<128x64xf32> to vector<128x64xbf16>
    %c0_49 = arith.constant 0 : index
    %c1088 = arith.constant 1088 : index
    %77 = vector.load %arg14[%c0_49, %c1088] : memref<128x1600xbf16, #tpu.memory_space<vmem>>, vector<128x64xbf16>
    tpu.vector_store %arg14[%c0_49, %c1088], %76 {strides = array<i32>} : memref<128x1600xbf16, #tpu.memory_space<vmem>>, vector<128x64xbf16>,
    %78 = vector.extract_strided_slice %61 {offsets = [0, 4, 0, 0], sizes = [2, 8, 8, 64], strides = [1, 1, 1, 1]} : vector<2x12x8x64xf32> to vector<2x8x8x64xf32>
    %79 = vector.shape_cast %78 : vector<2x8x8x64xf32> to vector<128x64xf32>
    %80 = arith.truncf %79 : vector<128x64xf32> to vector<128x64xbf16>
    %c0_50 = arith.constant 0 : index
    %c1408 = arith.constant 1408 : index
    %81 = vector.load %arg14[%c0_50, %c1408] : memref<128x1600xbf16, #tpu.memory_space<vmem>>, vector<128x64xbf16>
    tpu.vector_store %arg14[%c0_50, %c1408], %80 {strides = array<i32>} : memref<128x1600xbf16, #tpu.memory_space<vmem>>, vector<128x64xbf16>,
    %c0_51 = arith.constant 0 : index
    %c0_52 = arith.constant 0 : index
    %c3 = arith.constant 3 : index
    %c0_53 = arith.constant 0 : index
    %82 = vector.load %arg13[%c0_51, %c0_52, %c3, %c0_53] : memref<2x12x12x64xf32, #tpu.memory_space<vmem>>, vector<2x12x8x64xf32>
    %83 = vector.extract_strided_slice %82 {offsets = [0, 0, 0, 0], sizes = [2, 8, 8, 64], strides = [1, 1, 1, 1]} : vector<2x12x8x64xf32> to vector<2x8x8x64xf32>
    %84 = vector.shape_cast %83 : vector<2x8x8x64xf32> to vector<128x64xf32>
    %85 = arith.truncf %84 : vector<128x64xf32> to vector<128x64xbf16>
    %c0_54 = arith.constant 0 : index
    %c192 = arith.constant 192 : index
    %86 = vector.load %arg14[%c0_54, %c192] : memref<128x1600xbf16, #tpu.memory_space<vmem>>, vector<128x64xbf16>
    tpu.vector_store %arg14[%c0_54, %c192], %85 {strides = array<i32>} : memref<128x1600xbf16, #tpu.memory_space<vmem>>, vector<128x64xbf16>,
    %87 = vector.extract_strided_slice %82 {offsets = [0, 1, 0, 0], sizes = [2, 8, 8, 64], strides = [1, 1, 1, 1]} : vector<2x12x8x64xf32> to vector<2x8x8x64xf32>
    %88 = vector.shape_cast %87 : vector<2x8x8x64xf32> to vector<128x64xf32>
    %89 = arith.truncf %88 : vector<128x64xf32> to vector<128x64xbf16>
    %c0_55 = arith.constant 0 : index
    %c512 = arith.constant 512 : index
    %90 = vector.load %arg14[%c0_55, %c512] : memref<128x1600xbf16, #tpu.memory_space<vmem>>, vector<128x64xbf16>
    tpu.vector_store %arg14[%c0_55, %c512], %89 {strides = array<i32>} : memref<128x1600xbf16, #tpu.memory_space<vmem>>, vector<128x64xbf16>,
    %91 = vector.extract_strided_slice %82 {offsets = [0, 2, 0, 0], sizes = [2, 8, 8, 64], strides = [1, 1, 1, 1]} : vector<2x12x8x64xf32> to vector<2x8x8x64xf32>
    %92 = vector.shape_cast %91 : vector<2x8x8x64xf32> to vector<128x64xf32>
    %93 = arith.truncf %92 : vector<128x64xf32> to vector<128x64xbf16>
    %c0_56 = arith.constant 0 : index
    %c832 = arith.constant 832 : index
    %94 = vector.load %arg14[%c0_56, %c832] : memref<128x1600xbf16, #tpu.memory_space<vmem>>, vector<128x64xbf16>
    tpu.vector_store %arg14[%c0_56, %c832], %93 {strides = array<i32>} : memref<128x1600xbf16, #tpu.memory_space<vmem>>, vector<128x64xbf16>,
    %95 = vector.extract_strided_slice %82 {offsets = [0, 3, 0, 0], sizes = [2, 8, 8, 64], strides = [1, 1, 1, 1]} : vector<2x12x8x64xf32> to vector<2x8x8x64xf32>
    %96 = vector.shape_cast %95 : vector<2x8x8x64xf32> to vector<128x64xf32>
    %97 = arith.truncf %96 : vector<128x64xf32> to vector<128x64xbf16>
    %c0_57 = arith.constant 0 : index
    %c1152 = arith.constant 1152 : index
    %98 = vector.load %arg14[%c0_57, %c1152] : memref<128x1600xbf16, #tpu.memory_space<vmem>>, vector<128x64xbf16>
    tpu.vector_store %arg14[%c0_57, %c1152], %97 {strides = array<i32>} : memref<128x1600xbf16, #tpu.memory_space<vmem>>, vector<128x64xbf16>,
    %99 = vector.extract_strided_slice %82 {offsets = [0, 4, 0, 0], sizes = [2, 8, 8, 64], strides = [1, 1, 1, 1]} : vector<2x12x8x64xf32> to vector<2x8x8x64xf32>
    %100 = vector.shape_cast %99 : vector<2x8x8x64xf32> to vector<128x64xf32>
    %101 = arith.truncf %100 : vector<128x64xf32> to vector<128x64xbf16>
    %c0_58 = arith.constant 0 : index
    %c1472 = arith.constant 1472 : index
    %102 = vector.load %arg14[%c0_58, %c1472] : memref<128x1600xbf16, #tpu.memory_space<vmem>>, vector<128x64xbf16>
    tpu.vector_store %arg14[%c0_58, %c1472], %101 {strides = array<i32>} : memref<128x1600xbf16, #tpu.memory_space<vmem>>, vector<128x64xbf16>,
    %c0_59 = arith.constant 0 : index
    %c0_60 = arith.constant 0 : index
    %c4 = arith.constant 4 : index
    %c0_61 = arith.constant 0 : index
    %103 = vector.load %arg13[%c0_59, %c0_60, %c4, %c0_61] : memref<2x12x12x64xf32, #tpu.memory_space<vmem>>, vector<2x12x8x64xf32>
    %104 = vector.extract_strided_slice %103 {offsets = [0, 0, 0, 0], sizes = [2, 8, 8, 64], strides = [1, 1, 1, 1]} : vector<2x12x8x64xf32> to vector<2x8x8x64xf32>
    %105 = vector.shape_cast %104 : vector<2x8x8x64xf32> to vector<128x64xf32>
    %106 = arith.truncf %105 : vector<128x64xf32> to vector<128x64xbf16>
    %c0_62 = arith.constant 0 : index
    %c256 = arith.constant 256 : index
    %107 = vector.load %arg14[%c0_62, %c256] : memref<128x1600xbf16, #tpu.memory_space<vmem>>, vector<128x64xbf16>
    tpu.vector_store %arg14[%c0_62, %c256], %106 {strides = array<i32>} : memref<128x1600xbf16, #tpu.memory_space<vmem>>, vector<128x64xbf16>,
    %108 = vector.extract_strided_slice %103 {offsets = [0, 1, 0, 0], sizes = [2, 8, 8, 64], strides = [1, 1, 1, 1]} : vector<2x12x8x64xf32> to vector<2x8x8x64xf32>
    %109 = vector.shape_cast %108 : vector<2x8x8x64xf32> to vector<128x64xf32>
    %110 = arith.truncf %109 : vector<128x64xf32> to vector<128x64xbf16>
    %c0_63 = arith.constant 0 : index
    %c576 = arith.constant 576 : index
    %111 = vector.load %arg14[%c0_63, %c576] : memref<128x1600xbf16, #tpu.memory_space<vmem>>, vector<128x64xbf16>
    tpu.vector_store %arg14[%c0_63, %c576], %110 {strides = array<i32>} : memref<128x1600xbf16, #tpu.memory_space<vmem>>, vector<128x64xbf16>,
    %112 = vector.extract_strided_slice %103 {offsets = [0, 2, 0, 0], sizes = [2, 8, 8, 64], strides = [1, 1, 1, 1]} : vector<2x12x8x64xf32> to vector<2x8x8x64xf32>
    %113 = vector.shape_cast %112 : vector<2x8x8x64xf32> to vector<128x64xf32>
    %114 = arith.truncf %113 : vector<128x64xf32> to vector<128x64xbf16>
    %c0_64 = arith.constant 0 : index
    %c896 = arith.constant 896 : index
    %115 = vector.load %arg14[%c0_64, %c896] : memref<128x1600xbf16, #tpu.memory_space<vmem>>, vector<128x64xbf16>
    tpu.vector_store %arg14[%c0_64, %c896], %114 {strides = array<i32>} : memref<128x1600xbf16, #tpu.memory_space<vmem>>, vector<128x64xbf16>,
    %116 = vector.extract_strided_slice %103 {offsets = [0, 3, 0, 0], sizes = [2, 8, 8, 64], strides = [1, 1, 1, 1]} : vector<2x12x8x64xf32> to vector<2x8x8x64xf32>
    %117 = vector.shape_cast %116 : vector<2x8x8x64xf32> to vector<128x64xf32>
    %118 = arith.truncf %117 : vector<128x64xf32> to vector<128x64xbf16>
    %c0_65 = arith.constant 0 : index
    %c1216 = arith.constant 1216 : index
    %119 = vector.load %arg14[%c0_65, %c1216] : memref<128x1600xbf16, #tpu.memory_space<vmem>>, vector<128x64xbf16>
    tpu.vector_store %arg14[%c0_65, %c1216], %118 {strides = array<i32>} : memref<128x1600xbf16, #tpu.memory_space<vmem>>, vector<128x64xbf16>,
    %120 = vector.extract_strided_slice %103 {offsets = [0, 4, 0, 0], sizes = [2, 8, 8, 64], strides = [1, 1, 1, 1]} : vector<2x12x8x64xf32> to vector<2x8x8x64xf32>
    %121 = vector.shape_cast %120 : vector<2x8x8x64xf32> to vector<128x64xf32>
    %122 = arith.truncf %121 : vector<128x64xf32> to vector<128x64xbf16>
    %c0_66 = arith.constant 0 : index
    %c1536 = arith.constant 1536 : index
    %123 = vector.load %arg14[%c0_66, %c1536] : memref<128x1600xbf16, #tpu.memory_space<vmem>>, vector<128x64xbf16>
    tpu.vector_store %arg14[%c0_66, %c1536], %122 {strides = array<i32>} : memref<128x1600xbf16, #tpu.memory_space<vmem>>, vector<128x64xbf16>,
    %c0_67 = arith.constant 0 : index
    %c0_68 = arith.constant 0 : index
    %124 = vector.load %arg14[%c0_67, %c0_68] : memref<128x1600xbf16, #tpu.memory_space<vmem>>, vector<128x1600xbf16>
    %c0_69 = arith.constant 0 : index
    %c0_70 = arith.constant 0 : index
    %125 = vector.load %arg6[%c0_69, %c0_70] : memref<1600x128xbf16, #tpu.memory_space<vmem>>, vector<1600x128xbf16>
    %cst_71 = arith.constant dense<0.000000e+00> : vector<128x128xf32>
    %126 = tpu.matmul %124, %125, %cst_71 {dimension_numbers = #tpu.dot_dimension_numbers<[1], [0], [0], [1], [0, 0, 1, 1], [], []>} : vector<128x1600xbf16>, vector<1600x128xbf16>, vector<128x128xf32> -> vector<128x128xf32>
    %c0_72 = arith.constant 0 : index
    %c0_73 = arith.constant 0 : index
    %127 = vector.load %arg7[%c0_72, %c0_73] : memref<1x128xf32, #tpu.memory_space<vmem>>, vector<1x128xf32>
    %128 = vector.broadcast %127 : vector<1x128xf32> to vector<128x128xf32>
    %129 = arith.addf %126, %128 : vector<128x128xf32>
    %130 = vector.extract_strided_slice %129 {offsets = [0, 0], sizes = [128, 32], strides = [1, 1]} : vector<128x128xf32> to vector<128x32xf32>
    %131 = arith.negf %130 : vector<128x32xf32>
    %132 = math.exp %131 : vector<128x32xf32>
    %cst_74 = arith.constant 1.000000e+00 : f32
    %133 = vector.broadcast %cst_74 : f32 to vector<128x32xf32>
    %134 = arith.addf %133, %132 : vector<128x32xf32>
    %135 = arith.divf %133, %134 : vector<128x32xf32>
    %136 = vector.extract_strided_slice %129 {offsets = [0, 32], sizes = [128, 32], strides = [1, 1]} : vector<128x128xf32> to vector<128x32xf32>
    %137 = arith.negf %136 : vector<128x32xf32>
    %138 = math.exp %137 : vector<128x32xf32>
    %cst_75 = arith.constant 1.000000e+00 : f32
    %139 = vector.broadcast %cst_75 : f32 to vector<128x32xf32>
    %140 = arith.addf %139, %138 : vector<128x32xf32>
    %141 = arith.divf %139, %140 : vector<128x32xf32>
    %142 = vector.extract_strided_slice %129 {offsets = [0, 64], sizes = [128, 32], strides = [1, 1]} : vector<128x128xf32> to vector<128x32xf32>
    %143 = arith.negf %142 : vector<128x32xf32>
    %144 = math.exp %143 : vector<128x32xf32>
    %cst_76 = arith.constant 1.000000e+00 : f32
    %145 = vector.broadcast %cst_76 : f32 to vector<128x32xf32>
    %146 = arith.addf %145, %144 : vector<128x32xf32>
    %147 = arith.divf %145, %146 : vector<128x32xf32>
    %148 = vector.extract_strided_slice %129 {offsets = [0, 96], sizes = [128, 32], strides = [1, 1]} : vector<128x128xf32> to vector<128x32xf32>
    %149 = math.tanh %148 : vector<128x32xf32>
    %150 = arith.mulf %141, %5 : vector<128x32xf32>
    %151 = arith.mulf %135, %149 : vector<128x32xf32>
    %152 = arith.addf %150, %151 : vector<128x32xf32>
    %153 = math.tanh %152 : vector<128x32xf32>
    %154 = arith.mulf %147, %153 : vector<128x32xf32>
    %155 = vector.shape_cast %154 : vector<128x32xf32> to vector<2x64x32xf32>
    %cst_77 = arith.constant dense<0.000000e+00> : vector<2x64xf32>
    %156 = vector.multi_reduction <add>, %155, %cst_77 [2] : vector<2x64x32xf32> to vector<2x64xf32>
    %157 = vector.shape_cast %156 : vector<2x64xf32> to vector<2x64x1xf32>
    %cst_78 = arith.constant dense<0.000000e+00> : vector<2x1xf32>
    %158 = vector.multi_reduction <add>, %157, %cst_78 [1] : vector<2x64x1xf32> to vector<2x1xf32>
    %159 = vector.shape_cast %158 : vector<2x1xf32> to vector<2x1x1xf32>
    %160 = arith.mulf %155, %155 : vector<2x64x32xf32>
    %cst_79 = arith.constant dense<0.000000e+00> : vector<2x64xf32>
    %161 = vector.multi_reduction <add>, %160, %cst_79 [2] : vector<2x64x32xf32> to vector<2x64xf32>
    %162 = vector.shape_cast %161 : vector<2x64xf32> to vector<2x64x1xf32>
    %cst_80 = arith.constant dense<0.000000e+00> : vector<2x1xf32>
    %163 = vector.multi_reduction <add>, %162, %cst_80 [1] : vector<2x64x1xf32> to vector<2x1xf32>
    %164 = vector.shape_cast %163 : vector<2x1xf32> to vector<2x1x1xf32>
    %cst_81 = arith.constant 2.048000e+03 : f32
    %165 = vector.broadcast %cst_81 : f32 to vector<2x1x1xf32>
    %166 = arith.divf %159, %165 : vector<2x1x1xf32>
    %cst_82 = arith.constant 2.048000e+03 : f32
    %167 = vector.broadcast %cst_82 : f32 to vector<2x1x1xf32>
    %168 = arith.divf %164, %167 : vector<2x1x1xf32>
    %169 = arith.mulf %166, %166 : vector<2x1x1xf32>
    %170 = arith.subf %168, %169 : vector<2x1x1xf32>
    %cst_83 = arith.constant 9.99999974E-6 : f32
    %171 = vector.broadcast %cst_83 : f32 to vector<2x1x1xf32>
    %172 = arith.addf %170, %171 : vector<2x1x1xf32>
    %173 = math.rsqrt %172 : vector<2x1x1xf32>
    %174 = vector.broadcast %166 : vector<2x1x1xf32> to vector<2x64x32xf32>
    %175 = arith.subf %155, %174 : vector<2x64x32xf32>
    %176 = vector.broadcast %173 : vector<2x1x1xf32> to vector<2x64x32xf32>
    %177 = arith.mulf %175, %176 : vector<2x64x32xf32>
    %c0_84 = arith.constant 0 : index
    %c0_85 = arith.constant 0 : index
    %178 = vector.load %arg8[%c0_84, %c0_85] : memref<64x32xf32, #tpu.memory_space<vmem>>, vector<64x32xf32>
    %179 = vector.shape_cast %178 : vector<64x32xf32> to vector<1x64x32xf32>
    %180 = vector.broadcast %179 : vector<1x64x32xf32> to vector<2x64x32xf32>
    %181 = arith.mulf %177, %180 : vector<2x64x32xf32>
    %c0_86 = arith.constant 0 : index
    %c0_87 = arith.constant 0 : index
    %182 = vector.load %arg9[%c0_86, %c0_87] : memref<64x32xf32, #tpu.memory_space<vmem>>, vector<64x32xf32>
    %183 = vector.shape_cast %182 : vector<64x32xf32> to vector<1x64x32xf32>
    %184 = vector.broadcast %183 : vector<1x64x32xf32> to vector<2x64x32xf32>
    %185 = arith.addf %181, %184 : vector<2x64x32xf32>
    %c0_88 = arith.constant 0 : index
    %c0_89 = arith.constant 0 : index
    %c0_90 = arith.constant 0 : index
    %186 = vector.load %arg10[%c0_88, %c0_89, %c0_90] : memref<2x64x32xf32, #tpu.memory_space<vmem>>, vector<2x64x32xf32>
    tpu.vector_store %arg10[%c0_88, %c0_89, %c0_90], %185 {strides = array<i32>} : memref<2x64x32xf32, #tpu.memory_space<vmem>>, vector<2x64x32xf32>,
    %c0_91 = arith.constant 0 : index
    %c0_92 = arith.constant 0 : index
    %c0_93 = arith.constant 0 : index
    %187 = vector.load %arg11[%c0_91, %c0_92, %c0_93] : memref<2x64x32xf32, #tpu.memory_space<vmem>>, vector<2x64x32xf32>
    tpu.vector_store %arg11[%c0_91, %c0_92, %c0_93], %155 {strides = array<i32>} : memref<2x64x32xf32, #tpu.memory_space<vmem>>, vector<2x64x32xf32>,
    %188 = vector.shape_cast %152 : vector<128x32xf32> to vector<2x64x32xf32>
    %c0_94 = arith.constant 0 : index
    %c0_95 = arith.constant 0 : index
    %c0_96 = arith.constant 0 : index
    %189 = vector.load %arg12[%c0_94, %c0_95, %c0_96] : memref<2x64x32xf32, #tpu.memory_space<vmem>>, vector<2x64x32xf32>
    tpu.vector_store %arg12[%c0_94, %c0_95, %c0_96], %188 {strides = array<i32>} : memref<2x64x32xf32, #tpu.memory_space<vmem>>, vector<2x64x32xf32>,
    return
  }
  func.func @transform_0(%arg0: i32) -> (i32, i32, i32) {
    %c0_i32 = arith.constant 0 : i32
    %c0_i32_0 = arith.constant 0 : i32
    %c0_i32_1 = arith.constant 0 : i32
    return %arg0, %c0_i32, %c0_i32_0 : i32, i32, i32
  }
  func.func @transform_1(%arg0: i32) -> (i32, i32, i32) {
    %c0_i32 = arith.constant 0 : i32
    %c0_i32_0 = arith.constant 0 : i32
    %c0_i32_1 = arith.constant 0 : i32
    return %arg0, %c0_i32, %c0_i32_0 : i32, i32, i32
  }
  func.func @transform_2(%arg0: i32) -> (i32, i32, i32) {
    %c0_i32 = arith.constant 0 : i32
    %c0_i32_0 = arith.constant 0 : i32
    %c0_i32_1 = arith.constant 0 : i32
    return %arg0, %c0_i32, %c0_i32_0 : i32, i32, i32
  }
  func.func @transform_3(%arg0: i32) -> (i32, i32) {
    %c0_i32 = arith.constant 0 : i32
    %c0_i32_0 = arith.constant 0 : i32
    %c0_i32_1 = arith.constant 0 : i32
    return %c0_i32, %c0_i32_0 : i32, i32
  }
  func.func @transform_4(%arg0: i32) -> (i32, i32) {
    %c0_i32 = arith.constant 0 : i32
    %c0_i32_0 = arith.constant 0 : i32
    %c0_i32_1 = arith.constant 0 : i32
    return %c0_i32, %c0_i32_0 : i32, i32
  }
  func.func @transform_5(%arg0: i32) -> (i32, i32) {
    %c0_i32 = arith.constant 0 : i32
    %c0_i32_0 = arith.constant 0 : i32
    %c0_i32_1 = arith.constant 0 : i32
    return %c0_i32, %c0_i32_0 : i32, i32
  }
  func.func @transform_6(%arg0: i32) -> (i32, i32) {
    %c0_i32 = arith.constant 0 : i32
    %c0_i32_0 = arith.constant 0 : i32
    %c0_i32_1 = arith.constant 0 : i32
    return %c0_i32, %c0_i32_0 : i32, i32
  }
  func.func @transform_7(%arg0: i32) -> (i32, i32) {
    %c0_i32 = arith.constant 0 : i32
    %c0_i32_0 = arith.constant 0 : i32
    %c0_i32_1 = arith.constant 0 : i32
    return %c0_i32, %c0_i32_0 : i32, i32
  }
  func.func @transform_8(%arg0: i32) -> (i32, i32) {
    %c0_i32 = arith.constant 0 : i32
    %c0_i32_0 = arith.constant 0 : i32
    %c0_i32_1 = arith.constant 0 : i32
    return %c0_i32, %c0_i32_0 : i32, i32
  }
  func.func @transform_9(%arg0: i32) -> (i32, i32, i32) {
    %c0_i32 = arith.constant 0 : i32
    %c0_i32_0 = arith.constant 0 : i32
    %c0_i32_1 = arith.constant 0 : i32
    return %arg0, %c0_i32, %c0_i32_0 : i32, i32, i32
  }
  func.func @transform_10(%arg0: i32) -> (i32, i32, i32) {
    %c0_i32 = arith.constant 0 : i32
    %c0_i32_0 = arith.constant 0 : i32
    %c0_i32_1 = arith.constant 0 : i32
    return %arg0, %c0_i32, %c0_i32_0 : i32, i32, i32
  }
  func.func @transform_11(%arg0: i32) -> (i32, i32, i32) {
    %c0_i32 = arith.constant 0 : i32
    %c0_i32_0 = arith.constant 0 : i32
    %c0_i32_1 = arith.constant 0 : i32
    return %arg0, %c0_i32, %c0_i32_0 : i32, i32, i32
  }
}

</mosaic_0001>

<bundles_post_ra>
// kernel: act_enc_forward.1
= control target key start
LH: loop header
LB: loop body
LE: loop exit
PB: predicated region body
PF: predicated region fallthrough
CT: control target
= control target key end

     0   :  { %17 = vsyncpa [#allocation5], 0  ;;  %vm178_vm0 = vcmask 1043456   ;;  %vm153_vm1 = vcmask 326656   ;;  %vm295_vm2 = vcmask 523264   ;;  %v6911_v5 = vmov 0.0   ;;  %s9478_s0 = inlined_call_operand.vmem [shape: bf16[2,64,40], index: 0, kind: input, shape index: {}]   ;;  %s9479_s1 = inlined_call_operand.vmem [shape: f32[2,64,32], index: 1, kind: input, shape index: {}, may-alias: {1,2}]   ;;  %s9480_s2 = inlined_call_operand.vmem [shape: f32[2,64,32], index: 2, kind: input, shape index: {}, may-alias: {1,2}]   ;;  %s9481_s3 = inlined_call_operand.vmem [shape: bf16[40,32], index: 3, kind: input, shape index: {}]   ;;  %s9482_s4 = inlined_call_operand.vmem [shape: f32[1,32], index: 4, kind: input, shape index: {}]   ;;  %s9483_s5 = inlined_call_operand.vmem [shape: bf16[1600,128], index: 5, kind: input, shape index: {}]   ;;  %s9484_s6 = inlined_call_operand.vmem [shape: f32[1,128], index: 6, kind: input, shape index: {}]   ;;  %s9485_s7 = inlined_call_operand.vmem [shape: f32[64,32], index: 7, kind: input, shape index: {}]   ;;  %s9486_s8 = inlined_call_operand.vmem [shape: f32[64,32], index: 8, kind: input, shape index: {}]   ;;  %s9487_s9 = inlined_call_operand.hbm [shape: f32[2,64,32], index: 9, kind: output, shape index: {0}]   ;;  %s9488_s10 = inlined_call_operand.hbm [shape: f32[2,64,32], index: 10, kind: output, shape index: {1}]   ;;  %s9489_s11 = inlined_call_operand.hbm [shape: f32[2,64,32], index: 11, kind: output, shape index: {2}]  }
   0x1   :  { %v6483_v0 = vld [vmem:[%s9481_s3 + $0x10] ss:$0 sps:$4 sm:$0xff]   ;;  %v6484_v1 = vld [vmem:[%s9481_s3 + $0x8] sm:$0xff]   ;;  %v6486_v3 = vld [vmem:[%s9478_s0] sm:$0xff]   ;;  %296 = vst.msk [vmem:[#allocation2] sm:$0xff] %vm295_vm2, %v6911_v5  ;;  %vm297_vm3 = vcmask 519168  }
   0x2   :  { %6473 = vmatprep.subr.msk.bf16.mxu0 %vm178_vm0, %v6483_v0  ;;  %v180_v2 = vsel %vm178_vm0, %v6483_v0, 0  ;;  %v6485_v4 = vld [vmem:[%s9481_s3] sm:$0xff]   ;;  %6425 = vmatprep.mubr.msk.bf16.mxu0 %vm153_vm1, %v6486_v3  ;;  %299 = vst.msk [vmem:[#allocation2 + $0x10] sm:$0xff] %vm295_vm2, %v6911_v5  ;;  %301 = vst.msk [vmem:[#allocation2 + $0x20] sm:$0xff] %vm295_vm2, %v6911_v5  ;;  %v6487_v7 = vld [vmem:[%s9478_s0 + $0x8] sm:$0xff]   ;;  %s6912_s28 = smov 32  }
   0x3   :  { %6420 = vmatpush3.bf16.msra.mxu0 %v180_v2  ;;  %303 = vst.msk [vmem:[#allocation2 + $0x30] sm:$0xff] %vm295_vm2, %v6911_v5  ;;  %305 = vst.msk [vmem:[#allocation2 + $0x40] sm:$0xff] %vm295_vm2, %v6911_v5  ;;  %v54_v6 = vld [vmem:[%s9479_s1] sm:$0xff]  ;;  %v55_v8 = vld [vmem:[%s9479_s1 + $0x8] sm:$0xff]  ;;  %s6913_s29 = smov 64  }
   0x4   :  { %6421 = vmatprep.subr.bf16.mxu0 %v6484_v1  ;;  %307 = vst.msk [vmem:[#allocation2 + $0x50] sm:$0xff] %vm295_vm2, %v6911_v5  ;;  %309 = vst.msk [vmem:[#allocation2 + $0x60] sm:$0xff] %vm295_vm2, %v6911_v5  ;;  %379 = vrot.lane.b32.xlu0 %v54_v6, %s6912_s28  ;;  %v6488_v9 = vld [vmem:[%s9478_s0 + $0x10] sm:$0xff]   ;;  %v58_v11 = vld [vmem:[%s9479_s1 + $0x20] sm:$0xff] }
   0x5   :  { %311 = vst.msk [vmem:[#allocation2 + $0x70] sm:$0xff] %vm295_vm2, %v6911_v5  ;;  %313 = vst.msk [vmem:[#allocation2 + $0x80] sm:$0xff] %vm295_vm2, %v6911_v5  ;;  %v56_v10 = vld [vmem:[%s9479_s1 + $0x10] sm:$0xff]  ;;  %v57_v12 = vld [vmem:[%s9479_s1 + $0x18] sm:$0xff] }
   0x6   :  { %315 = vst.msk [vmem:[#allocation2 + $0x90] sm:$0xff] %vm295_vm2, %v6911_v5  ;;  %317 = vst.msk [vmem:[#allocation2 + $0xa0] sm:$0xff] %vm295_vm2, %v6911_v5  ;;  %383 = vrot.lane.b32.xlu1 %v56_v10, %s6912_s28  ;;  %v6489_v17 = vld [vmem:[%s9478_s0 + $0x18] sm:$0xff]   ;;  %v60_v20 = vld [vmem:[%s9479_s1 + $0x30] sm:$0xff] }
   0x7   :  { %6422 = vmatpush3.bf16.msra.mxu0 %v6484_v1  ;;  %319 = vst.msk [vmem:[#allocation2 + $0xb0] sm:$0xff] %vm295_vm2, %v6911_v5  ;;  %321 = vst.msk [vmem:[#allocation2 + $0xc0] sm:$0xff] %vm295_vm2, %v6911_v5  ;;  %v59_v21 = vld [vmem:[%s9479_s1 + $0x28] sm:$0xff]  ;;  %v6490_v25 = vld [vmem:[%s9478_s0 + $0x20] sm:$0xff]  }
   0x8   :  { %323 = vst.msk [vmem:[#allocation2 + $0xd0] sm:$0xff] %vm295_vm2, %v6911_v5  ;;  %325 = vst.msk [vmem:[#allocation2 + $0xe0] sm:$0xff] %vm295_vm2, %v6911_v5  ;;  %6423 = vmatprep.subr.bf16.mxu0 %v6485_v4  ;;  %381 = vrot.lane.b32.xlu0 %v55_v8, %s6912_s28  ;;  %v63_v29 = vld [vmem:[%s9479_s1 + $0x48] sm:$0xff]  ;;  %v62_v30 = vld [vmem:[%s9479_s1 + $0x40] sm:$0xff] }
   0x9   :  { %327 = vst.msk [vmem:[#allocation2 + $0xf0] sm:$0xff] %vm295_vm2, %v6911_v5  ;;  %329 = vst.msk [vmem:[#allocation2 + $0x100] sm:$0xff] %vm295_vm2, %v6911_v5  ;;  %v445_v13 = vld [vmem:[#allocation2 + $0x10] sm:$0xff]  ;;  %v6491_v35 = vld [vmem:[%s9478_s0 + $0x28] sm:$0xff]  }
   0xa   :  { %331 = vst.msk [vmem:[#allocation2 + $0x110] sm:$0xff] %vm295_vm2, %v6911_v5  ;;  %333 = vst.msk [vmem:[#allocation2 + $0x120] sm:$0xff] %vm295_vm2, %v6911_v5  ;;  %v5793_v14 = vpack.c.bf16 %v445_v13, %v445_v13  ;;  %385 = vrot.lane.b32.xlu1 %v57_v12, %s6912_s28  ;;  %v65_v36 = vld [vmem:[%s9479_s1 + $0x58] sm:$0xff]  ;;  %v64_v37 = vld [vmem:[%s9479_s1 + $0x50] sm:$0xff] }
   0xb   :  { %335 = vst.msk [vmem:[#allocation2 + $0x130] sm:$0xff] %vm295_vm2, %v6911_v5  ;;  %337 = vst.msk [vmem:[#allocation2 + $0x140] sm:$0xff] %vm295_vm2, %v6911_v5  ;;  %6424 = vmatpush3.bf16.msra.mxu0 %v6485_v4  ;;  %v6492_v38 = vld [vmem:[%s9478_s0 + $0x30] sm:$0xff]   ;;  %v67_v39 = vld [vmem:[%s9479_s1 + $0x68] sm:$0xff] }
   0xc   :  { %339 = vst.msk [vmem:[#allocation2 + $0x150] sm:$0xff] %vm295_vm2, %v6911_v5  ;;  %341 = vst.msk [vmem:[#allocation2 + $0x160] sm:$0xff] %vm295_vm2, %v6911_v5  ;;  %387 = vrot.lane.b32.xlu0 %v58_v11, %s6912_s28  ;;  %v66_v40 = vld [vmem:[%s9479_s1 + $0x60] sm:$0xff]  ;;  %v6493_v42 = vld [vmem:[%s9478_s0 + $0x38] sm:$0xff]  }
   0xd   :  { %343 = vst.msk [vmem:[#allocation2 + $0x170] sm:$0xff] %vm295_vm2, %v6911_v5  ;;  %v68_v43 = vld [vmem:[%s9479_s1 + $0x70] sm:$0xff]  ;;  %v61_v50 = vld [vmem:[%s9479_s1 + $0x38] sm:$0xff]  ;;  %v444_v53 = vld [vmem:[#allocation2] sm:$0xff] }
   0xe   :  { %298 = vst.msk [vmem:[#allocation2 + $0x8] sm:$0xf] %vm297_vm3, %v6911_v5  ;;  %300 = vst.msk [vmem:[#allocation2 + $0x18] sm:$0xf] %vm297_vm3, %v6911_v5  ;;  %6426 = vmatmul.mubr.msk.bf16.vlgmr.msra.gmra.mxu0 %vm153_vm1, %v6487_v7  ;;  %389 = vrot.lane.b32.xlu1 %v59_v21, %s6912_s28  ;;  %v69_v52 = vld [vmem:[%s9479_s1 + $0x78] sm:$0xff]  ;;  %v5792_v54 = vpack.c.bf16 %v444_v53, %v444_v53 }
   0xf   :  { %302 = vst.msk [vmem:[#allocation2 + $0x28] sm:$0xf] %vm297_vm3, %v6911_v5  ;;  %304 = vst.msk [vmem:[#allocation2 + $0x38] sm:$0xf] %vm297_vm3, %v6911_v5  ;;  %6429 = vmatprep.mubr.msk.bf16.mxu0 %vm153_vm1, %v6488_v9  ;;  %v457_v24 = vld [vmem:[#allocation2 + $0xd0] sm:$0xff] }
  0x10   :  { %306 = vst.msk [vmem:[#allocation2 + $0x48] sm:$0xf] %vm297_vm3, %v6911_v5  ;;  %308 = vst.msk [vmem:[#allocation2 + $0x58] sm:$0xf] %vm297_vm3, %v6911_v5  ;;  %v5801_v26 = vpack.c.bf16 %v457_v24, %v457_v24  ;;  %391 = vrot.lane.b32.xlu0 %v60_v20, %s6912_s28 }
  0x11   :  { %310 = vst.msk [vmem:[#allocation2 + $0x68] sm:$0xf] %vm297_vm3, %v6911_v5  ;;  %312 = vst.msk [vmem:[#allocation2 + $0x78] sm:$0xf] %vm297_vm3, %v6911_v5 }
  0x12   :  { %314 = vst.msk [vmem:[#allocation2 + $0x88] sm:$0xf] %vm297_vm3, %v6911_v5  ;;  %316 = vst.msk [vmem:[#allocation2 + $0x98] sm:$0xf] %vm297_vm3, %v6911_v5  ;;  %395 = vrot.lane.b32.xlu1 %v62_v30, %s6912_s28 }
  0x13   :  { %318 = vst.msk [vmem:[#allocation2 + $0xa8] sm:$0xf] %vm297_vm3, %v6911_v5  ;;  %320 = vst.msk [vmem:[#allocation2 + $0xb8] sm:$0xf] %vm297_vm3, %v6911_v5 }
  0x14   :  { %322 = vst.msk [vmem:[#allocation2 + $0xc8] sm:$0xf] %vm297_vm3, %v6911_v5  ;;  %324 = vst.msk [vmem:[#allocation2 + $0xd8] sm:$0xf] %vm297_vm3, %v6911_v5  ;;  %397 = vrot.lane.b32.xlu0 %v63_v29, %s6912_s28 }
  0x15   :  { %326 = vst.msk [vmem:[#allocation2 + $0xe8] sm:$0xf] %vm297_vm3, %v6911_v5  ;;  %328 = vst.msk [vmem:[#allocation2 + $0xf8] sm:$0xf] %vm297_vm3, %v6911_v5  ;;  %v1094_v15 = vld [vmem:[#allocation2 + $0x12] sm:$0xff]  ;;  %v765_v41 = vld [vmem:[#allocation2 + $0x1] sm:$0xff] }
  0x16   :  { %330 = vst.msk [vmem:[#allocation2 + $0x108] sm:$0xf] %vm297_vm3, %v6911_v5  ;;  %332 = vst.msk [vmem:[#allocation2 + $0x118] sm:$0xf] %vm297_vm3, %v6911_v5  ;;  %v7067_v16 = vpack.c.bf16 %v1094_v15, %v1094_v15  ;;  %v766_v18 = vld [vmem:[#allocation2 + $0x11] sm:$0xff]  ;;  %6430 = vmatmul.mubr.msk.bf16.gmra.mxu0 %vm153_vm1, %v6489_v17  ;;  %399 = vrot.lane.b32.xlu1 %v64_v37, %s6912_s28  ;;  %v5836_v44 = vpack.c.bf16 %v765_v41, %v765_v41  ;;  %v1413_v45 = vld [vmem:[#allocation2 + $0x3] sm:$0xff] }
  0x17   :  { %334 = vst.msk [vmem:[#allocation2 + $0x128] sm:$0xf] %vm297_vm3, %v6911_v5  ;;  %336 = vst.msk [vmem:[#allocation2 + $0x138] sm:$0xf] %vm297_vm3, %v6911_v5  ;;  %v1414_v19 = vld [vmem:[#allocation2 + $0x13] sm:$0xff]  ;;  %v5837_v22 = vpack.c.bf16 %v766_v18, %v766_v18  ;;  %6433 = vmatprep.mubr.msk.bf16.mxu0 %vm153_vm1, %v6490_v25  ;;  %v5924_v46 = vpack.c.bf16 %v1413_v45, %v1413_v45 }
  0x18   :  { %338 = vst.msk [vmem:[#allocation2 + $0x148] sm:$0xf] %vm297_vm3, %v6911_v5  ;;  %340 = vst.msk [vmem:[#allocation2 + $0x158] sm:$0xf] %vm297_vm3, %v6911_v5  ;;  %v5925_v23 = vpack.c.bf16 %v1414_v19, %v1414_v19  ;;  %401 = vrot.lane.b32.xlu0 %v65_v36, %s6912_s28 }
  0x19   :  { %342 = vst.msk [vmem:[#allocation2 + $0x168] sm:$0xf] %vm297_vm3, %v6911_v5  ;;  %344 = vst.msk [vmem:[#allocation2 + $0x178] sm:$0xf] %vm297_vm3, %v6911_v5 }
  0x1a   :  { %533 = vst.msk [vmem:[#allocation3 + $0x34] sm:$0xf] %vm297_vm3, %v5793_v14  ;;  %1182 = vst.msk [vmem:[#allocation3 + $0x38] sm:$0xf] %vm297_vm3, %v7067_v16  ;;  %403 = vrot.lane.b32.xlu1 %v66_v40, %s6912_s28 }
  0x1b   :  { %v1106_v27 = vld [vmem:[#allocation2 + $0xd2] sm:$0xff]  ;;  %965 = vst.msk [vmem:[#allocation3 + $0xc] sm:$0xf] %vm297_vm3, %v5837_v22  ;;  %1613 = vst.msk [vmem:[#allocation3 + $0x10] sm:$0xf] %vm297_vm3, %v5925_v23  ;;  %v777_v47 = vld [vmem:[#allocation2 + $0xc1] sm:$0xff] }
  0x1c   :  { %v778_v28 = vld [vmem:[#allocation2 + $0xd1] sm:$0xff]  ;;  %v5889_v31 = vpack.c.bf16 %v1106_v27, %v1106_v27  ;;  %541 = vst.msk [vmem:[#allocation3 + $0x1d4] sm:$0xf] %vm297_vm3, %v5801_v26  ;;  %405 = vrot.lane.b32.xlu0 %v67_v39, %s6912_s28  ;;  %v5844_v48 = vpack.c.bf16 %v777_v47, %v777_v47  ;;  %v1425_v49 = vld [vmem:[#allocation2 + $0xc3] sm:$0xff] }
  0x1d   :  { %v5845_v32 = vpack.c.bf16 %v778_v28, %v778_v28  ;;  %v1426_v33 = vld [vmem:[#allocation2 + $0xd3] sm:$0xff]  ;;  %v5932_v51 = vpack.c.bf16 %v1425_v49, %v1425_v49 }
  0x1e   :  { %v5933_v34 = vpack.c.bf16 %v1426_v33, %v1426_v33  ;;  %1190 = vst.msk [vmem:[#allocation3 + $0x1d8] sm:$0xf] %vm297_vm3, %v5889_v31  ;;  %6434 = vmatmul.mubr.msk.bf16.gmra.mxu0 %vm153_vm1, %v6491_v35  ;;  %407 = vrot.lane.b32.xlu1 %v68_v43, %s6912_s28 }
  0x1f   :  { %973 = vst.msk [vmem:[#allocation3 + $0x1ac] sm:$0xf] %vm297_vm3, %v5845_v32  ;;  %6437 = vmatprep.mubr.msk.bf16.mxu0 %vm153_vm1, %v6492_v38 }
  0x20   :  { %1621 = vst.msk [vmem:[#allocation3 + $0x1b0] sm:$0xf] %vm297_vm3, %v5933_v34  ;;  %837 = vrot.lane.b32.xlu0 %v5836_v44, %s6913_s29 }
  0x22   :  { %839 = vrot.lane.b32.xlu1 %v5837_v22, %s6913_s29 }
  0x24   :  { %1485 = vrot.lane.b32.xlu0 %v5924_v46, %s6913_s29 }
  0x26   :  { %6438 = vmatmul.mubr.msk.bf16.gmra.mxu0 %vm153_vm1, %v6493_v42  ;;  %1487 = vrot.lane.b32.xlu1 %v5925_v23, %s6913_s29 }
  0x28   :  { %596 = vrot.lane.b32.xlu0 %v5793_v14, %s6913_s29 }
  0x2a   :  { %853 = vrot.lane.b32.xlu1 %v5844_v48, %s6913_s29 }
  0x2c   :  { %1245 = vrot.lane.b32.xlu0 %v7067_v16, %s6913_s29 }
  0x2e   :  { %1501 = vrot.lane.b32.xlu1 %v5932_v51, %s6913_s29 }
  0x30   :  { %393 = vrot.lane.b32.xlu0 %v61_v50, %s6912_s28 }
  0x32   :  { %612 = vrot.lane.b32.xlu1 %v5801_v26, %s6913_s29 }
  0x34   :  { %855 = vrot.lane.b32.xlu0 %v5845_v32, %s6913_s29 }
  0x36   :  { %1261 = vrot.lane.b32.xlu1 %v5889_v31, %s6913_s29 }
  0x38   :  { %1503 = vrot.lane.b32.xlu0 %v5933_v34, %s6913_s29 }
  0x3a   :  { %409 = vrot.lane.b32.xlu1 %v69_v52, %s6912_s28 }
  0x3b   :  { %18 = vsyncpa [#allocation7], 0  ;;  %532 = vst.msk [vmem:[#allocation3] sm:$0xf] %vm297_vm3, %v5792_v54  ;;  %v1093_v55 = vld [vmem:[#allocation2 + $0x2] sm:$0xff]  ;;  %vm644_vm4 = vcmask 1043968  }
  0x3c   :  { %v5880_v56 = vpack.c.bf16 %v1093_v55, %v1093_v55  ;;  %v456_v4 = vld [vmem:[#allocation2 + $0xc0] sm:$0xff]  ;;  %v6494_v9 = vld [vmem:[%s9483_s5 + $0x78] sm:$0xff]   ;;  %v6496_v15 = vld [vmem:[%s9483_s5 + $0x70] sm:$0xff]   ;;  %vm346_vm5 = vcmask 261120   ;;  %vm427_vm6 = vcmask 523520   ;;  %s6914_s1 = smov 96  }
  0x3d   :  { %v5800_v7 = vpack.c.bf16 %v456_v4, %v456_v4  ;;  %v1105_v8 = vld [vmem:[#allocation2 + $0xc2] sm:$0xff]  ;;  %v6495_v10 = vld [vmem:[%s9483_s5 + $0x38] sm:$0xff]   ;;  %6023 = vmatprep.subr.bf16.mxu1 %v6494_v9  ;;  %v6497_v16 = vld [vmem:[%s9483_s5 + $0x30] sm:$0xff]  }
  0x3e   :  { %1181 = vst.msk [vmem:[#allocation3 + $0x4] sm:$0xf] %vm297_vm3, %v5880_v56  ;;  %v5888_v13 = vpack.c.bf16 %v1105_v8, %v1105_v8  ;;  %6024 = vmatpush3.bf16.msra.mxu1 %v6495_v10  ;;  %v1741_v14 = vld [vmem:[#allocation2 + $0x4] sm:$0xff]  ;;  %v6502_v29 = vld [vmem:[%s9483_s5 + $0x58] sm:$0xff]   ;;  %v6504_v33 = vld [vmem:[%s9483_s5 + $0x50] sm:$0xff]  }
  0x3f   :  { %540 = vst.msk [vmem:[#allocation3 + $0x1a0] sm:$0xf] %vm297_vm3, %v5800_v7  ;;  %6025 = vmatprep.subr.bf16.mxu1 %v6496_v15  ;;  %v5968_v19 = vpack.c.bf16 %v1741_v14, %v1741_v14  ;;  %v6498_v20 = vld [vmem:[%s9483_s5 + $0x68] sm:$0xff]   ;;  %v6500_v24 = vld [vmem:[%s9483_s5 + $0x60] sm:$0xff]   ;;  %v6503_v30 = vld [vmem:[%s9483_s5 + $0x18] sm:$0xff]  }
  0x40   :  { %1189 = vst.msk [vmem:[#allocation3 + $0x1a4] sm:$0xf] %vm297_vm3, %v5888_v13  ;;  %v6499_v21 = vld [vmem:[%s9483_s5 + $0x28] sm:$0xff]   ;;  %v6501_v25 = vld [vmem:[%s9483_s5 + $0x20] sm:$0xff]   ;;  %v6505_v34 = vld [vmem:[%s9483_s5 + $0x10] sm:$0xff]  }
  0x41   :  { %v1753_v28 = vld [vmem:[#allocation2 + $0xc4] sm:$0xff]  ;;  %v6513_v46 = vld [vmem:[%s9483_s5 + $0xf8] sm:$0xff]   ;;  %v6515_v48 = vld [vmem:[%s9483_s5 + $0xf0] sm:$0xff]  }
  0x42   :  { %6026 = vmatpush3.bf16.msra.mxu1 %v6497_v16  ;;  %v5976_v32 = vpack.c.bf16 %v1753_v28, %v1753_v28  ;;  %v6506_v36 = vld [vmem:[%s9483_s5 + $0x48] sm:$0xff]   ;;  %v6508_v40 = vld [vmem:[%s9483_s5 + $0x40] sm:$0xff]   ;;  %v6514_v47 = vld [vmem:[%s9483_s5 + $0xb8] sm:$0xff]   ;;  %6087 = vmatprep.subr.bf16.mxu0 %v6513_v46 }
  0x43   :  { %6027 = vmatprep.subr.bf16.mxu1 %v6498_v20  ;;  %v6507_v37 = vld [vmem:[%s9483_s5 + $0x8] sm:$0xff]   ;;  %v6509_v41 = vld [vmem:[%s9483_s5] sm:$0xff]   ;;  %6088 = vmatpush3.bf16.msra.mxu0 %v6514_v47  ;;  %v6516_v49 = vld [vmem:[%s9483_s5 + $0xb0] sm:$0xff]  }
  0x44   :  { %v7268_v50 = vld [vmem:[%s9482_s4] ss:$0 sm:$0xff]  ;;  %6089 = vmatprep.subr.bf16.mxu0 %v6515_v48  ;;  %v6517_v52 = vld [vmem:[%s9483_s5 + $0xe8] sm:$0xff]  }
  0x45   :  { %v6518_v54 = vld [vmem:[%s9483_s5 + $0xa8] sm:$0xff]   ;;  %v6519_v8 = vld [vmem:[%s9483_s5 + $0xe0] sm:$0xff]  }
  0x46   :  { %6028 = vmatpush3.bf16.msra.mxu1 %v6499_v21  ;;  %v6525_v48 = vld [vmem:[%s9483_s5 + $0xc8] sm:$0xff]  }
  0x47   :  { %6029 = vmatprep.subr.bf16.mxu1 %v6500_v24  ;;  %6090 = vmatpush3.bf16.msra.mxu0 %v6516_v49 }
  0x48   :  { %6091 = vmatprep.subr.bf16.mxu0 %v6517_v52 }
  0x4a   :  { %6030 = vmatpush3.bf16.msra.mxu1 %v6501_v25  ;;  %v6523_v25 = vld [vmem:[%s9483_s5 + $0xd0] sm:$0xff]  }
  0x4b   :  { %6031 = vmatprep.subr.bf16.mxu1 %v6502_v29  ;;  %6092 = vmatpush3.bf16.msra.mxu0 %v6518_v54 }
  0x4c   :  { %6093 = vmatprep.subr.bf16.mxu0 %v6519_v8 }
  0x4e   :  { %6032 = vmatpush3.bf16.msra.mxu1 %v6503_v30 }
  0x4f   :  { %6033 = vmatprep.subr.bf16.mxu1 %v6504_v33 }
  0x52   :  { %6034 = vmatpush3.bf16.msra.mxu1 %v6505_v34 }
  0x53   :  { %6035 = vmatprep.subr.bf16.mxu1 %v6506_v36 }
  0x56   :  { %6036 = vmatpush3.bf16.msra.mxu1 %v6507_v37 }
  0x57   :  { %6037 = vmatprep.subr.bf16.mxu1 %v6508_v40 }
  0x5a   :  { %6038 = vmatpush3.bf16.msra.mxu1 %v6509_v41 }
  0x76   :  { %v7159_v57 = vpop.permute.xlu0 %379 }
  0x78   :  { %v7163_v59 = vpop.permute.xlu1 %383 }
  0x7a   :  { %v7161_v58 = vpop.permute.xlu0 %381 }
  0x7c   :  { %v7167_v61 = vpop.permute.xlu1 %385 }
  0x7e   :  { %v7165_v60 = vpop.permute.xlu0 %387 }
  0x80   :  { %v7171_v63 = vpop.permute.xlu1 %389 }
  0x82   :  { %v7169_v62 = vpop.permute.xlu0 %391 }
  0x84   :  { %v7175_v1 = vpop.permute.xlu1 %395 }
  0x86   :  { %v7173_v0 = vpop.permute.xlu0 %397 }
  0x88   :  { %v7179_v3 = vpop.permute.xlu1 %399 }
  0x8a   :  { %v7177_v2 = vpop.permute.xlu0 %401 }
  0x8c   :  { %v7183_v6 = vpop.permute.xlu1 %403 }
  0x8e   :  { %v7181_v5 = vpop.permute.xlu0 %405 }
  0x90   :  { %v7192_v12 = vpop.permute.xlu1 %407 }
  0x92   :  { %v838_v11 = vpop.permute.xlu0 %837 }
  0x93   :  { %885 = vst.msk [vmem:[#allocation3] sm:$0xf] %vm644_vm4, %v838_v11  ;;  %v6520_v11 = vld [vmem:[%s9483_s5 + $0xa0] sm:$0xff]  }
  0x94   :  { %v840_v18 = vpop.permute.xlu1 %839  ;;  %6094 = vmatpush3.bf16.msra.mxu0 %v6520_v11 }
  0x95   :  { %886 = vst.msk [vmem:[#allocation3 + $0x34] sm:$0xf] %vm644_vm4, %v840_v18 }
  0x96   :  { %v1486_v17 = vpop.permute.xlu0 %1485 }
  0x97   :  { %1533 = vst.msk [vmem:[#allocation3 + $0x4] sm:$0xf] %vm644_vm4, %v1486_v17  ;;  %v6521_v17 = vld [vmem:[%s9483_s5 + $0xd8] sm:$0xff]  }
  0x98   :  { %v1488_v23 = vpop.permute.xlu1 %1487  ;;  %6095 = vmatprep.subr.bf16.mxu0 %v6521_v17 }
  0x99   :  { %1534 = vst.msk [vmem:[#allocation3 + $0x38] sm:$0xf] %vm644_vm4, %v1488_v23 }
  0x9a   :  { %v597_v22 = vpop.permute.xlu0 %596 }
  0x9b   :  { %645 = vst.msk [vmem:[#allocation3 + $0x8] sm:$0xf] %vm644_vm4, %v597_v22 }
  0x9c   :  { %1829 = vst.msk [vmem:[#allocation3 + $0x8] sm:$0xf] %vm297_vm3, %v5968_v19  ;;  %v854_v27 = vpop.permute.xlu1 %853  ;;  %v6510_v42 = vld [vmem:[#allocation3] ss:$52 sps:$4 sm:$0xff]   ;;  %v6522_v19 = vld [vmem:[%s9483_s5 + $0x98] sm:$0xff]  }
  0x9d   :  { %893 = vst.msk [vmem:[#allocation3 + $0x1a0] sm:$0xf] %vm644_vm4, %v854_v27  ;;  %6096 = vmatpush3.bf16.msra.mxu0 %v6522_v19 }
  0x9e   :  { %v1246_v26 = vpop.permute.xlu0 %1245  ;;  %6097 = vmatprep.subr.bf16.mxu0 %v6523_v25 }
  0x9f   :  { %1293 = vst.msk [vmem:[#allocation3 + $0xc] sm:$0xf] %vm644_vm4, %v1246_v26 }
  0xa0   :  { %v1502_v31 = vpop.permute.xlu1 %1501  ;;  %v6512_v43 = vld [vmem:[#allocation3 + $0x4] ss:$52 sps:$4 sm:$0xff]  }
  0xa1   :  { %1541 = vst.msk [vmem:[#allocation3 + $0x1a4] sm:$0xf] %vm644_vm4, %v1502_v31  ;;  %3556 = vmatprep.mubr.bf16.mxu1 %v6512_v43 }
  0xa2   :  { %v7243_v39 = vpop.permute.xlu0 %393  ;;  %3557 = vmatmul.mubr.bf16.vlgmr.msra.gmra.mxu1 %v6510_v42 }
  0xa4   :  { %v613_v35 = vpop.permute.xlu1 %612 }
  0xa5   :  { %653 = vst.msk [vmem:[#allocation3 + $0x1a8] sm:$0xf] %vm644_vm4, %v613_v35  ;;  %v6524_v35 = vld [vmem:[%s9483_s5 + $0x90] sm:$0xff]  }
  0xa6   :  { %1837 = vst.msk [vmem:[#allocation3 + $0x1a8] sm:$0xf] %vm297_vm3, %v5976_v32  ;;  %v856_v44 = vpop.permute.xlu0 %855  ;;  %6098 = vmatpush3.bf16.msra.mxu0 %v6524_v35 }
  0xa7   :  { %894 = vst.msk [vmem:[#allocation3 + $0x1d4] sm:$0xf] %vm644_vm4, %v856_v44  ;;  %6099 = vmatprep.subr.bf16.mxu0 %v6525_v48 }
  0xa8   :  { %v1262_v38 = vpop.permute.xlu1 %1261 }
  0xa9   :  { %1301 = vst.msk [vmem:[#allocation3 + $0x1ac] sm:$0xf] %vm644_vm4, %v1262_v38 }
  0xaa   :  { %v1504_v45 = vpop.permute.xlu0 %1503 }
  0xab   :  { %1542 = vst.msk [vmem:[#allocation3 + $0x1d8] sm:$0xf] %vm644_vm4, %v1504_v45 }
  0xce   :  { %v6427_v51 = vpop.f32.mrf.mxu0 }
  0xcf   :  { %v225_v53 = vadd.f32 %v6427_v51, %v7268_v50 }
  0xd0   :  { %v216_v55 = vpop.f32.mrf.mxu0 }
  0xd1   :  { %v281_v56 = vmax.f32 %v225_v53, 0.0  ;;  %v217_v4 = vadd.f32 %v7268_v50, %v216_v55 }
  0xd2   :  { %v6428_v7 = vpop.f32.mrf.mxu0 }
  0xd3   :  { %v279_v9 = vmax.f32 %v217_v4, 0.0  ;;  %349 = vst.msk [vmem:[#allocation2 + $0x42] sm:$0xff] %vm346_vm5, %v281_v56  ;;  %v228_v10 = vadd.f32 %v6428_v7, %v7268_v50 }
  0xd4   :  { %430 = vst.msk [vmem:[#allocation2 + $0x42] sm:$0xff] %vm427_vm6, %v7163_v59  ;;  %v219_v13 = vpop.f32.mrf.mxu0 }
  0xd5   :  { %347 = vst.msk [vmem:[#allocation2 + $0x22] sm:$0xff] %vm346_vm5, %v279_v9  ;;  %v282_v14 = vmax.f32 %v228_v10, 0.0  ;;  %v220_v15 = vadd.f32 %v7268_v50, %v219_v13  ;;  %v6526_v10 = vld [vmem:[%s9483_s5 + $0x88] sm:$0xff]  }
  0xd6   :  { %428 = vst.msk [vmem:[#allocation2 + $0x22] sm:$0xff] %vm427_vm6, %v7159_v57  ;;  %v6431_v16 = vpop.f32.mrf.mxu0  ;;  %v454_v57 = vld [vmem:[#allocation2 + $0xa0] sm:$0xff]  ;;  %6100 = vmatpush3.bf16.msra.mxu0 %v6526_v10 }
  0xd7   :  { %350 = vst.msk [vmem:[#allocation2 + $0x52] sm:$0xff] %vm346_vm5, %v282_v14  ;;  %v280_v18 = vmax.f32 %v220_v15, 0.0  ;;  %v241_v59 = vadd.f32 %v6431_v16, %v7268_v50  ;;  %v7304_v23 = vpack.c.bf16 %v454_v57, %v454_v57 }
  0xd8   :  { %431 = vst.msk [vmem:[#allocation2 + $0x52] sm:$0xff] %vm427_vm6, %v7167_v61  ;;  %v232_v20 = vpop.f32.mrf.mxu0 }
  0xd9   :  { %348 = vst.msk [vmem:[#allocation2 + $0x32] sm:$0xff] %vm346_vm5, %v280_v18  ;;  %v285_v21 = vmax.f32 %v241_v59, 0.0  ;;  %v233_v22 = vadd.f32 %v7268_v50, %v232_v20 }
  0xda   :  { %429 = vst.msk [vmem:[#allocation2 + $0x32] sm:$0xff] %vm427_vm6, %v7161_v58  ;;  %v6432_v24 = vpop.f32.mrf.mxu0 }
  0xdb   :  { %353 = vst.msk [vmem:[#allocation2 + $0x82] sm:$0xff] %vm346_vm5, %v285_v21  ;;  %v769_v61 = vld [vmem:[#allocation2 + $0x41] sm:$0xff]  ;;  %v283_v27 = vmax.f32 %v233_v22, 0.0  ;;  %v244_v28 = vadd.f32 %v6432_v24, %v7268_v50 }
  0xdc   :  { %v448_v26 = vld [vmem:[#allocation2 + $0x40] sm:$0xff]  ;;  %755 = vst.msk [vmem:[#allocation3 + $0x160] sm:$0xf] %vm297_vm3, %v7304_v23  ;;  %v5840_v58 = vpack.c.bf16 %v769_v61, %v769_v61  ;;  %v235_v33 = vpop.f32.mrf.mxu0 }
  0xdd   :  { %v1417_v29 = vld [vmem:[#allocation2 + $0x43] sm:$0xff]  ;;  %434 = vst.msk [vmem:[#allocation2 + $0x82] sm:$0xff] %vm427_vm6, %v7169_v62  ;;  %v5796_v30 = vpack.c.bf16 %v448_v26, %v448_v26  ;;  %v286_v36 = vmax.f32 %v244_v28, 0.0  ;;  %v236_v38 = vadd.f32 %v7268_v50, %v235_v33 }
  0xde   :  { %v7317_v31 = vpack.c.bf16 %v1417_v29, %v1417_v29  ;;  %v1097_v32 = vld [vmem:[#allocation2 + $0x42] sm:$0xff]  ;;  %351 = vst.msk [vmem:[#allocation2 + $0x62] sm:$0xff] %vm346_vm5, %v283_v27  ;;  %845 = vrot.lane.b32.xlu0 %v5840_v58, %s6913_s29  ;;  %v6435_v47 = vpop.f32.mrf.mxu0 }
  0xdf   :  { %v1745_v34 = vld [vmem:[#allocation2 + $0x44] sm:$0xff]  ;;  %v5884_v37 = vpack.c.bf16 %v1097_v32, %v1097_v32  ;;  %968 = vst.msk [vmem:[#allocation3 + $0xa8] sm:$0xf] %vm297_vm3, %v5840_v58  ;;  %1038 = vst.msk [vmem:[#allocation3 + $0x54] sm:$0xf] %vm297_vm3, %v5840_v58  ;;  %602 = vrot.lane.b32.xlu1 %v5796_v30, %s6913_s29  ;;  %v770_v51 = vld [vmem:[#allocation2 + $0x51] sm:$0xff]  ;;  %v257_v54 = vadd.f32 %v6435_v47, %v7268_v50 }
  0xe0   :  { %v767_v40 = vld [vmem:[#allocation2 + $0x21] sm:$0xff]  ;;  %v7324_v42 = vpack.c.bf16 %v1745_v34, %v1745_v34  ;;  %536 = vst.msk [vmem:[#allocation3 + $0xd0] sm:$0xf] %vm297_vm3, %v5796_v30  ;;  %679 = vst.msk [vmem:[#allocation3 + $0x7c] sm:$0xf] %vm297_vm3, %v5796_v30  ;;  %v1418_v52 = vld [vmem:[#allocation2 + $0x53] sm:$0xff]  ;;  %v7367_v55 = vpack.c.bf16 %v770_v51, %v770_v51  ;;  %v248_v7 = vpop.f32.mrf.mxu0 }
  0xe1   :  { %v446_v62 = vld [vmem:[#allocation2 + $0x20] sm:$0xff]  ;;  %749 = vst.msk [vmem:[#allocation3 + $0x28] sm:$0xf] %vm297_vm3, %v5796_v30  ;;  %1616 = vst.msk [vmem:[#allocation3 + $0xac] sm:$0xf] %vm297_vm3, %v7317_v31  ;;  %v7339_v43 = vpack.c.bf16 %v767_v40, %v767_v40  ;;  %v449_v53 = vld [vmem:[#allocation2 + $0x50] sm:$0xff]  ;;  %v7369_v56 = vpack.c.bf16 %v1418_v52, %v1418_v52  ;;  %v249_v14 = vadd.f32 %v7268_v50, %v248_v7 }
  0xe2   :  { %v1415_v41 = vld [vmem:[#allocation2 + $0x23] sm:$0xff]  ;;  %432 = vst.msk [vmem:[#allocation2 + $0x62] sm:$0xff] %vm427_vm6, %v7165_v60  ;;  %v7341_v44 = vpack.c.bf16 %v446_v62, %v446_v62  ;;  %v284_v60 = vmax.f32 %v236_v38, 0.0  ;;  %v7371_v4 = vpack.c.bf16 %v449_v53, %v449_v53  ;;  %v1098_v8 = vld [vmem:[#allocation2 + $0x52] sm:$0xff]  ;;  %v289_v13 = vmax.f32 %v257_v54, 0.0  ;;  %1493 = vrot.lane.b32.xlu0 %v7317_v31, %s6913_s29 }
  0xe3   :  { %1686 = vst.msk [vmem:[#allocation3 + $0x58] sm:$0xf] %vm297_vm3, %v7317_v31  ;;  %v7343_v45 = vpack.c.bf16 %v1415_v41, %v1415_v41  ;;  %v1095_v46 = vld [vmem:[#allocation2 + $0x22] sm:$0xff]  ;;  %1185 = vst.msk [vmem:[#allocation3 + $0xd4] sm:$0xf] %vm297_vm3, %v5884_v37  ;;  %v1746_v9 = vld [vmem:[#allocation2 + $0x54] sm:$0xff]  ;;  %v7382_v15 = vpack.c.bf16 %v1098_v8, %v1098_v8  ;;  %1251 = vrot.lane.b32.xlu1 %v5884_v37, %s6913_s29 }
  0xe4   :  { %354 = vst.msk [vmem:[#allocation2 + $0x92] sm:$0xff] %vm346_vm5, %v286_v36  ;;  %v7352_v49 = vpack.c.bf16 %v1095_v46, %v1095_v46  ;;  %352 = vst.msk [vmem:[#allocation2 + $0x72] sm:$0xff] %vm346_vm5, %v284_v60  ;;  %v1096_v11 = vld [vmem:[#allocation2 + $0x32] sm:$0xff]  ;;  %v7384_v17 = vpack.c.bf16 %v1746_v9, %v1746_v9  ;;  %v452_v57 = vld [vmem:[#allocation2 + $0x80] sm:$0xff]  ;;  %v287_v21 = vmax.f32 %v249_v14, 0.0 }
  0xe5   :  { %1327 = vst.msk [vmem:[#allocation3 + $0x80] sm:$0xf] %vm297_vm3, %v5884_v37  ;;  %1397 = vst.msk [vmem:[#allocation3 + $0x2c] sm:$0xf] %vm297_vm3, %v5884_v37  ;;  %v768_v16 = vld [vmem:[#allocation2 + $0x31] sm:$0xff]  ;;  %v7397_v59 = vpack.c.bf16 %v1096_v11, %v1096_v11  ;;  %v1101_v22 = vld [vmem:[#allocation2 + $0x82] sm:$0xff]  ;;  %v7431_v26 = vpack.c.bf16 %v452_v57, %v452_v57 }
  0xe6   :  { %2045 = vst.msk [vmem:[#allocation3 + $0x30] sm:$0xf] %vm297_vm3, %v7324_v42  ;;  %966 = vst.msk [vmem:[#allocation3 + $0x40] sm:$0xf] %vm297_vm3, %v7339_v43  ;;  %v7409_v19 = vpack.c.bf16 %v768_v16, %v768_v16  ;;  %v1416_v20 = vld [vmem:[#allocation2 + $0x33] sm:$0xff]  ;;  %v773_v61 = vld [vmem:[#allocation2 + $0x81] sm:$0xff]  ;;  %v7433_v27 = vpack.c.bf16 %v1101_v22, %v1101_v22  ;;  %841 = vrot.lane.b32.xlu0 %v7339_v43, %s6913_s29 }
  0xe7   :  { %534 = vst.msk [vmem:[#allocation3 + $0x68] sm:$0xf] %vm297_vm3, %v7341_v44  ;;  %677 = vst.msk [vmem:[#allocation3 + $0x14] sm:$0xf] %vm297_vm3, %v7341_v44  ;;  %v7419_v25 = vpack.c.bf16 %v1416_v20, %v1416_v20  ;;  %v7441_v29 = vpack.c.bf16 %v773_v61, %v773_v61  ;;  %v1749_v58 = vld [vmem:[#allocation2 + $0x84] sm:$0xff]  ;;  %598 = vrot.lane.b32.xlu1 %v7341_v44, %s6913_s29 }
  0xe8   :  { %1614 = vst.msk [vmem:[#allocation3 + $0x44] sm:$0xf] %vm297_vm3, %v7343_v45  ;;  %1183 = vst.msk [vmem:[#allocation3 + $0x6c] sm:$0xf] %vm297_vm3, %v7352_v49  ;;  %v1421_v30 = vld [vmem:[#allocation2 + $0x83] sm:$0xff]  ;;  %v7452_v36 = vpack.c.bf16 %v1749_v58, %v1749_v58 }
  0xe9   :  { %435 = vst.msk [vmem:[#allocation2 + $0x92] sm:$0xff] %vm427_vm6, %v7243_v39  ;;  %v447_v39 = vld [vmem:[#allocation2 + $0x30] sm:$0xff]  ;;  %433 = vst.msk [vmem:[#allocation2 + $0x72] sm:$0xff] %vm427_vm6, %v7171_v63  ;;  %v6436_v63 = vpop.f32.mrf.mxu0  ;;  %v6527_v31 = vld [vmem:[%s9483_s5 + $0xc0] sm:$0xff]   ;;  %v7454_v37 = vpack.c.bf16 %v1421_v30, %v1421_v30 }
  0xea   :  { %1325 = vst.msk [vmem:[#allocation3 + $0x18] sm:$0xf] %vm297_vm3, %v7352_v49  ;;  %v7391_v18 = vpack.c.bf16 %v447_v39, %v447_v39  ;;  %969 = vst.msk [vmem:[#allocation3 + $0xdc] sm:$0xf] %vm297_vm3, %v7367_v55  ;;  %v260_v24 = vadd.f32 %v6436_v63, %v7268_v50  ;;  %v450_v34 = vld [vmem:[#allocation2 + $0x60] sm:$0xff]  ;;  %6101 = vmatprep.subr.bf16.mxu0 %v6527_v31  ;;  %1489 = vrot.lane.b32.xlu0 %v7343_v45, %s6913_s29 }
  0xeb   :  { %1039 = vst.msk [vmem:[#allocation3 + $0x88] sm:$0xf] %vm297_vm3, %v7367_v55  ;;  %1617 = vst.msk [vmem:[#allocation3 + $0xe0] sm:$0xf] %vm297_vm3, %v7369_v56  ;;  %v251_v28 = vpop.f32.mrf.mxu0  ;;  %v1099_v35 = vld [vmem:[#allocation2 + $0x62] sm:$0xff]  ;;  %v7470_v38 = vpack.c.bf16 %v450_v34, %v450_v34  ;;  %1247 = vrot.lane.b32.xlu1 %v7352_v49, %s6913_s29 }
  0xec   :  { %1687 = vst.msk [vmem:[#allocation3 + $0x8c] sm:$0xf] %vm297_vm3, %v7369_v56  ;;  %537 = vst.msk [vmem:[#allocation3 + $0x104] sm:$0xf] %vm297_vm3, %v7371_v4  ;;  %v290_v32 = vmax.f32 %v260_v24, 0.0  ;;  %v252_v33 = vadd.f32 %v7268_v50, %v251_v28  ;;  %v7472_v40 = vpack.c.bf16 %v1099_v35, %v1099_v35  ;;  %v1419_v41 = vld [vmem:[#allocation2 + $0x63] sm:$0xff] }
  0xed   :  { %680 = vst.msk [vmem:[#allocation3 + $0xb0] sm:$0xf] %vm297_vm3, %v7371_v4  ;;  %750 = vst.msk [vmem:[#allocation3 + $0x5c] sm:$0xf] %vm297_vm3, %v7371_v4  ;;  %v6439_v43 = vpop.f32.mrf.mxu0  ;;  %v1747_v44 = vld [vmem:[#allocation2 + $0x64] sm:$0xff]  ;;  %v7484_v47 = vpack.c.bf16 %v1419_v41, %v1419_v41 }
  0xee   :  { %357 = vst.msk [vmem:[#allocation2 + $0x102] sm:$0xff] %vm346_vm5, %v289_v13  ;;  %355 = vst.msk [vmem:[#allocation2 + $0xe2] sm:$0xff] %vm346_vm5, %v287_v21  ;;  %v6528_v46 = vld [vmem:[%s9483_s5 + $0x80] sm:$0xff]   ;;  %v273_v48 = vadd.f32 %v6439_v43, %v7268_v50  ;;  %v7487_v60 = vpack.c.bf16 %v1747_v44, %v1747_v44  ;;  %600 = vrot.lane.b32.xlu0 %v7391_v18, %s6913_s29 }
  0xef   :  { %1186 = vst.msk [vmem:[#allocation3 + $0x108] sm:$0xf] %vm297_vm3, %v7382_v15  ;;  %1328 = vst.msk [vmem:[#allocation3 + $0xb4] sm:$0xf] %vm297_vm3, %v7382_v15  ;;  %6102 = vmatpush3.bf16.msra.mxu0 %v6528_v46  ;;  %847 = vrot.lane.b32.xlu1 %v7367_v55, %s6913_s29 }
  0xf0   :  { %1398 = vst.msk [vmem:[#allocation3 + $0x60] sm:$0xf] %vm297_vm3, %v7382_v15  ;;  %2046 = vst.msk [vmem:[#allocation3 + $0x64] sm:$0xf] %vm297_vm3, %v7384_v17  ;;  %v774_v51 = vld [vmem:[#allocation2 + $0x91] sm:$0xff]  ;;  %v293_v14 = vmax.f32 %v273_v48, 0.0 }
  0xf1   :  { %535 = vst.msk [vmem:[#allocation3 + $0x9c] sm:$0xf] %vm297_vm3, %v7391_v18  ;;  %678 = vst.msk [vmem:[#allocation3 + $0x48] sm:$0xf] %vm297_vm3, %v7391_v18  ;;  %v453_v52 = vld [vmem:[#allocation2 + $0x90] sm:$0xff]  ;;  %v7513_v54 = vpack.c.bf16 %v774_v51, %v774_v51 }
  0xf2   :  { %1184 = vst.msk [vmem:[#allocation3 + $0xa0] sm:$0xf] %vm297_vm3, %v7397_v59  ;;  %1326 = vst.msk [vmem:[#allocation3 + $0x4c] sm:$0xf] %vm297_vm3, %v7397_v59  ;;  %v1422_v53 = vld [vmem:[#allocation2 + $0x93] sm:$0xff]  ;;  %v7515_v7 = vpack.c.bf16 %v453_v52, %v453_v52  ;;  %v410_v52 = vpop.permute.xlu1 %409  ;;  %1249 = vrot.lane.b32.xlu0 %v7397_v59, %s6913_s29 }
  0xf3   :  { %967 = vst.msk [vmem:[#allocation3 + $0x74] sm:$0xf] %vm297_vm3, %v7409_v19  ;;  %1037 = vst.msk [vmem:[#allocation3 + $0x20] sm:$0xf] %vm297_vm3, %v7409_v19  ;;  %v7517_v8 = vpack.c.bf16 %v1422_v53, %v1422_v53  ;;  %v1102_v9 = vld [vmem:[#allocation2 + $0x92] sm:$0xff]  ;;  %1495 = vrot.lane.b32.xlu1 %v7369_v56, %s6913_s29 }
  0xf4   :  { %438 = vst.msk [vmem:[#allocation2 + $0x102] sm:$0xff] %vm427_vm6, %v7179_v3  ;;  %v771_v3 = vld [vmem:[#allocation2 + $0x61] sm:$0xff]  ;;  %436 = vst.msk [vmem:[#allocation2 + $0xe2] sm:$0xff] %vm427_vm6, %v7175_v1  ;;  %v288_v1 = vmax.f32 %v252_v33, 0.0  ;;  %v1750_v10 = vld [vmem:[#allocation2 + $0x94] sm:$0xff]  ;;  %v7527_v63 = vpack.c.bf16 %v1102_v9, %v1102_v9 }
  0xf5   :  { %1615 = vst.msk [vmem:[#allocation3 + $0x78] sm:$0xf] %vm297_vm3, %v7419_v25  ;;  %1685 = vst.msk [vmem:[#allocation3 + $0x24] sm:$0xf] %vm297_vm3, %v7419_v25  ;;  %v7474_v62 = vpack.c.bf16 %v771_v3, %v771_v3  ;;  %v772_v39 = vld [vmem:[#allocation2 + $0x71] sm:$0xff]  ;;  %v7529_v20 = vpack.c.bf16 %v1750_v10, %v1750_v10 }
  0xf6   :  { %683 = vst.msk [vmem:[#allocation3 + $0x14c] sm:$0xf] %vm297_vm3, %v7431_v26  ;;  %753 = vst.msk [vmem:[#allocation3 + $0xf8] sm:$0xf] %vm297_vm3, %v7431_v26  ;;  %v1420_v11 = vld [vmem:[#allocation2 + $0x73] sm:$0xff]  ;;  %v7537_v57 = vpack.c.bf16 %v772_v39, %v772_v39  ;;  %610 = vrot.lane.b32.xlu0 %v7431_v26, %s6913_s29 }
  0xf7   :  { %1331 = vst.msk [vmem:[#allocation3 + $0x150] sm:$0xf] %vm297_vm3, %v7433_v27  ;;  %1401 = vst.msk [vmem:[#allocation3 + $0xfc] sm:$0xf] %vm297_vm3, %v7433_v27  ;;  %v451_v13 = vld [vmem:[#allocation2 + $0x70] sm:$0xff]  ;;  %v7539_v21 = vpack.c.bf16 %v1420_v11, %v1420_v11  ;;  %604 = vrot.lane.b32.xlu1 %v7371_v4, %s6913_s29 }
  0xf8   :  { %972 = vst.msk [vmem:[#allocation3 + $0x178] sm:$0xf] %vm297_vm3, %v7441_v29  ;;  %1042 = vst.msk [vmem:[#allocation3 + $0x124] sm:$0xf] %vm297_vm3, %v7441_v29  ;;  %v7541_v22 = vpack.c.bf16 %v451_v13, %v451_v13  ;;  %v1100_v24 = vld [vmem:[#allocation2 + $0x72] sm:$0xff] }
  0xf9   :  { %358 = vst.msk [vmem:[#allocation2 + $0x112] sm:$0xff] %vm346_vm5, %v290_v32  ;;  %356 = vst.msk [vmem:[#allocation2 + $0xf2] sm:$0xff] %vm346_vm5, %v288_v1  ;;  %v1748_v28 = vld [vmem:[#allocation2 + $0x74] sm:$0xff]  ;;  %v7551_v49 = vpack.c.bf16 %v1100_v24, %v1100_v24 }
  0xfa   :  { %2049 = vst.msk [vmem:[#allocation3 + $0x100] sm:$0xf] %vm297_vm3, %v7452_v36  ;;  %1620 = vst.msk [vmem:[#allocation3 + $0x17c] sm:$0xf] %vm297_vm3, %v7454_v37  ;;  %v7555_v32 = vpack.c.bf16 %v1748_v28, %v1748_v28  ;;  %1259 = vrot.lane.b32.xlu0 %v7433_v27, %s6913_s29 }
  0xfb   :  { %1690 = vst.msk [vmem:[#allocation3 + $0x128] sm:$0xf] %vm297_vm3, %v7454_v37  ;;  %538 = vst.msk [vmem:[#allocation3 + $0x138] sm:$0xf] %vm297_vm3, %v7470_v38  ;;  %v1109_v45 = vld [vmem:[#allocation2 + $0x102] sm:$0xff]  ;;  %1253 = vrot.lane.b32.xlu1 %v7382_v15, %s6913_s29 }
  0xfc   :  { %439 = vst.msk [vmem:[#allocation2 + $0x112] sm:$0xff] %vm427_vm6, %v7177_v2  ;;  %v264_v2 = vpop.f32.mrf.mxu0  ;;  %9495 = vst [vmem:[#allocation11_spill] sm:$0xff] %v7527_v63  ;;  %v781_v30 = vld [vmem:[#allocation2 + $0x101] sm:$0xff]  ;;  %v7579_v34 = vpack.c.bf16 %v1109_v45, %v1109_v45 }
  0xfd   :  { %681 = vst.msk [vmem:[#allocation3 + $0xe4] sm:$0xf] %vm297_vm3, %v7470_v38  ;;  %751 = vst.msk [vmem:[#allocation3 + $0x90] sm:$0xf] %vm297_vm3, %v7470_v38  ;;  %v265_v16 = vadd.f32 %v7268_v50, %v264_v2  ;;  %v7583_v35 = vpack.c.bf16 %v781_v30, %v781_v30  ;;  %v1429_v41 = vld [vmem:[#allocation2 + $0x103] sm:$0xff] }
  0xfe   :  { %1187 = vst.msk [vmem:[#allocation3 + $0x13c] sm:$0xf] %vm297_vm3, %v7472_v40  ;;  %1329 = vst.msk [vmem:[#allocation3 + $0xe8] sm:$0xf] %vm297_vm3, %v7472_v40  ;;  %v6440_v61 = vpop.f32.mrf.mxu0  ;;  %v1757_v43 = vld [vmem:[#allocation2 + $0x104] sm:$0xff]  ;;  %v7593_v48 = vpack.c.bf16 %v1429_v41, %v1429_v41  ;;  %606 = vrot.lane.b32.xlu0 %v7470_v38, %s6913_s29 }
  0xff   :  { %1399 = vst.msk [vmem:[#allocation3 + $0x94] sm:$0xf] %vm297_vm3, %v7472_v40  ;;  %970 = vst.msk [vmem:[#allocation3 + $0x110] sm:$0xf] %vm297_vm3, %v7474_v62  ;;  %v291_v58 = vmax.f32 %v265_v16, 0.0  ;;  %v276_v31 = vadd.f32 %v6440_v61, %v7268_v50  ;;  %v458_v44 = vld [vmem:[#allocation2 + $0xe0] sm:$0xff]  ;;  %v7597_v53 = vpack.c.bf16 %v1757_v43, %v1757_v43  ;;  %843 = vrot.lane.b32.xlu1 %v7409_v19, %s6913_s29 }
 0x100   :  { %1040 = vst.msk [vmem:[#allocation3 + $0xbc] sm:$0xf] %vm297_vm3, %v7474_v62  ;;  %1618 = vst.msk [vmem:[#allocation3 + $0x114] sm:$0xf] %vm297_vm3, %v7484_v47  ;;  %v267_v3 = vpop.f32.mrf.mxu0  ;;  %v1107_v1 = vld [vmem:[#allocation2 + $0xe2] sm:$0xff]  ;;  %v6541_v19 = vld [vmem:[%s9483_s5 + $0x138] sm:$0xff]  }
 0x101   :  { %1688 = vst.msk [vmem:[#allocation3 + $0xc0] sm:$0xf] %vm297_vm3, %v7484_v47  ;;  %2047 = vst.msk [vmem:[#allocation3 + $0x98] sm:$0xf] %vm297_vm3, %v7487_v60  ;;  %v294_v46 = vmax.f32 %v276_v31, 0.0  ;;  %v779_v51 = vld [vmem:[#allocation2 + $0xe1] sm:$0xff]  ;;  %v7623_v55 = vpack.c.bf16 %v1107_v1, %v1107_v1 }
 0x102   :  { %9496 = vst [vmem:[#allocation12_spill] sm:$0xff] %v7529_v20  ;;  %437 = vst.msk [vmem:[#allocation2 + $0xf2] sm:$0xff] %vm427_vm6, %v7173_v0  ;;  %v460_v0 = vld [vmem:[#allocation2 + $0x100] sm:$0xff]  ;;  %v7625_v18 = vpack.c.bf16 %v779_v51, %v779_v51  ;;  %1255 = vrot.lane.b32.xlu0 %v7472_v40, %s6913_s29 }
 0x103   :  { %1043 = vst.msk [vmem:[#allocation3 + $0x158] sm:$0xf] %vm297_vm3, %v7513_v54  ;;  %684 = vst.msk [vmem:[#allocation3 + $0x180] sm:$0xf] %vm297_vm3, %v7515_v7  ;;  %v7571_v33 = vpack.c.bf16 %v460_v0, %v460_v0  ;;  %v1427_v2 = vld [vmem:[#allocation2 + $0xe3] sm:$0xff]  ;;  %v1430_v10 = vld [vmem:[#allocation2 + $0x113] sm:$0xff]  ;;  %1491 = vrot.lane.b32.xlu1 %v7419_v25, %s6913_s29 }
 0x104   :  { %754 = vst.msk [vmem:[#allocation3 + $0x12c] sm:$0xf] %vm297_vm3, %v7515_v7  ;;  %1691 = vst.msk [vmem:[#allocation3 + $0x15c] sm:$0xf] %vm297_vm3, %v7517_v8  ;;  %v7632_v39 = vpack.c.bf16 %v1427_v2, %v1427_v2  ;;  %v461_v11 = vld [vmem:[#allocation2 + $0x110] sm:$0xff]  ;;  %v775_v38 = vld [vmem:[#allocation2 + $0xa1] sm:$0xff] }
 0x105   :  { %361 = vst.msk [vmem:[#allocation2 + $0x142] sm:$0xff] %vm346_vm5, %v293_v14  ;;  %359 = vst.msk [vmem:[#allocation2 + $0x122] sm:$0xff] %vm346_vm5, %v291_v58  ;;  %v7648_v14 = vpack.c.bf16 %v1430_v10, %v1430_v10  ;;  %v7651_v16 = vpack.c.bf16 %v461_v11, %v461_v11  ;;  %v1110_v24 = vld [vmem:[#allocation2 + $0x112] sm:$0xff]  ;;  %v1423_v25 = vld [vmem:[#allocation2 + $0xa3] sm:$0xff] }
 0x106   :  { %1332 = vst.msk [vmem:[#allocation3 + $0x184] sm:$0xf] %vm297_vm3, %v7527_v63  ;;  %1402 = vst.msk [vmem:[#allocation3 + $0x130] sm:$0xf] %vm297_vm3, %v7527_v63  ;;  %v1758_v61 = vld [vmem:[#allocation2 + $0x114] sm:$0xff]  ;;  %v7656_v58 = vpack.c.bf16 %v1110_v24, %v1110_v24  ;;  %851 = vrot.lane.b32.xlu0 %v7537_v57, %s6913_s29  ;;  %v7870_v40 = vpack.c.bf16 %v1423_v25, %v1423_v25  ;;  %v1755_v25 = vld [vmem:[#allocation2 + $0xe4] sm:$0xff] }
 0x107   :  { %2050 = vst.msk [vmem:[#allocation3 + $0x134] sm:$0xf] %vm297_vm3, %v7529_v20  ;;  %971 = vst.msk [vmem:[#allocation3 + $0x144] sm:$0xf] %vm297_vm3, %v7537_v57  ;;  %v7658_v30 = vpack.c.bf16 %v1758_v61, %v1758_v61  ;;  %849 = vrot.lane.b32.xlu1 %v7474_v62, %s6913_s29  ;;  %v6546_v62 = vld [vmem:[%s9483_s5 + $0x170] sm:$0xff]  }
 0x108   :  { %1041 = vst.msk [vmem:[#allocation3 + $0xf0] sm:$0xf] %vm297_vm3, %v7537_v57  ;;  %1619 = vst.msk [vmem:[#allocation3 + $0x148] sm:$0xf] %vm297_vm3, %v7539_v21  ;;  %v6547_v57 = vld [vmem:[%s9483_s5 + $0x130] sm:$0xff]  }
 0x109   :  { %1689 = vst.msk [vmem:[#allocation3 + $0xf4] sm:$0xf] %vm297_vm3, %v7539_v21  ;;  %539 = vst.msk [vmem:[#allocation3 + $0x16c] sm:$0xf] %vm297_vm3, %v7541_v22  ;;  %v459_v28 = vld [vmem:[#allocation2 + $0xf0] sm:$0xff] }
 0x10a   :  { %682 = vst.msk [vmem:[#allocation3 + $0x118] sm:$0xf] %vm297_vm3, %v7541_v22  ;;  %752 = vst.msk [vmem:[#allocation3 + $0xc4] sm:$0xf] %vm297_vm3, %v7541_v22  ;;  %v780_v0 = vld [vmem:[#allocation2 + $0xf1] sm:$0xff]  ;;  %1499 = vrot.lane.b32.xlu0 %v7539_v21, %s6913_s29  ;;  %v1115_v21 = vld [vmem:[#allocation2 + $0x162] sm:$0xff] }
 0x10b   :  { %442 = vst.msk [vmem:[#allocation2 + $0x142] sm:$0xff] %vm427_vm6, %v7192_v12  ;;  %v268_v12 = vadd.f32 %v7268_v50, %v267_v3  ;;  %440 = vst.msk [vmem:[#allocation2 + $0x122] sm:$0xff] %vm427_vm6, %v7183_v6  ;;  %v7617_v50 = vpack.c.bf16 %v458_v44, %v458_v44  ;;  %v782_v6 = vld [vmem:[#allocation2 + $0x111] sm:$0xff]  ;;  %v7682_v56 = vpack.c.bf16 %v780_v0, %v780_v0  ;;  %1497 = vrot.lane.b32.xlu1 %v7484_v47, %s6913_s29  ;;  %v1763_v47 = vld [vmem:[#allocation2 + $0x164] sm:$0xff] }
 0x10c   :  { %1188 = vst.msk [vmem:[#allocation3 + $0x170] sm:$0xf] %vm297_vm3, %v7551_v49  ;;  %1330 = vst.msk [vmem:[#allocation3 + $0x11c] sm:$0xf] %vm297_vm3, %v7551_v49  ;;  %v7644_v13 = vpack.c.bf16 %v782_v6, %v782_v6  ;;  %v1108_v45 = vld [vmem:[#allocation2 + $0xf2] sm:$0xff] }
 0x10d   :  { %1400 = vst.msk [vmem:[#allocation3 + $0xc8] sm:$0xf] %vm297_vm3, %v7551_v49  ;;  %2048 = vst.msk [vmem:[#allocation3 + $0xcc] sm:$0xf] %vm297_vm3, %v7555_v32  ;;  %v292_v9 = vmax.f32 %v268_v12, 0.0  ;;  %v7684_v59 = vpack.c.bf16 %v1108_v45, %v1108_v45  ;;  %v1428_v31 = vld [vmem:[#allocation2 + $0xf3] sm:$0xff] }
 0x10e   :  { %544 = vst.msk [vmem:[#allocation3 + $0x270] sm:$0xf] %vm297_vm3, %v7571_v33  ;;  %687 = vst.msk [vmem:[#allocation3 + $0x21c] sm:$0xf] %vm297_vm3, %v7571_v33  ;;  %v7686_v3 = vpack.c.bf16 %v1428_v31, %v1428_v31  ;;  %618 = vrot.lane.b32.xlu0 %v7571_v33, %s6913_s29 }
 0x10f   :  { %757 = vst.msk [vmem:[#allocation3 + $0x1c8] sm:$0xf] %vm297_vm3, %v7571_v33  ;;  %1193 = vst.msk [vmem:[#allocation3 + $0x274] sm:$0xf] %vm297_vm3, %v7579_v34  ;;  %608 = vrot.lane.b32.xlu1 %v7541_v22, %s6913_s29  ;;  %v6554_v33 = vld [vmem:[%s9483_s5 + $0x168] sm:$0xff]  }
 0x110   :  { %1335 = vst.msk [vmem:[#allocation3 + $0x220] sm:$0xf] %vm297_vm3, %v7579_v34  ;;  %1405 = vst.msk [vmem:[#allocation3 + $0x1cc] sm:$0xf] %vm297_vm3, %v7579_v34  ;;  %v6555_v22 = vld [vmem:[%s9483_s5 + $0x128] sm:$0xff]  }
 0x111   :  { %976 = vst.msk [vmem:[#allocation3 + $0x248] sm:$0xf] %vm297_vm3, %v7583_v35  ;;  %1046 = vst.msk [vmem:[#allocation3 + $0x1f4] sm:$0xf] %vm297_vm3, %v7583_v35 }
 0x112   :  { %362 = vst.msk [vmem:[#allocation2 + $0x152] sm:$0xff] %vm346_vm5, %v294_v46  ;;  %360 = vst.msk [vmem:[#allocation2 + $0x132] sm:$0xff] %vm346_vm5, %v292_v9  ;;  %v464_v41 = vld [vmem:[#allocation2 + $0x140] sm:$0xff]  ;;  %1267 = vrot.lane.b32.xlu0 %v7579_v34, %s6913_s29 }
 0x113   :  { %1624 = vst.msk [vmem:[#allocation3 + $0x24c] sm:$0xf] %vm297_vm3, %v7593_v48  ;;  %1694 = vst.msk [vmem:[#allocation3 + $0x1f8] sm:$0xf] %vm297_vm3, %v7593_v48  ;;  %v1113_v43 = vld [vmem:[#allocation2 + $0x142] sm:$0xff]  ;;  %v7708_v46 = vpack.c.bf16 %v464_v41, %v464_v41  ;;  %1257 = vrot.lane.b32.xlu1 %v7551_v49, %s6913_s29 }
 0x114   :  { %2053 = vst.msk [vmem:[#allocation3 + $0x1d0] sm:$0xf] %vm297_vm3, %v7597_v53  ;;  %542 = vst.msk [vmem:[#allocation3 + $0x208] sm:$0xf] %vm297_vm3, %v7617_v50  ;;  %v785_v44 = vld [vmem:[#allocation2 + $0x141] sm:$0xff]  ;;  %v7710_v12 = vpack.c.bf16 %v1113_v43, %v1113_v43 }
 0x115   :  { %685 = vst.msk [vmem:[#allocation3 + $0x1b4] sm:$0xf] %vm297_vm3, %v7617_v50  ;;  %1191 = vst.msk [vmem:[#allocation3 + $0x20c] sm:$0xf] %vm297_vm3, %v7623_v55  ;;  %v7712_v1 = vpack.c.bf16 %v785_v44, %v785_v44  ;;  %v1761_v51 = vld [vmem:[#allocation2 + $0x144] sm:$0xff] }
 0x116   :  { %1333 = vst.msk [vmem:[#allocation3 + $0x1b8] sm:$0xf] %vm297_vm3, %v7623_v55  ;;  %974 = vst.msk [vmem:[#allocation3 + $0x1e0] sm:$0xf] %vm297_vm3, %v7625_v18  ;;  %v1433_v2 = vld [vmem:[#allocation2 + $0x143] sm:$0xff]  ;;  %v7718_v11 = vpack.c.bf16 %v1761_v51, %v1761_v51  ;;  %614 = vrot.lane.b32.xlu0 %v7617_v50, %s6913_s29  ;;  %v6572_v50 = vld [vmem:[%s9483_s5 + $0x150] sm:$0xff]  }
 0x117   :  { %443 = vst.msk [vmem:[#allocation2 + $0x152] sm:$0xff] %vm427_vm6, %v410_v52  ;;  %441 = vst.msk [vmem:[#allocation2 + $0x132] sm:$0xff] %vm427_vm6, %v7181_v5  ;;  %v7680_v5 = vpack.c.bf16 %v459_v28, %v459_v28  ;;  %v466_v52 = vld [vmem:[#allocation2 + $0x160] sm:$0xff]  ;;  %v7722_v61 = vpack.c.bf16 %v1433_v2, %v1433_v2  ;;  %861 = vrot.lane.b32.xlu1 %v7583_v35, %s6913_s29  ;;  %v6564_v35 = vld [vmem:[%s9483_s5 + $0x158] sm:$0xff]  }
 0x118   :  { %1622 = vst.msk [vmem:[#allocation3 + $0x1e4] sm:$0xf] %vm297_vm3, %v7632_v39  ;;  %977 = vst.msk [vmem:[#allocation3 + $0x27c] sm:$0xf] %vm297_vm3, %v7644_v13  ;;  %v462_v9 = vld [vmem:[#allocation2 + $0x120] sm:$0xff]  ;;  %v7720_v24 = vpack.c.bf16 %v466_v52, %v466_v52 }
 0x119   :  { %1047 = vst.msk [vmem:[#allocation3 + $0x228] sm:$0xf] %vm297_vm3, %v7644_v13  ;;  %1625 = vst.msk [vmem:[#allocation3 + $0x280] sm:$0xf] %vm297_vm3, %v7648_v14  ;;  %v783_v6 = vld [vmem:[#allocation2 + $0x121] sm:$0xff]  ;;  %v7732_v28 = vpack.c.bf16 %v462_v9, %v462_v9 }
 0x11a   :  { %1695 = vst.msk [vmem:[#allocation3 + $0x22c] sm:$0xf] %vm297_vm3, %v7648_v14  ;;  %545 = vst.msk [vmem:[#allocation3 + $0x2a4] sm:$0xf] %vm297_vm3, %v7651_v16  ;;  %v1111_v10 = vld [vmem:[#allocation2 + $0x122] sm:$0xff]  ;;  %v7734_v0 = vpack.c.bf16 %v783_v6, %v783_v6  ;;  %1263 = vrot.lane.b32.xlu0 %v7623_v55, %s6913_s29  ;;  %v6573_v55 = vld [vmem:[%s9483_s5 + $0x110] sm:$0xff]  }
 0x11b   :  { %688 = vst.msk [vmem:[#allocation3 + $0x250] sm:$0xf] %vm297_vm3, %v7651_v16  ;;  %758 = vst.msk [vmem:[#allocation3 + $0x1fc] sm:$0xf] %vm297_vm3, %v7651_v16  ;;  %v7736_v45 = vpack.c.bf16 %v1111_v10, %v1111_v10  ;;  %v1431_v31 = vld [vmem:[#allocation2 + $0x123] sm:$0xff]  ;;  %1509 = vrot.lane.b32.xlu1 %v7593_v48, %s6913_s29  ;;  %v6565_v48 = vld [vmem:[%s9483_s5 + $0x118] sm:$0xff]  }
 0x11c   :  { %1194 = vst.msk [vmem:[#allocation3 + $0x2a8] sm:$0xf] %vm297_vm3, %v7656_v58  ;;  %1336 = vst.msk [vmem:[#allocation3 + $0x254] sm:$0xf] %vm297_vm3, %v7656_v58  ;;  %v1759_v4 = vld [vmem:[#allocation2 + $0x124] sm:$0xff]  ;;  %v7746_v26 = vpack.c.bf16 %v1431_v31, %v1431_v31 }
 0x11d   :  { %1406 = vst.msk [vmem:[#allocation3 + $0x200] sm:$0xf] %vm297_vm3, %v7656_v58  ;;  %2054 = vst.msk [vmem:[#allocation3 + $0x204] sm:$0xf] %vm297_vm3, %v7658_v30  ;;  %v7748_v41 = vpack.c.bf16 %v1759_v4, %v1759_v4  ;;  %v6560_v49 = vld [vmem:[%s9483_s5 + $0x160] sm:$0xff]  }
 0x11e   :  { %543 = vst.msk [vmem:[#allocation3 + $0x23c] sm:$0xf] %vm297_vm3, %v7680_v5  ;;  %686 = vst.msk [vmem:[#allocation3 + $0x1e8] sm:$0xf] %vm297_vm3, %v7680_v5  ;;  %v786_v43 = vld [vmem:[#allocation2 + $0x151] sm:$0xff]  ;;  %v6561_v34 = vld [vmem:[%s9483_s5 + $0x120] sm:$0xff]   ;;  %863 = vrot.lane.b32.xlu0 %v7644_v13, %s6913_s29 }
 0x11f   :  { %975 = vst.msk [vmem:[#allocation3 + $0x214] sm:$0xf] %vm297_vm3, %v7682_v56  ;;  %1045 = vst.msk [vmem:[#allocation3 + $0x1c0] sm:$0xf] %vm297_vm3, %v7682_v56  ;;  %v465_v44 = vld [vmem:[#allocation2 + $0x150] sm:$0xff]  ;;  %v7774_v52 = vpack.c.bf16 %v786_v43, %v786_v43  ;;  %857 = vrot.lane.b32.xlu1 %v7625_v18, %s6913_s29  ;;  %v6580_v18 = vld [vmem:[%s9483_s5 + $0x148] sm:$0xff]  }
 0x120   :  { %1192 = vst.msk [vmem:[#allocation3 + $0x240] sm:$0xf] %vm297_vm3, %v7684_v59  ;;  %1334 = vst.msk [vmem:[#allocation3 + $0x1ec] sm:$0xf] %vm297_vm3, %v7684_v59  ;;  %v1434_v51 = vld [vmem:[#allocation2 + $0x153] sm:$0xff]  ;;  %v7776_v2 = vpack.c.bf16 %v465_v44, %v465_v44  ;;  %v6586_v13 = vld [vmem:[%s9483_s5 + $0x140] sm:$0xff]  }
 0x121   :  { %1623 = vst.msk [vmem:[#allocation3 + $0x218] sm:$0xf] %vm297_vm3, %v7686_v3  ;;  %1693 = vst.msk [vmem:[#allocation3 + $0x1c4] sm:$0xf] %vm297_vm3, %v7686_v3  ;;  %v7778_v9 = vpack.c.bf16 %v1434_v51, %v1434_v51  ;;  %v1114_v6 = vld [vmem:[#allocation2 + $0x152] sm:$0xff] }
 0x122   :  { %9497 = vst [vmem:[#allocation13_spill] sm:$0xff] %v7720_v24  ;;  %9498 = vst [vmem:[#allocation14_spill] sm:$0xff] %v7722_v61  ;;  %v1762_v10 = vld [vmem:[#allocation2 + $0x154] sm:$0xff]  ;;  %v7786_v43 = vpack.c.bf16 %v1114_v6, %v1114_v6  ;;  %1511 = vrot.lane.b32.xlu0 %v7648_v14, %s6913_s29  ;;  %v6587_v14 = vld [vmem:[%s9483_s5 + $0x100] sm:$0xff]  }
 0x123   :  { %691 = vst.msk [vmem:[#allocation3 + $0x2ec] sm:$0xf] %vm297_vm3, %v7708_v46  ;;  %761 = vst.msk [vmem:[#allocation3 + $0x298] sm:$0xf] %vm297_vm3, %v7708_v46  ;;  %v784_v31 = vld [vmem:[#allocation2 + $0x131] sm:$0xff]  ;;  %v7788_v44 = vpack.c.bf16 %v1762_v10, %v1762_v10  ;;  %v1751_v10 = vld [vmem:[#allocation2 + $0xa4] sm:$0xff]  ;;  %1505 = vrot.lane.b32.xlu1 %v7632_v39, %s6913_s29 }
 0x124   :  { %1339 = vst.msk [vmem:[#allocation3 + $0x2f0] sm:$0xf] %vm297_vm3, %v7710_v12  ;;  %1409 = vst.msk [vmem:[#allocation3 + $0x29c] sm:$0xf] %vm297_vm3, %v7710_v12  ;;  %v463_v4 = vld [vmem:[#allocation2 + $0x130] sm:$0xff]  ;;  %v7794_v51 = vpack.c.bf16 %v784_v31, %v784_v31  ;;  %v7848_v31 = vpack.c.bf16 %v1751_v10, %v1751_v10  ;;  %v7887_v10 = vpack.c.bf16 %v1115_v21, %v1115_v21  ;;  %v6581_v39 = vld [vmem:[%s9483_s5 + $0x108] sm:$0xff]  }
 0x125   :  { %980 = vst.msk [vmem:[#allocation3 + $0x318] sm:$0xf] %vm297_vm3, %v7712_v1  ;;  %1050 = vst.msk [vmem:[#allocation3 + $0x2c4] sm:$0xf] %vm297_vm3, %v7712_v1  ;;  %v1432_v20 = vld [vmem:[#allocation2 + $0x133] sm:$0xff]  ;;  %v7796_v63 = vpack.c.bf16 %v463_v4, %v463_v4 }
 0x126   :  { %2057 = vst.msk [vmem:[#allocation3 + $0x2a0] sm:$0xf] %vm297_vm3, %v7718_v11  ;;  %763 = vst.msk [vmem:[#allocation3 + $0x300] sm:$0xf] %vm297_vm3, %v7720_v24  ;;  %v1112_v24 = vld [vmem:[#allocation2 + $0x132] sm:$0xff]  ;;  %620 = vrot.lane.b32.xlu0 %v7651_v16, %s6913_s29  ;;  %v787_v16 = vld [vmem:[#allocation2 + $0x161] sm:$0xff] }
 0x127   :  { %1628 = vst.msk [vmem:[#allocation3 + $0x31c] sm:$0xf] %vm297_vm3, %v7722_v61  ;;  %1698 = vst.msk [vmem:[#allocation3 + $0x2c8] sm:$0xf] %vm297_vm3, %v7722_v61  ;;  %v7798_v61 = vpack.c.bf16 %v1432_v20, %v1432_v20  ;;  %v1760_v6 = vld [vmem:[#allocation2 + $0x134] sm:$0xff]  ;;  %v7808_v15 = vpack.c.bf16 %v1112_v24, %v1112_v24  ;;  %v1103_v20 = vld [vmem:[#allocation2 + $0xa2] sm:$0xff]  ;;  %616 = vrot.lane.b32.xlu1 %v7680_v5, %s6913_s29 }
 0x128   :  { %546 = vst.msk [vmem:[#allocation3 + $0x2d8] sm:$0xf] %vm297_vm3, %v7732_v28  ;;  %689 = vst.msk [vmem:[#allocation3 + $0x284] sm:$0xf] %vm297_vm3, %v7732_v28  ;;  %v7810_v27 = vpack.c.bf16 %v1760_v6, %v1760_v6  ;;  %v7840_v24 = vpack.c.bf16 %v1103_v20, %v1103_v20  ;;  %v6540_v4 = vld [vmem:[%s9483_s5 + $0x178] sm:$0xff]   ;;  %v7862_v6 = vpack.c.bf16 %v775_v38, %v775_v38  ;;  %v1435_v5 = vld [vmem:[#allocation2 + $0x163] sm:$0xff] }
 0x129   :  { %759 = vst.msk [vmem:[#allocation3 + $0x230] sm:$0xf] %vm297_vm3, %v7732_v28  ;;  %978 = vst.msk [vmem:[#allocation3 + $0x2b0] sm:$0xf] %vm297_vm3, %v7734_v0  ;;  %6151 = vmatprep.subr.bf16.mxu1 %v6540_v4  ;;  %v6544_v20 = vld [vmem:[%s9483_s5 + $0x1f8] sm:$0xff]   ;;  %v7895_v4 = vpack.c.bf16 %v1763_v47, %v1763_v47 }
 0x12a   :  { %1048 = vst.msk [vmem:[#allocation3 + $0x25c] sm:$0xf] %vm297_vm3, %v7734_v0  ;;  %1195 = vst.msk [vmem:[#allocation3 + $0x2dc] sm:$0xf] %vm297_vm3, %v7736_v45  ;;  %6152 = vmatpush3.bf16.msra.mxu1 %v6541_v19  ;;  %6215 = vmatprep.subr.bf16.mxu0 %v6544_v20 }
 0x12b   :  { %1337 = vst.msk [vmem:[#allocation3 + $0x288] sm:$0xf] %vm297_vm3, %v7736_v45  ;;  %1407 = vst.msk [vmem:[#allocation3 + $0x234] sm:$0xf] %vm297_vm3, %v7736_v45  ;;  %6153 = vmatprep.subr.bf16.mxu1 %v6546_v62  ;;  %859 = vrot.lane.b32.xlu0 %v7682_v56, %s6913_s29  ;;  %v1742_v56 = vld [vmem:[#allocation2 + $0x14] sm:$0xff]  ;;  %v8044_v62 = vpack.c.bf16 %v1755_v25, %v1755_v25 }
 0x12c   :  { %1626 = vst.msk [vmem:[#allocation3 + $0x2b4] sm:$0xf] %vm297_vm3, %v7746_v26  ;;  %1696 = vst.msk [vmem:[#allocation3 + $0x260] sm:$0xf] %vm297_vm3, %v7746_v26  ;;  %1265 = vrot.lane.b32.xlu1 %v7684_v59, %s6913_s29  ;;  %v7987_v59 = vpack.c.bf16 %v1435_v5, %v1435_v5 }
 0x12d   :  { %2055 = vst.msk [vmem:[#allocation3 + $0x238] sm:$0xf] %vm297_vm3, %v7748_v41  ;;  %1051 = vst.msk [vmem:[#allocation3 + $0x2f8] sm:$0xf] %vm297_vm3, %v7774_v52 }
 0x12e   :  { %692 = vst.msk [vmem:[#allocation3 + $0x320] sm:$0xf] %vm297_vm3, %v7776_v2  ;;  %762 = vst.msk [vmem:[#allocation3 + $0x2cc] sm:$0xf] %vm297_vm3, %v7776_v2  ;;  %6154 = vmatpush3.bf16.msra.mxu1 %v6547_v57 }
 0x12f   :  { %1699 = vst.msk [vmem:[#allocation3 + $0x2fc] sm:$0xf] %vm297_vm3, %v7778_v9  ;;  %1340 = vst.msk [vmem:[#allocation3 + $0x324] sm:$0xf] %vm297_vm3, %v7786_v43  ;;  %6155 = vmatprep.subr.bf16.mxu1 %v6554_v33  ;;  %1507 = vrot.lane.b32.xlu0 %v7686_v3, %s6913_s29  ;;  %v1743_v3 = vld [vmem:[#allocation2 + $0x24] sm:$0xff] }
 0x130   :  { %1410 = vst.msk [vmem:[#allocation3 + $0x2d0] sm:$0xf] %vm297_vm3, %v7786_v43  ;;  %2058 = vst.msk [vmem:[#allocation3 + $0x2d4] sm:$0xf] %vm297_vm3, %v7788_v44  ;;  %626 = vrot.lane.b32.xlu1 %v7708_v46, %s6913_s29  ;;  %v5969_v46 = vpack.c.bf16 %v1742_v56, %v1742_v56 }
 0x131   :  { %979 = vst.msk [vmem:[#allocation3 + $0x2e4] sm:$0xf] %vm297_vm3, %v7794_v51  ;;  %1049 = vst.msk [vmem:[#allocation3 + $0x290] sm:$0xf] %vm297_vm3, %v7794_v51 }
 0x132   :  { %547 = vst.msk [vmem:[#allocation3 + $0x30c] sm:$0xf] %vm297_vm3, %v7796_v63  ;;  %690 = vst.msk [vmem:[#allocation3 + $0x2b8] sm:$0xf] %vm297_vm3, %v7796_v63  ;;  %6156 = vmatpush3.bf16.msra.mxu1 %v6555_v22  ;;  %v6545_v22 = vld [vmem:[%s9483_s5 + $0x1b8] sm:$0xff]  }
 0x133   :  { %760 = vst.msk [vmem:[#allocation3 + $0x264] sm:$0xf] %vm297_vm3, %v7796_v63  ;;  %1627 = vst.msk [vmem:[#allocation3 + $0x2e8] sm:$0xf] %vm297_vm3, %v7798_v61  ;;  %6157 = vmatprep.subr.bf16.mxu1 %v6560_v49  ;;  %1269 = vrot.lane.b32.xlu0 %v7656_v58, %s6913_s29  ;;  %v7979_v58 = vpack.c.bf16 %v787_v16, %v787_v16  ;;  %v6552_v49 = vld [vmem:[%s9483_s5 + $0x1f0] sm:$0xff]   ;;  %v6562_v16 = vld [vmem:[%s9483_s5 + $0x1e0] sm:$0xff]  }
 0x134   :  { %1697 = vst.msk [vmem:[#allocation3 + $0x294] sm:$0xf] %vm297_vm3, %v7798_v61  ;;  %1196 = vst.msk [vmem:[#allocation3 + $0x310] sm:$0xf] %vm297_vm3, %v7808_v15  ;;  %622 = vrot.lane.b32.xlu1 %v7732_v28, %s6913_s29  ;;  %v1744_v28 = vld [vmem:[#allocation2 + $0x34] sm:$0xff] }
 0x135   :  { %1338 = vst.msk [vmem:[#allocation3 + $0x2bc] sm:$0xf] %vm297_vm3, %v7808_v15  ;;  %1408 = vst.msk [vmem:[#allocation3 + $0x268] sm:$0xf] %vm297_vm3, %v7808_v15 }
 0x136   :  { %2056 = vst.msk [vmem:[#allocation3 + $0x26c] sm:$0xf] %vm297_vm3, %v7810_v27  ;;  %1403 = vst.msk [vmem:[#allocation3 + $0x164] sm:$0xf] %vm297_vm3, %v7840_v24  ;;  %6158 = vmatpush3.bf16.msra.mxu1 %v6561_v34 }
 0x137   :  { %2051 = vst.msk [vmem:[#allocation3 + $0x168] sm:$0xf] %vm297_vm3, %v7848_v31  ;;  %1044 = vst.msk [vmem:[#allocation3 + $0x18c] sm:$0xf] %vm297_vm3, %v7862_v6  ;;  %6159 = vmatprep.subr.bf16.mxu1 %v6564_v35  ;;  %865 = vrot.lane.b32.xlu0 %v7734_v0, %s6913_s29  ;;  %v5971_v0 = vpack.c.bf16 %v1744_v28, %v1744_v28 }
 0x138   :  { %1692 = vst.msk [vmem:[#allocation3 + $0x190] sm:$0xf] %vm297_vm3, %v7870_v40  ;;  %1411 = vst.msk [vmem:[#allocation3 + $0x304] sm:$0xf] %vm297_vm3, %v7887_v10  ;;  %1271 = vrot.lane.b32.xlu1 %v7736_v45, %s6913_s29 }
 0x139   :  { %2059 = vst.msk [vmem:[#allocation3 + $0x308] sm:$0xf] %vm297_vm3, %v7895_v4  ;;  %1052 = vst.msk [vmem:[#allocation3 + $0x32c] sm:$0xf] %vm297_vm3, %v7979_v58 }
 0x13a   :  { %6160 = vmatpush3.bf16.msra.mxu1 %v6565_v48  ;;  %1700 = vst.msk [vmem:[#allocation3 + $0x330] sm:$0xf] %vm297_vm3, %v7987_v59  ;;  %v6553_v48 = vld [vmem:[%s9483_s5 + $0x1b0] sm:$0xff]  }
 0x13b   :  { %6161 = vmatprep.subr.bf16.mxu1 %v6572_v50  ;;  %1513 = vrot.lane.b32.xlu0 %v7746_v26, %s6913_s29  ;;  %v6558_v50 = vld [vmem:[%s9483_s5 + $0x1e8] sm:$0xff]  }
 0x13c   :  { %867 = vrot.lane.b32.xlu1 %v7794_v51, %s6913_s29 }
 0x13e   :  { %6162 = vmatpush3.bf16.msra.mxu1 %v6573_v55 }
 0x13f   :  { %6163 = vmatprep.subr.bf16.mxu1 %v6580_v18  ;;  %624 = vrot.lane.b32.xlu0 %v7796_v63, %s6913_s29  ;;  %v6598_v63 = vld [vmem:[%s9483_s5 + $0x278] sm:$0xff]  }
 0x140   :  { %1515 = vrot.lane.b32.xlu1 %v7798_v61, %s6913_s29  ;;  %v5970_v61 = vpack.c.bf16 %v1743_v3, %v1743_v3 }
 0x142   :  { %6164 = vmatpush3.bf16.msra.mxu1 %v6581_v39 }
 0x143   :  { %6165 = vmatprep.subr.bf16.mxu1 %v6586_v13  ;;  %1273 = vrot.lane.b32.xlu0 %v7808_v15, %s6913_s29  ;;  %v1754_v15 = vld [vmem:[#allocation2 + $0xd4] sm:$0xff] }
 0x144   :  { %1275 = vrot.lane.b32.xlu1 %v7710_v12, %s6913_s29 }
 0x146   :  { %6166 = vmatpush3.bf16.msra.mxu1 %v6587_v14  ;;  %v6559_v14 = vld [vmem:[%s9483_s5 + $0x1a8] sm:$0xff]  }
 0x147   :  { %6279 = vmatprep.subr.bf16.mxu1 %v6598_v63  ;;  %1893 = vrot.lane.b32.xlu0 %v5969_v46, %s6913_s29  ;;  %v9499_v63 = vld [vmem:[#allocation13_spill] sm:$0xff] }
 0x148   :  { %1895 = vrot.lane.b32.xlu1 %v5970_v61, %s6913_s29 }
 0x14b   :  { %1897 = vrot.lane.b32.xlu0 %v5971_v0, %s6913_s29 }
 0x14c   :  { %1899 = vrot.lane.b32.xlu1 %v7324_v42, %s6913_s29 }
 0x14f   :  { %1901 = vrot.lane.b32.xlu0 %v7384_v17, %s6913_s29 }
 0x150   :  { %1903 = vrot.lane.b32.xlu1 %v7487_v60, %s6913_s29  ;;  %v846_v12 = vpop.permute.xlu0 %845 }
 0x151   :  { %v603_v45 = vpop.permute.xlu1 %602  ;;  %889 = vst.msk [vmem:[#allocation3 + $0xd0] sm:$0xf] %vm644_vm4, %v846_v12  ;;  %1007 = vst.msk [vmem:[#allocation3 + $0x7c] sm:$0xf] %vm644_vm4, %v846_v12 }
 0x152   :  { %1077 = vst.msk [vmem:[#allocation3 + $0x28] sm:$0xf] %vm644_vm4, %v846_v12  ;;  %648 = vst.msk [vmem:[#allocation3 + $0xa4] sm:$0xf] %vm644_vm4, %v603_v45  ;;  %v455_v12 = vld [vmem:[#allocation2 + $0xb0] sm:$0xff] }
 0x153   :  { %718 = vst.msk [vmem:[#allocation3 + $0x50] sm:$0xf] %vm644_vm4, %v603_v45  ;;  %993 = vrot.lane.b32.xlu0 %v7441_v29, %s6913_s29 }
 0x154   :  { %1832 = vst.msk [vmem:[#allocation3 + $0xa4] sm:$0xf] %vm297_vm3, %v5971_v0  ;;  %1974 = vst.msk [vmem:[#allocation3 + $0x50] sm:$0xf] %vm297_vm3, %v5971_v0  ;;  %995 = vrot.lane.b32.xlu1 %v7513_v54, %s6913_s29  ;;  %v1494_v26 = vpop.permute.xlu0 %1493 }
 0x155   :  { %v1252_v51 = vpop.permute.xlu1 %1251  ;;  %1537 = vst.msk [vmem:[#allocation3 + $0xd4] sm:$0xf] %vm644_vm4, %v1494_v26  ;;  %1655 = vst.msk [vmem:[#allocation3 + $0x80] sm:$0xf] %vm644_vm4, %v1494_v26 }
 0x156   :  { %1725 = vst.msk [vmem:[#allocation3 + $0x2c] sm:$0xf] %vm644_vm4, %v1494_v26  ;;  %1296 = vst.msk [vmem:[#allocation3 + $0xa8] sm:$0xf] %vm644_vm4, %v1252_v51  ;;  %v9500_v26 = vld [vmem:[#allocation14_spill] sm:$0xff] }
 0x157   :  { %1366 = vst.msk [vmem:[#allocation3 + $0x54] sm:$0xf] %vm644_vm4, %v1252_v51  ;;  %1905 = vrot.lane.b32.xlu0 %v7555_v32, %s6913_s29  ;;  %v5833_v51 = vpack.c.bf16 %v455_v12, %v455_v12 }
 0x158   :  { %1907 = vrot.lane.b32.xlu1 %v7452_v36, %s6913_s29  ;;  %v842_v29 = vpop.permute.xlu0 %841 }
 0x159   :  { %v599_v54 = vpop.permute.xlu1 %598  ;;  %887 = vst.msk [vmem:[#allocation3 + $0x68] sm:$0xf] %vm644_vm4, %v842_v29  ;;  %1005 = vst.msk [vmem:[#allocation3 + $0x14] sm:$0xf] %vm644_vm4, %v842_v29 }
 0x15a   :  { %646 = vst.msk [vmem:[#allocation3 + $0x3c] sm:$0xf] %vm644_vm4, %v599_v54 }
 0x15b   :  { %1830 = vst.msk [vmem:[#allocation3 + $0x3c] sm:$0xf] %vm297_vm3, %v5969_v46  ;;  %705 = vrot.lane.b32.xlu0 %v7515_v7, %s6913_s29  ;;  %v8042_v7 = vpack.c.bf16 %v1754_v15, %v1754_v15  ;;  %756 = vst.msk [vmem:[#allocation3 + $0x194] sm:$0xf] %vm297_vm3, %v5833_v51 }
 0x15c   :  { %707 = vrot.lane.b32.xlu1 %v7304_v23, %s6913_s29  ;;  %v1490_v19 = vpop.permute.xlu0 %1489 }
 0x15d   :  { %v1248_v38 = vpop.permute.xlu1 %1247  ;;  %1535 = vst.msk [vmem:[#allocation3 + $0x6c] sm:$0xf] %vm644_vm4, %v1490_v19  ;;  %1653 = vst.msk [vmem:[#allocation3 + $0x18] sm:$0xf] %vm644_vm4, %v1490_v19  ;;  %v2083_v39 = vld [vmem:[#allocation3 + $0xa4] sm:$0xff] }
 0x15e   :  { %1294 = vst.msk [vmem:[#allocation3 + $0x40] sm:$0xf] %vm644_vm4, %v1248_v38 }
 0x15f   :  { %1641 = vrot.lane.b32.xlu0 %v7454_v37, %s6913_s29  ;;  %v1756_v37 = vld [vmem:[#allocation2 + $0xf4] sm:$0xff] }
 0x160   :  { %1643 = vrot.lane.b32.xlu1 %v7517_v8, %s6913_s29  ;;  %v601_v20 = vpop.permute.xlu0 %600  ;;  %v8057_v21 = vpack.c.bf16 %v1756_v37, %v1756_v37 }
 0x161   :  { %v848_v23 = vpop.permute.xlu1 %847  ;;  %647 = vst.msk [vmem:[#allocation3 + $0x70] sm:$0xf] %vm644_vm4, %v601_v20  ;;  %717 = vst.msk [vmem:[#allocation3 + $0x1c] sm:$0xf] %vm644_vm4, %v601_v20 }
 0x162   :  { %890 = vst.msk [vmem:[#allocation3 + $0x104] sm:$0xf] %vm644_vm4, %v848_v23  ;;  %1008 = vst.msk [vmem:[#allocation3 + $0xb0] sm:$0xf] %vm644_vm4, %v848_v23  ;;  %v6529_v47 = vld [vmem:[#allocation3 + $0x8] ss:$52 sps:$4 sm:$0xff]   ;;  %v6039_v45 = vpop.f32.mrf.mxu1 }
 0x163   :  { %1078 = vst.msk [vmem:[#allocation3 + $0x5c] sm:$0xf] %vm644_vm4, %v848_v23  ;;  %1909 = vrot.lane.b32.xlu0 %v8042_v7, %s6913_s29 }
 0x164   :  { %1831 = vst.msk [vmem:[#allocation3 + $0x70] sm:$0xf] %vm297_vm3, %v5970_v61  ;;  %1973 = vst.msk [vmem:[#allocation3 + $0x1c] sm:$0xf] %vm297_vm3, %v5970_v61  ;;  %1911 = vrot.lane.b32.xlu1 %v8044_v62, %s6913_s29  ;;  %v1250_v8 = vpop.permute.xlu0 %1249  ;;  %v6576_v61 = vld [vmem:[%s9483_s5 + $0x1d0] sm:$0xff]   ;;  %v2075_v29 = vld [vmem:[#allocation3 + $0x68] sm:$0xff]  ;;  %v6040_v15 = vpop.f32.mrf.mxu1 }
 0x165   :  { %v1496_v57 = vpop.permute.xlu1 %1495  ;;  %v6531_v33 = vld [vmem:[#allocation3 + $0xc] ss:$52 sps:$4 sm:$0xff]   ;;  %1295 = vst.msk [vmem:[#allocation3 + $0x74] sm:$0xf] %vm644_vm4, %v1250_v8  ;;  %1365 = vst.msk [vmem:[#allocation3 + $0x20] sm:$0xf] %vm644_vm4, %v1250_v8  ;;  %v8156_v37 = vadd.f32 %v6040_v15, %v6039_v45 }
 0x166   :  { %1538 = vst.msk [vmem:[#allocation3 + $0x108] sm:$0xf] %vm644_vm4, %v1496_v57  ;;  %1656 = vst.msk [vmem:[#allocation3 + $0xb4] sm:$0xf] %vm644_vm4, %v1496_v57  ;;  %3653 = vmatprep.mubr.bf16.mxu0 %v6531_v33  ;;  %v9501_v33 = vld [vmem:[#allocation11_spill] sm:$0xff]  ;;  %v788_v45 = vld [vmem:[#allocation2 + $0x171] sm:$0xff] }
 0x167   :  { %1726 = vst.msk [vmem:[#allocation3 + $0x60] sm:$0xf] %vm644_vm4, %v1496_v57  ;;  %1913 = vrot.lane.b32.xlu0 %v8057_v21, %s6913_s29  ;;  %3654 = vmatmul.mubr.bf16.vlgmr.msra.gmra.mxu0 %v6529_v47  ;;  %v6582_v47 = vld [vmem:[%s9483_s5 + $0x1c8] sm:$0xff]   ;;  %v5879_v51 = vpack.c.bf16 %v788_v45, %v788_v45 }
 0x168   :  { %1915 = vrot.lane.b32.xlu1 %v7597_v53, %s6913_s29  ;;  %v611_v34 = vpop.permute.xlu0 %610  ;;  %6216 = vmatpush3.bf16.msra.mxu0 %v6545_v22  ;;  %v1104_v22 = vld [vmem:[#allocation2 + $0xb2] sm:$0xff] }
 0x169   :  { %v605_v35 = vpop.permute.xlu1 %604  ;;  %652 = vst.msk [vmem:[#allocation3 + $0x174] sm:$0xf] %vm644_vm4, %v611_v34  ;;  %722 = vst.msk [vmem:[#allocation3 + $0x120] sm:$0xf] %vm644_vm4, %v611_v34  ;;  %6217 = vmatprep.subr.bf16.mxu0 %v6552_v49  ;;  %v776_v34 = vld [vmem:[#allocation2 + $0xb1] sm:$0xff] }
 0x16a   :  { %649 = vst.msk [vmem:[#allocation3 + $0xd8] sm:$0xf] %vm644_vm4, %v605_v35  ;;  %719 = vst.msk [vmem:[#allocation3 + $0x84] sm:$0xf] %vm644_vm4, %v605_v35  ;;  %v6583_v35 = vld [vmem:[%s9483_s5 + $0x188] sm:$0xff]  }
 0x16b   :  { %1836 = vst.msk [vmem:[#allocation3 + $0x174] sm:$0xf] %vm297_vm3, %v7555_v32  ;;  %1978 = vst.msk [vmem:[#allocation3 + $0x120] sm:$0xf] %vm297_vm3, %v7555_v32  ;;  %1917 = vrot.lane.b32.xlu0 %v7658_v30, %s6913_s29 }
 0x16c   :  { %1833 = vst.msk [vmem:[#allocation3 + $0xd8] sm:$0xf] %vm297_vm3, %v7324_v42  ;;  %1975 = vst.msk [vmem:[#allocation3 + $0x84] sm:$0xf] %vm297_vm3, %v7324_v42  ;;  %1919 = vrot.lane.b32.xlu1 %v7748_v41, %s6913_s29  ;;  %v1260_v55 = vpop.permute.xlu0 %1259  ;;  %v2076_v32 = vld [vmem:[#allocation3 + $0x70] sm:$0xff]  ;;  %6218 = vmatpush3.bf16.msra.mxu0 %v6553_v48  ;;  %v5921_v48 = vpack.c.bf16 %v1104_v22, %v1104_v22 }
 0x16d   :  { %v1254_v18 = vpop.permute.xlu1 %1253  ;;  %v6532_v13 = vld [vmem:[#allocation3 + $0x74] ss:$52 sps:$4 sm:$0xff]   ;;  %1300 = vst.msk [vmem:[#allocation3 + $0x178] sm:$0xf] %vm644_vm4, %v1260_v55  ;;  %1370 = vst.msk [vmem:[#allocation3 + $0x124] sm:$0xf] %vm644_vm4, %v1260_v55  ;;  %v5579_v42 = vcombine.low %v2076_v32, %v2083_v39  ;;  %6219 = vmatprep.subr.bf16.mxu0 %v6558_v50  ;;  %v5877_v32 = vpack.c.bf16 %v776_v34, %v776_v34 }
 0x16e   :  { %1297 = vst.msk [vmem:[#allocation3 + $0xdc] sm:$0xf] %vm644_vm4, %v1254_v18  ;;  %1367 = vst.msk [vmem:[#allocation3 + $0x88] sm:$0xf] %vm644_vm4, %v1254_v18  ;;  %3661 = vmatprep.mubr.bf16.mxu0 %v6532_v13  ;;  %v6538_v49 = vld [vmem:[#allocation3 + $0xd4] ss:$52 sps:$4 sm:$0xff]  }
 0x16f   :  { %997 = vrot.lane.b32.xlu0 %v7712_v1, %s6913_s29  ;;  %3662 = vmatmul.mubr.bf16.gmra.mxu0 %v5579_v42  ;;  %v6563_v1 = vld [vmem:[%s9483_s5 + $0x1a0] sm:$0xff]   ;;  %1404 = vst.msk [vmem:[#allocation3 + $0x198] sm:$0xf] %vm297_vm3, %v5921_v48  ;;  %v1424_v13 = vld [vmem:[#allocation2 + $0xb3] sm:$0xff] }
 0x170   :  { %999 = vrot.lane.b32.xlu1 %v7774_v52, %s6913_s29  ;;  %v607_v5 = vpop.permute.xlu0 %606  ;;  %6220 = vmatpush3.bf16.msra.mxu0 %v6559_v14  ;;  %v6568_v52 = vld [vmem:[%s9483_s5 + $0x1d8] sm:$0xff]   ;;  %v6590_v18 = vld [vmem:[%s9483_s5 + $0x1c0] sm:$0xff]  }
 0x171   :  { %v844_v56 = vpop.permute.xlu1 %843  ;;  %650 = vst.msk [vmem:[#allocation3 + $0x10c] sm:$0xf] %vm644_vm4, %v607_v5  ;;  %720 = vst.msk [vmem:[#allocation3 + $0xb8] sm:$0xf] %vm644_vm4, %v607_v5  ;;  %6221 = vmatprep.subr.bf16.mxu0 %v6562_v16  ;;  %v2096_v39 = vld [vmem:[#allocation3 + $0x104] sm:$0xff]  ;;  %v2089_v16 = vld [vmem:[#allocation3 + $0xd0] sm:$0xff]  ;;  %v5965_v5 = vpack.c.bf16 %v1424_v13, %v1424_v13 }
 0x172   :  { %888 = vst.msk [vmem:[#allocation3 + $0x9c] sm:$0xf] %vm644_vm4, %v844_v56  ;;  %1006 = vst.msk [vmem:[#allocation3 + $0x48] sm:$0xf] %vm644_vm4, %v844_v56 }
 0x173   :  { %1834 = vst.msk [vmem:[#allocation3 + $0x10c] sm:$0xf] %vm297_vm3, %v7384_v17  ;;  %1976 = vst.msk [vmem:[#allocation3 + $0xb8] sm:$0xf] %vm297_vm3, %v7384_v17  ;;  %1921 = vrot.lane.b32.xlu0 %v7810_v27, %s6913_s29  ;;  %v6569_v17 = vld [vmem:[%s9483_s5 + $0x198] sm:$0xff]  }
 0x174   :  { %1923 = vrot.lane.b32.xlu1 %v7718_v11, %s6913_s29  ;;  %v1256_v3 = vpop.permute.xlu0 %1255  ;;  %6222 = vmatpush3.bf16.msra.mxu0 %v6563_v1 }
 0x175   :  { %v1492_v46 = vpop.permute.xlu1 %1491  ;;  %1298 = vst.msk [vmem:[#allocation3 + $0x110] sm:$0xf] %vm644_vm4, %v1256_v3  ;;  %1368 = vst.msk [vmem:[#allocation3 + $0xbc] sm:$0xf] %vm644_vm4, %v1256_v3  ;;  %6223 = vmatprep.subr.bf16.mxu0 %v6568_v52  ;;  %v2090_v54 = vld [vmem:[#allocation3 + $0xd8] sm:$0xff] }
 0x176   :  { %1536 = vst.msk [vmem:[#allocation3 + $0xa0] sm:$0xf] %vm644_vm4, %v1492_v46  ;;  %1654 = vst.msk [vmem:[#allocation3 + $0x4c] sm:$0xf] %vm644_vm4, %v1492_v46 }
 0x177   :  { %709 = vrot.lane.b32.xlu0 %v7776_v2, %s6913_s29  ;;  %v6577_v2 = vld [vmem:[%s9483_s5 + $0x190] sm:$0xff]  }
 0x178   :  { %711 = vrot.lane.b32.xlu1 %v9499_v63, %s6913_s29  ;;  %v852_v28 = vpop.permute.xlu0 %851  ;;  %6224 = vmatpush3.bf16.msra.mxu0 %v6569_v17 }
 0x179   :  { %v850_v0 = vpop.permute.xlu1 %849  ;;  %892 = vst.msk [vmem:[#allocation3 + $0x16c] sm:$0xf] %vm644_vm4, %v852_v28  ;;  %1010 = vst.msk [vmem:[#allocation3 + $0x118] sm:$0xf] %vm644_vm4, %v852_v28  ;;  %6225 = vmatprep.subr.bf16.mxu0 %v6576_v61  ;;  %v2111_v61 = vld [vmem:[#allocation3 + $0x174] sm:$0xff] }
 0x17a   :  { %1080 = vst.msk [vmem:[#allocation3 + $0xc4] sm:$0xf] %vm644_vm4, %v852_v28  ;;  %891 = vst.msk [vmem:[#allocation3 + $0x138] sm:$0xf] %vm644_vm4, %v850_v0 }
 0x17b   :  { %1009 = vst.msk [vmem:[#allocation3 + $0xe4] sm:$0xf] %vm644_vm4, %v850_v0  ;;  %1079 = vst.msk [vmem:[#allocation3 + $0x90] sm:$0xf] %vm644_vm4, %v850_v0  ;;  %1645 = vrot.lane.b32.xlu0 %v9500_v26, %s6913_s29  ;;  %v6550_v0 = vld [vmem:[#allocation3 + $0x1a4] ss:$52 sps:$4 sm:$0xff]  }
 0x17c   :  { %1647 = vrot.lane.b32.xlu1 %v7778_v9, %s6913_s29  ;;  %v1500_v19 = vpop.permute.xlu0 %1499  ;;  %v2097_v23 = vld [vmem:[#allocation3 + $0x10c] sm:$0xff]  ;;  %6226 = vmatpush3.bf16.msra.mxu0 %v6577_v2 }
 0x17d   :  { %v1498_v38 = vpop.permute.xlu1 %1497  ;;  %v2082_v25 = vld [vmem:[#allocation3 + $0x9c] sm:$0xff]  ;;  %1540 = vst.msk [vmem:[#allocation3 + $0x170] sm:$0xf] %vm644_vm4, %v1500_v19  ;;  %1658 = vst.msk [vmem:[#allocation3 + $0x11c] sm:$0xf] %vm644_vm4, %v1500_v19  ;;  %v5592_v8 = vcombine.low %v2090_v54, %v2097_v23  ;;  %6227 = vmatprep.subr.bf16.mxu0 %v6582_v47  ;;  %v2118_v26 = vld [vmem:[#allocation3 + $0x1a8] sm:$0xff] }
 0x17e   :  { %v6534_v20 = vld [vmem:[#allocation3 + $0x6c] ss:$52 sps:$4 sm:$0xff]   ;;  %1728 = vst.msk [vmem:[#allocation3 + $0xc8] sm:$0xf] %vm644_vm4, %v1500_v19  ;;  %1539 = vst.msk [vmem:[#allocation3 + $0x13c] sm:$0xf] %vm644_vm4, %v1498_v38  ;;  %v5577_v57 = vcombine.low %v2075_v29, %v2082_v25 }
 0x17f   :  { %1657 = vst.msk [vmem:[#allocation3 + $0xe8] sm:$0xf] %vm644_vm4, %v1498_v38  ;;  %1727 = vst.msk [vmem:[#allocation3 + $0x94] sm:$0xf] %vm644_vm4, %v1498_v38  ;;  %v6536_v9 = vld [vmem:[#allocation3 + $0xdc] ss:$52 sps:$4 sm:$0xff]   ;;  %1353 = vrot.lane.b32.xlu0 %v9501_v33, %s6913_s29  ;;  %3564 = vmatprep.mubr.bf16.mxu1 %v6534_v20 }
 0x180   :  { %1355 = vrot.lane.b32.xlu1 %v7840_v24, %s6913_s29  ;;  %3669 = vmatprep.mubr.bf16.mxu0 %v6536_v9  ;;  %v619_v50 = vpop.permute.xlu0 %618  ;;  %v9502_v24 = vld [vmem:[#allocation12_spill] sm:$0xff]  ;;  %v1436_v38 = vld [vmem:[#allocation2 + $0x173] sm:$0xff] }
 0x181   :  { %3670 = vmatmul.mubr.bf16.gmra.mxu0 %v5592_v8  ;;  %v609_v55 = vpop.permute.xlu1 %608  ;;  %3565 = vmatmul.mubr.bf16.gmra.mxu1 %v5577_v57  ;;  %656 = vst.msk [vmem:[#allocation3 + $0x244] sm:$0xf] %vm644_vm4, %v619_v50  ;;  %726 = vst.msk [vmem:[#allocation3 + $0x1f0] sm:$0xf] %vm644_vm4, %v619_v50  ;;  %v5967_v20 = vpack.c.bf16 %v1436_v38, %v1436_v38  ;;  %v6599_v38 = vld [vmem:[%s9483_s5 + $0x238] sm:$0xff]  }
 0x182   :  { %651 = vst.msk [vmem:[#allocation3 + $0x140] sm:$0xf] %vm644_vm4, %v609_v55  ;;  %721 = vst.msk [vmem:[#allocation3 + $0xec] sm:$0xf] %vm644_vm4, %v609_v55  ;;  %3572 = vmatprep.mubr.bf16.mxu1 %v6538_v49  ;;  %6228 = vmatpush3.bf16.msra.mxu0 %v6583_v35 }
 0x183   :  { %1840 = vst.msk [vmem:[#allocation3 + $0x244] sm:$0xf] %vm297_vm3, %v8057_v21  ;;  %1982 = vst.msk [vmem:[#allocation3 + $0x1f0] sm:$0xf] %vm297_vm3, %v8057_v21  ;;  %2001 = vrot.lane.b32.xlu0 %v9502_v24, %s6913_s29  ;;  %v6594_v21 = vld [vmem:[%s9483_s5 + $0x180] sm:$0xff]   ;;  %6229 = vmatprep.subr.bf16.mxu0 %v6590_v18 }
 0x184   :  { %1835 = vst.msk [vmem:[#allocation3 + $0x140] sm:$0xf] %vm297_vm3, %v7487_v60  ;;  %1977 = vst.msk [vmem:[#allocation3 + $0xec] sm:$0xf] %vm297_vm3, %v7487_v60  ;;  %2003 = vrot.lane.b32.xlu1 %v7848_v31, %s6913_s29  ;;  %v1268_v42 = vpop.permute.xlu0 %1267  ;;  %v6604_v60 = vld [vmem:[%s9483_s5 + $0x2f8] sm:$0xff]   ;;  %v5590_v31 = vcombine.low %v2089_v16, %v2096_v39  ;;  %v2110_v3 = vld [vmem:[#allocation3 + $0x16c] sm:$0xff] }
 0x185   :  { %v1258_v14 = vpop.permute.xlu1 %1257  ;;  %1304 = vst.msk [vmem:[#allocation3 + $0x248] sm:$0xf] %vm644_vm4, %v1268_v42  ;;  %1374 = vst.msk [vmem:[#allocation3 + $0x1f4] sm:$0xf] %vm644_vm4, %v1268_v42  ;;  %v6542_v56 = vld [vmem:[#allocation3 + $0x13c] ss:$52 sps:$4 sm:$0xff]  }
 0x186   :  { %1299 = vst.msk [vmem:[#allocation3 + $0x144] sm:$0xf] %vm644_vm4, %v1258_v14  ;;  %1369 = vst.msk [vmem:[#allocation3 + $0xf0] sm:$0xf] %vm644_vm4, %v1258_v14  ;;  %6230 = vmatpush3.bf16.msra.mxu0 %v6594_v21 }
 0x187   :  { %1065 = vrot.lane.b32.xlu0 %v7862_v6, %s6913_s29  ;;  %6343 = vmatprep.subr.bf16.mxu0 %v6604_v60  ;;  %v2103_v6 = vld [vmem:[#allocation3 + $0x138] sm:$0xff] }
 0x188   :  { %1067 = vrot.lane.b32.xlu1 %v5877_v32, %s6913_s29  ;;  %v615_v1 = vpop.permute.xlu0 %614 }
 0x189   :  { %v862_v52 = vpop.permute.xlu1 %861  ;;  %3573 = vmatmul.mubr.bf16.gmra.mxu1 %v5590_v31  ;;  %654 = vst.msk [vmem:[#allocation3 + $0x1dc] sm:$0xf] %vm644_vm4, %v615_v1  ;;  %v1116_v1 = vld [vmem:[#allocation2 + $0x172] sm:$0xff] }
 0x18a   :  { %897 = vst.msk [vmem:[#allocation3 + $0x270] sm:$0xf] %vm644_vm4, %v862_v52  ;;  %1015 = vst.msk [vmem:[#allocation3 + $0x21c] sm:$0xf] %vm644_vm4, %v862_v52  ;;  %3580 = vmatprep.mubr.bf16.mxu1 %v6542_v56  ;;  %v467_v56 = vld [vmem:[#allocation2 + $0x170] sm:$0xff] }
 0x18b   :  { %1085 = vst.msk [vmem:[#allocation3 + $0x1c8] sm:$0xf] %vm644_vm4, %v862_v52  ;;  %1713 = vrot.lane.b32.xlu0 %v7870_v40, %s6913_s29  ;;  %v5603_v40 = vcombine.low %v2103_v6, %v2110_v3  ;;  %v5835_v52 = vpack.c.bf16 %v467_v56, %v467_v56  ;;  %v5923_v6 = vpack.c.bf16 %v1116_v1, %v1116_v1 }
 0x18c   :  { %1838 = vst.msk [vmem:[#allocation3 + $0x1dc] sm:$0xf] %vm297_vm3, %v8042_v7  ;;  %1715 = vrot.lane.b32.xlu1 %v5965_v5, %s6913_s29  ;;  %v1264_v46 = vpop.permute.xlu0 %1263  ;;  %v2139_v33 = vld [vmem:[#allocation3 + $0x244] sm:$0xff] }
 0x18d   :  { %v1510_v17 = vpop.permute.xlu1 %1509  ;;  %v2104_v63 = vld [vmem:[#allocation3 + $0x140] sm:$0xff]  ;;  %1302 = vst.msk [vmem:[#allocation3 + $0x1e0] sm:$0xf] %vm644_vm4, %v1264_v46 }
 0x18e   :  { %v6548_v28 = vld [vmem:[#allocation3 + $0x144] ss:$52 sps:$4 sm:$0xff]   ;;  %1545 = vst.msk [vmem:[#allocation3 + $0x274] sm:$0xf] %vm644_vm4, %v1510_v17  ;;  %1663 = vst.msk [vmem:[#allocation3 + $0x220] sm:$0xf] %vm644_vm4, %v1510_v17  ;;  %v5605_v7 = vcombine.low %v2104_v63, %v2111_v61 }
 0x18f   :  { %1733 = vst.msk [vmem:[#allocation3 + $0x1cc] sm:$0xf] %vm644_vm4, %v1510_v17  ;;  %1357 = vrot.lane.b32.xlu0 %v7786_v43, %s6913_s29  ;;  %3677 = vmatprep.mubr.bf16.mxu0 %v6548_v28  ;;  %v2117_v43 = vld [vmem:[#allocation3 + $0x1a0] sm:$0xff] }
 0x190   :  { %1359 = vrot.lane.b32.xlu1 %v7887_v10, %s6913_s29  ;;  %v864_v2 = vpop.permute.xlu0 %863  ;;  %3678 = vmatmul.mubr.bf16.gmra.mxu0 %v5605_v7  ;;  %v2124_v10 = vld [vmem:[#allocation3 + $0x1d4] sm:$0xff]  ;;  %764 = vst.msk [vmem:[#allocation3 + $0x334] sm:$0xf] %vm297_vm3, %v5835_v52  ;;  %1412 = vst.msk [vmem:[#allocation3 + $0x338] sm:$0xf] %vm297_vm3, %v5923_v6  ;;  %v2092_v6 = vld [vmem:[#allocation3 + $0xe8] sm:$0xff] }
 0x191   :  { %v858_v12 = vpop.permute.xlu1 %857  ;;  %3581 = vmatmul.mubr.bf16.gmra.mxu1 %v5603_v40  ;;  %898 = vst.msk [vmem:[#allocation3 + $0x2a4] sm:$0xf] %vm644_vm4, %v864_v2  ;;  %1016 = vst.msk [vmem:[#allocation3 + $0x250] sm:$0xf] %vm644_vm4, %v864_v2  ;;  %v5616_v25 = vcombine.low %v2117_v43, %v2124_v10  ;;  %v1752_v40 = vld [vmem:[#allocation2 + $0xb4] sm:$0xff] }
 0x192   :  { %1086 = vst.msk [vmem:[#allocation3 + $0x1fc] sm:$0xf] %vm644_vm4, %v864_v2  ;;  %895 = vst.msk [vmem:[#allocation3 + $0x208] sm:$0xf] %vm644_vm4, %v858_v12  ;;  %3588 = vmatprep.mubr.bf16.mxu1 %v6550_v0  ;;  %v6009_v0 = vpack.c.bf16 %v1752_v40, %v1752_v40 }
 0x193   :  { %1013 = vst.msk [vmem:[#allocation3 + $0x1b4] sm:$0xf] %vm644_vm4, %v858_v12  ;;  %2005 = vrot.lane.b32.xlu0 %v7788_v44, %s6913_s29 }
 0x194   :  { %2007 = vrot.lane.b32.xlu1 %v7895_v4, %s6913_s29  ;;  %v1512_v29 = vpop.permute.xlu0 %1511  ;;  %v2125_v15 = vld [vmem:[#allocation3 + $0x1dc] sm:$0xff]  ;;  %2052 = vst.msk [vmem:[#allocation3 + $0x19c] sm:$0xf] %vm297_vm3, %v6009_v0  ;;  %v6639_v0 = vld [vmem:[%s9483_s5 + $0x210] sm:$0xff]  }
 0x195   :  { %v1506_v54 = vpop.permute.xlu1 %1505  ;;  %v6556_v19 = vld [vmem:[#allocation3 + $0x1ac] ss:$52 sps:$4 sm:$0xff]   ;;  %1546 = vst.msk [vmem:[#allocation3 + $0x2a8] sm:$0xf] %vm644_vm4, %v1512_v29  ;;  %1664 = vst.msk [vmem:[#allocation3 + $0x254] sm:$0xf] %vm644_vm4, %v1512_v29  ;;  %v5618_v4 = vcombine.low %v2118_v26, %v2125_v15 }
 0x196   :  { %1734 = vst.msk [vmem:[#allocation3 + $0x200] sm:$0xf] %vm644_vm4, %v1512_v29  ;;  %1543 = vst.msk [vmem:[#allocation3 + $0x20c] sm:$0xf] %vm644_vm4, %v1506_v54  ;;  %3685 = vmatprep.mubr.bf16.mxu0 %v6556_v19  ;;  %v2145_v13 = vld [vmem:[#allocation3 + $0x270] sm:$0xff] }
 0x197   :  { %1661 = vst.msk [vmem:[#allocation3 + $0x1b8] sm:$0xf] %vm644_vm4, %v1506_v54  ;;  %1069 = vrot.lane.b32.xlu0 %v7979_v58, %s6913_s29  ;;  %v6597_v19 = vld [vmem:[#allocation3 + $0x14] ss:$52 sps:$4 sm:$0xff]  }
 0x198   :  { %1071 = vrot.lane.b32.xlu1 %v5879_v51, %s6913_s29  ;;  %v621_v23 = vpop.permute.xlu0 %620  ;;  %3686 = vmatmul.mubr.bf16.gmra.mxu0 %v5618_v4  ;;  %v6593_v51 = vld [vmem:[#allocation3 + $0x1c] ss:$52 sps:$4 sm:$0xff]  }
 0x199   :  { %v617_v9 = vpop.permute.xlu1 %616  ;;  %3589 = vmatmul.mubr.bf16.gmra.mxu1 %v5616_v25  ;;  %657 = vst.msk [vmem:[#allocation3 + $0x278] sm:$0xf] %vm644_vm4, %v621_v23  ;;  %727 = vst.msk [vmem:[#allocation3 + $0x224] sm:$0xf] %vm644_vm4, %v621_v23  ;;  %v6606_v4 = vld [vmem:[%s9483_s5 + $0x270] sm:$0xff]   ;;  %v6605_v25 = vld [vmem:[%s9483_s5 + $0x2b8] sm:$0xff]  }
 0x19a   :  { %655 = vst.msk [vmem:[#allocation3 + $0x210] sm:$0xf] %vm644_vm4, %v617_v9  ;;  %725 = vst.msk [vmem:[#allocation3 + $0x1bc] sm:$0xf] %vm644_vm4, %v617_v9  ;;  %v6600_v9 = vld [vmem:[#allocation3 + $0x7c] ss:$52 sps:$4 sm:$0xff]  }
 0x19b   :  { %1841 = vst.msk [vmem:[#allocation3 + $0x278] sm:$0xf] %vm297_vm3, %v7597_v53  ;;  %1983 = vst.msk [vmem:[#allocation3 + $0x224] sm:$0xf] %vm297_vm3, %v7597_v53  ;;  %1717 = vrot.lane.b32.xlu0 %v7987_v59, %s6913_s29 }
 0x19c   :  { %1839 = vst.msk [vmem:[#allocation3 + $0x210] sm:$0xf] %vm297_vm3, %v8044_v62  ;;  %1981 = vst.msk [vmem:[#allocation3 + $0x1bc] sm:$0xf] %vm297_vm3, %v8044_v62  ;;  %1719 = vrot.lane.b32.xlu1 %v5967_v20, %s6913_s29  ;;  %v2152_v39 = vld [vmem:[#allocation3 + $0x2a4] sm:$0xff] }
 0x19d   :  { %v860_v58 = vpop.permute.xlu0 %859  ;;  %v2131_v35 = vld [vmem:[#allocation3 + $0x208] sm:$0xff]  ;;  %v5642_v5 = vcombine.low %v2145_v13, %v2152_v39 }
 0x19e   :  { %v1266_v8 = vpop.permute.xlu1 %1265  ;;  %896 = vst.msk [vmem:[#allocation3 + $0x23c] sm:$0xf] %vm644_vm4, %v860_v58  ;;  %1014 = vst.msk [vmem:[#allocation3 + $0x1e8] sm:$0xf] %vm644_vm4, %v860_v58  ;;  %v6607_v58 = vld [vmem:[%s9483_s5 + $0x230] sm:$0xff]  }
 0x19f   :  { %1303 = vst.msk [vmem:[#allocation3 + $0x214] sm:$0xf] %vm644_vm4, %v1266_v8  ;;  %1373 = vst.msk [vmem:[#allocation3 + $0x1c0] sm:$0xf] %vm644_vm4, %v1266_v8  ;;  %v6612_v8 = vld [vmem:[%s9483_s5 + $0x2f0] sm:$0xff]  }
 0x1a1   :  { %v1508_v53 = vpop.permute.xlu0 %1507 }
 0x1a2   :  { %v627_v57 = vpop.permute.xlu1 %626  ;;  %1544 = vst.msk [vmem:[#allocation3 + $0x240] sm:$0xf] %vm644_vm4, %v1508_v53  ;;  %1662 = vst.msk [vmem:[#allocation3 + $0x1ec] sm:$0xf] %vm644_vm4, %v1508_v53  ;;  %v6591_v53 = vld [vmem:[#allocation3 + $0x18] ss:$52 sps:$4 sm:$0xff]  }
 0x1a3   :  { %660 = vst.msk [vmem:[#allocation3 + $0x314] sm:$0xf] %vm644_vm4, %v627_v57  ;;  %730 = vst.msk [vmem:[#allocation3 + $0x2c0] sm:$0xf] %vm644_vm4, %v627_v57  ;;  %v6602_v57 = vld [vmem:[#allocation3 + $0x84] ss:$52 sps:$4 sm:$0xff]  }
 0x1a4   :  { %1844 = vst.msk [vmem:[#allocation3 + $0x314] sm:$0xf] %vm297_vm3, %v7810_v27  ;;  %1986 = vst.msk [vmem:[#allocation3 + $0x2c0] sm:$0xf] %vm297_vm3, %v7810_v27 }
 0x1a5   :  { %v1270_v59 = vpop.permute.xlu0 %1269 }
 0x1a6   :  { %v623_v62 = vpop.permute.xlu1 %622  ;;  %v2132_v47 = vld [vmem:[#allocation3 + $0x210] sm:$0xff]  ;;  %1305 = vst.msk [vmem:[#allocation3 + $0x27c] sm:$0xf] %vm644_vm4, %v1270_v59  ;;  %1375 = vst.msk [vmem:[#allocation3 + $0x228] sm:$0xf] %vm644_vm4, %v1270_v59  ;;  %v6614_v59 = vld [vmem:[%s9483_s5 + $0x268] sm:$0xff]  }
 0x1a7   :  { %v6566_v22 = vld [vmem:[#allocation3 + $0x214] ss:$52 sps:$4 sm:$0xff]   ;;  %658 = vst.msk [vmem:[#allocation3 + $0x2ac] sm:$0xf] %vm644_vm4, %v623_v62  ;;  %728 = vst.msk [vmem:[#allocation3 + $0x258] sm:$0xf] %vm644_vm4, %v623_v62  ;;  %v5631_v49 = vcombine.low %v2132_v47, %v2139_v33 }
 0x1a8   :  { %1842 = vst.msk [vmem:[#allocation3 + $0x2ac] sm:$0xf] %vm297_vm3, %v7658_v30  ;;  %1984 = vst.msk [vmem:[#allocation3 + $0x258] sm:$0xf] %vm297_vm3, %v7658_v30  ;;  %3693 = vmatprep.mubr.bf16.mxu0 %v6566_v22  ;;  %v6574_v30 = vld [vmem:[#allocation3 + $0x274] ss:$52 sps:$4 sm:$0xff]  }
 0x1a9   :  { %3694 = vmatmul.mubr.bf16.gmra.mxu0 %v5631_v49  ;;  %v866_v27 = vpop.permute.xlu0 %865  ;;  %v2138_v48 = vld [vmem:[#allocation3 + $0x23c] sm:$0xff]  ;;  %v6613_v49 = vld [vmem:[%s9483_s5 + $0x2b0] sm:$0xff]  }
 0x1aa   :  { %v1272_v34 = vpop.permute.xlu1 %1271  ;;  %v6570_v50 = vld [vmem:[#allocation3 + $0x20c] ss:$52 sps:$4 sm:$0xff]   ;;  %899 = vst.msk [vmem:[#allocation3 + $0x2d8] sm:$0xf] %vm644_vm4, %v866_v27  ;;  %1017 = vst.msk [vmem:[#allocation3 + $0x284] sm:$0xf] %vm644_vm4, %v866_v27  ;;  %v5629_v55 = vcombine.low %v2131_v35, %v2138_v48 }
 0x1ab   :  { %1087 = vst.msk [vmem:[#allocation3 + $0x230] sm:$0xf] %vm644_vm4, %v866_v27  ;;  %1306 = vst.msk [vmem:[#allocation3 + $0x2b0] sm:$0xf] %vm644_vm4, %v1272_v34  ;;  %3596 = vmatprep.mubr.bf16.mxu1 %v6570_v50  ;;  %v6615_v27 = vld [vmem:[%s9483_s5 + $0x228] sm:$0xff]   ;;  %v2085_v35 = vld [vmem:[#allocation3 + $0xb4] sm:$0xff] }
 0x1ac   :  { %1376 = vst.msk [vmem:[#allocation3 + $0x25c] sm:$0xf] %vm644_vm4, %v1272_v34  ;;  %3597 = vmatmul.mubr.bf16.gmra.mxu1 %v5629_v55  ;;  %v6618_v34 = vld [vmem:[%s9483_s5 + $0x2e8] sm:$0xff]   ;;  %v6622_v50 = vld [vmem:[%s9483_s5 + $0x260] sm:$0xff]   ;;  %v1764_v55 = vld [vmem:[#allocation2 + $0x174] sm:$0xff] }
 0x1ad   :  { %v1514_v18 = vpop.permute.xlu0 %1513  ;;  %3604 = vmatprep.mubr.bf16.mxu1 %v6574_v30  ;;  %v2146_v14 = vld [vmem:[#allocation3 + $0x278] sm:$0xff] }
 0x1ae   :  { %v868_v32 = vpop.permute.xlu1 %867  ;;  %1547 = vst.msk [vmem:[#allocation3 + $0x2dc] sm:$0xf] %vm644_vm4, %v1514_v18  ;;  %1665 = vst.msk [vmem:[#allocation3 + $0x288] sm:$0xf] %vm644_vm4, %v1514_v18  ;;  %v6608_v30 = vld [vmem:[#allocation3 + $0xe4] ss:$52 sps:$4 sm:$0xff]  }
 0x1af   :  { %1735 = vst.msk [vmem:[#allocation3 + $0x234] sm:$0xf] %vm644_vm4, %v1514_v18  ;;  %900 = vst.msk [vmem:[#allocation3 + $0x30c] sm:$0xf] %vm644_vm4, %v868_v32  ;;  %v6011_v18 = vpack.c.bf16 %v1764_v55, %v1764_v55 }
 0x1b0   :  { %1018 = vst.msk [vmem:[#allocation3 + $0x2b8] sm:$0xf] %vm644_vm4, %v868_v32  ;;  %1088 = vst.msk [vmem:[#allocation3 + $0x264] sm:$0xf] %vm644_vm4, %v868_v32  ;;  %v2078_v32 = vld [vmem:[#allocation3 + $0x80] sm:$0xff] }
 0x1b1   :  { %v625_v21 = vpop.permute.xlu0 %624  ;;  %2060 = vst.msk [vmem:[#allocation3 + $0x33c] sm:$0xf] %vm297_vm3, %v6011_v18 }
 0x1b2   :  { %v1516_v42 = vpop.permute.xlu1 %1515  ;;  %v2153_v60 = vld [vmem:[#allocation3 + $0x2ac] sm:$0xff]  ;;  %659 = vst.msk [vmem:[#allocation3 + $0x2e0] sm:$0xf] %vm644_vm4, %v625_v21  ;;  %729 = vst.msk [vmem:[#allocation3 + $0x28c] sm:$0xf] %vm644_vm4, %v625_v21 }
 0x1b3   :  { %v6578_v16 = vld [vmem:[#allocation3 + $0x27c] ss:$52 sps:$4 sm:$0xff]   ;;  %1548 = vst.msk [vmem:[#allocation3 + $0x310] sm:$0xf] %vm644_vm4, %v1516_v42  ;;  %1666 = vst.msk [vmem:[#allocation3 + $0x2bc] sm:$0xf] %vm644_vm4, %v1516_v42  ;;  %v5644_v31 = vcombine.low %v2146_v14, %v2153_v60 }
 0x1b4   :  { %1736 = vst.msk [vmem:[#allocation3 + $0x268] sm:$0xf] %vm644_vm4, %v1516_v42  ;;  %3701 = vmatprep.mubr.bf16.mxu0 %v6578_v16  ;;  %3605 = vmatmul.mubr.bf16.gmra.mxu1 %v5642_v5  ;;  %v6619_v21 = vld [vmem:[%s9483_s5 + $0x2a8] sm:$0xff]   ;;  %v5583_v42 = vcombine.low %v2078_v32, %v2085_v35  ;;  %v6623_v14 = vld [vmem:[%s9483_s5 + $0x220] sm:$0xff]  }
 0x1b5   :  { %1843 = vst.msk [vmem:[#allocation3 + $0x2e0] sm:$0xf] %vm297_vm3, %v7748_v41  ;;  %1985 = vst.msk [vmem:[#allocation3 + $0x28c] sm:$0xf] %vm297_vm3, %v7748_v41  ;;  %3702 = vmatmul.mubr.bf16.gmra.mxu0 %v5644_v31  ;;  %v1274_v3 = vpop.permute.xlu0 %1273  ;;  %v2159_v63 = vld [vmem:[#allocation3 + $0x2d8] sm:$0xff]  ;;  %v6628_v60 = vld [vmem:[%s9483_s5 + $0x2e0] sm:$0xff]  }
 0x1b6   :  { %v1276_v46 = vpop.permute.xlu1 %1275  ;;  %1307 = vst.msk [vmem:[#allocation3 + $0x2e4] sm:$0xf] %vm644_vm4, %v1274_v3  ;;  %1377 = vst.msk [vmem:[#allocation3 + $0x290] sm:$0xf] %vm644_vm4, %v1274_v3  ;;  %v6610_v16 = vld [vmem:[#allocation3 + $0xec] ss:$52 sps:$4 sm:$0xff]  }
 0x1b7   :  { %1308 = vst.msk [vmem:[#allocation3 + $0x318] sm:$0xf] %vm644_vm4, %v1276_v46  ;;  %1378 = vst.msk [vmem:[#allocation3 + $0x2c4] sm:$0xf] %vm644_vm4, %v1276_v46  ;;  %v6630_v31 = vld [vmem:[%s9483_s5 + $0x258] sm:$0xff]  }
 0x1b8   :  { %v6636_v46 = vld [vmem:[%s9483_s5 + $0x2d8] sm:$0xff]  }
 0x1b9   :  { %v1894_v41 = vpop.permute.xlu0 %1893  ;;  %v6634_v32 = vld [vmem:[#allocation3 + $0x224] ss:$52 sps:$4 sm:$0xff]  }
 0x1ba   :  { %v1896_v17 = vpop.permute.xlu1 %1895  ;;  %v2166_v61 = vld [vmem:[#allocation3 + $0x30c] sm:$0xff]  ;;  %1941 = vst.msk [vmem:[#allocation3 + $0x10] sm:$0xf] %vm644_vm4, %v1894_v41 }
 0x1bb   :  { %v6584_v28 = vld [vmem:[#allocation3 + $0x2dc] ss:$52 sps:$4 sm:$0xff]   ;;  %1942 = vst.msk [vmem:[#allocation3 + $0x44] sm:$0xf] %vm644_vm4, %v1896_v17  ;;  %v5655_v7 = vcombine.low %v2159_v63, %v2166_v61 }
 0x1bc   :  { %3612 = vmatprep.mubr.bf16.mxu1 %v6584_v28  ;;  %v6638_v41 = vld [vmem:[%s9483_s5 + $0x250] sm:$0xff]   ;;  %v2099_v63 = vld [vmem:[#allocation3 + $0x11c] sm:$0xff] }
 0x1bd   :  { %3613 = vmatmul.mubr.bf16.gmra.mxu1 %v5655_v7  ;;  %v1898_v2 = vpop.permute.xlu0 %1897  ;;  %v2160_v45 = vld [vmem:[#allocation3 + $0x2e0] sm:$0xff]  ;;  %v6637_v7 = vld [vmem:[%s9483_s5 + $0x298] sm:$0xff]   ;;  %v5596_v40 = vcombine.low %v2092_v6, %v2099_v63  ;;  %v2148_v6 = vld [vmem:[#allocation3 + $0x288] sm:$0xff] }
 0x1be   :  { %v1900_v12 = vpop.permute.xlu1 %1899  ;;  %v2167_v43 = vld [vmem:[#allocation3 + $0x314] sm:$0xff]  ;;  %1943 = vst.msk [vmem:[#allocation3 + $0x78] sm:$0xf] %vm644_vm4, %v1898_v2  ;;  %2013 = vst.msk [vmem:[#allocation3 + $0x24] sm:$0xf] %vm644_vm4, %v1898_v2  ;;  %3750 = vmatprep.mubr.bf16.mxu1 %v6597_v19 }
 0x1bf   :  { %v6588_v10 = vld [vmem:[#allocation3 + $0x2e4] ss:$52 sps:$4 sm:$0xff]   ;;  %1944 = vst.msk [vmem:[#allocation3 + $0xac] sm:$0xf] %vm644_vm4, %v1900_v12  ;;  %2014 = vst.msk [vmem:[#allocation3 + $0x58] sm:$0xf] %vm644_vm4, %v1900_v12  ;;  %v5657_v26 = vcombine.low %v2160_v45, %v2167_v43 }
 0x1c0   :  { %3709 = vmatprep.mubr.bf16.mxu0 %v6588_v10  ;;  %v6644_v2 = vld [vmem:[%s9483_s5 + $0x2d0] sm:$0xff]   ;;  %v6646_v12 = vld [vmem:[%s9483_s5 + $0x248] sm:$0xff]  }
 0x1c1   :  { %3710 = vmatmul.mubr.bf16.gmra.mxu0 %v5657_v26  ;;  %v1902_v29 = vpop.permute.xlu0 %1901 }
 0x1c2   :  { %v1904_v54 = vpop.permute.xlu1 %1903  ;;  %3847 = vmatprep.mubr.bf16.mxu0 %v6593_v51  ;;  %v6595_v15 = vld [vmem:[#allocation3 + $0x10] ss:$52 sps:$4 sm:$0xff]   ;;  %1945 = vst.msk [vmem:[#allocation3 + $0xe0] sm:$0xf] %vm644_vm4, %v1902_v29  ;;  %2015 = vst.msk [vmem:[#allocation3 + $0x8c] sm:$0xf] %vm644_vm4, %v1902_v29 }
 0x1c3   :  { %1946 = vst.msk [vmem:[#allocation3 + $0x114] sm:$0xf] %vm644_vm4, %v1904_v54  ;;  %2016 = vst.msk [vmem:[#allocation3 + $0xc0] sm:$0xf] %vm644_vm4, %v1904_v54  ;;  %v6645_v29 = vld [vmem:[%s9483_s5 + $0x290] sm:$0xff]   ;;  %v6647_v54 = vld [vmem:[%s9483_s5 + $0x208] sm:$0xff]  }
 0x1c5   :  { %v994_v20 = vpop.permute.xlu0 %993  ;;  %3751 = vmatmul.mubr.bf16.vlgmr.msra.gmra.mxu1 %v6595_v15  ;;  %v2077_v62 = vld [vmem:[#allocation3 + $0x78] sm:$0xff]  ;;  %v6652_v15 = vld [vmem:[%s9483_s5 + $0x2c8] sm:$0xff]  }
 0x1c6   :  { %v996_v23 = vpop.permute.xlu1 %995  ;;  %1011 = vst.msk [vmem:[#allocation3 + $0x14c] sm:$0xf] %vm644_vm4, %v994_v20  ;;  %1081 = vst.msk [vmem:[#allocation3 + $0xf8] sm:$0xf] %vm644_vm4, %v994_v20  ;;  %6280 = vmatpush3.bf16.msra.mxu1 %v6599_v38  ;;  %3758 = vmatprep.mubr.bf16.mxu1 %v6600_v9  ;;  %v2084_v47 = vld [vmem:[#allocation3 + $0xac] sm:$0xff] }
 0x1c7   :  { %1012 = vst.msk [vmem:[#allocation3 + $0x180] sm:$0xf] %vm644_vm4, %v996_v23  ;;  %1082 = vst.msk [vmem:[#allocation3 + $0x12c] sm:$0xf] %vm644_vm4, %v996_v23  ;;  %6281 = vmatprep.subr.bf16.mxu1 %v6606_v4  ;;  %v5581_v48 = vcombine.low %v2077_v62, %v2084_v47  ;;  %v6624_v9 = vld [vmem:[#allocation3 + $0x1b4] ss:$52 sps:$4 sm:$0xff]  }
 0x1c8   :  { %v8432_v62 = vld [vmem:[%s9483_s5 + $0x318] sm:$0xff]  }
 0x1c9   :  { %3848 = vmatmul.mubr.bf16.vlgmr.msra.gmra.mxu0 %v6591_v53  ;;  %v1906_v33 = vpop.permute.xlu0 %1905  ;;  %v2091_v5 = vld [vmem:[#allocation3 + $0xe0] sm:$0xff] }
 0x1ca   :  { %v1908_v22 = vpop.permute.xlu1 %1907  ;;  %3855 = vmatprep.mubr.bf16.mxu0 %v6602_v57  ;;  %6344 = vmatpush3.bf16.msra.mxu0 %v6605_v25  ;;  %1947 = vst.msk [vmem:[#allocation3 + $0x148] sm:$0xf] %vm644_vm4, %v1906_v33  ;;  %2017 = vst.msk [vmem:[#allocation3 + $0xf4] sm:$0xf] %vm644_vm4, %v1906_v33  ;;  %v2098_v56 = vld [vmem:[#allocation3 + $0x114] sm:$0xff]  ;;  %v6654_v25 = vld [vmem:[%s9483_s5 + $0x240] sm:$0xff]  }
 0x1cb   :  { %1948 = vst.msk [vmem:[#allocation3 + $0x17c] sm:$0xf] %vm644_vm4, %v1908_v22  ;;  %2018 = vst.msk [vmem:[#allocation3 + $0x128] sm:$0xf] %vm644_vm4, %v1908_v22  ;;  %6282 = vmatpush3.bf16.msra.mxu1 %v6607_v58  ;;  %6345 = vmatprep.subr.bf16.mxu0 %v6612_v8  ;;  %v5594_v3 = vcombine.low %v2091_v5, %v2098_v56  ;;  %v6653_v58 = vld [vmem:[%s9483_s5 + $0x288] sm:$0xff]   ;;  %v6655_v53 = vld [vmem:[%s9483_s5 + $0x200] sm:$0xff]  }
 0x1cc   :  { %6283 = vmatprep.subr.bf16.mxu1 %v6614_v59  ;;  %v6659_v57 = vld [vmem:[%s9483_s5 + $0x2c0] sm:$0xff]   ;;  %v6626_v59 = vld [vmem:[#allocation3 + $0x1bc] ss:$52 sps:$4 sm:$0xff]  }
 0x1cd   :  { %v706_v39 = vpop.permute.xlu0 %705  ;;  %3759 = vmatmul.mubr.bf16.gmra.mxu1 %v5581_v48  ;;  %v6632_v48 = vld [vmem:[#allocation3 + $0x21c] ss:$52 sps:$4 sm:$0xff]  }
 0x1ce   :  { %v708_v13 = vpop.permute.xlu1 %707  ;;  %6346 = vmatpush3.bf16.msra.mxu0 %v6613_v49  ;;  %723 = vst.msk [vmem:[#allocation3 + $0x154] sm:$0xf] %vm644_vm4, %v706_v39  ;;  %3766 = vmatprep.mubr.bf16.mxu1 %v6608_v30  ;;  %v6616_v17 = vld [vmem:[#allocation3 + $0x14c] ss:$52 sps:$4 sm:$0xff]  }
 0x1cf   :  { %724 = vst.msk [vmem:[#allocation3 + $0x188] sm:$0xf] %vm644_vm4, %v708_v13  ;;  %6284 = vmatpush3.bf16.msra.mxu1 %v6615_v27  ;;  %6347 = vmatprep.subr.bf16.mxu0 %v6618_v34  ;;  %v6663_v27 = vld [vmem:[%s9483_s5 + $0x280] sm:$0xff]   ;;  %v2127_v34 = vld [vmem:[#allocation3 + $0x1ec] sm:$0xff] }
 0x1d0   :  { %1979 = vst.msk [vmem:[#allocation3 + $0x154] sm:$0xf] %vm297_vm3, %v7452_v36  ;;  %1980 = vst.msk [vmem:[#allocation3 + $0x188] sm:$0xf] %vm297_vm3, %v9502_v24  ;;  %6285 = vmatprep.subr.bf16.mxu1 %v6622_v50  ;;  %v6629_v36 = vld [vmem:[%s9483_s5 + $0x2a0] sm:$0xff]   ;;  %v6631_v24 = vld [vmem:[%s9483_s5 + $0x218] sm:$0xff]  }
 0x1d1   :  { %3856 = vmatmul.mubr.bf16.gmra.mxu0 %v5583_v42  ;;  %v1642_v1 = vpop.permute.xlu0 %1641  ;;  %v2105_v45 = vld [vmem:[#allocation3 + $0x148] sm:$0xff]  ;;  %v2120_v50 = vld [vmem:[#allocation3 + $0x1b8] sm:$0xff] }
 0x1d2   :  { %v1644_v52 = vpop.permute.xlu1 %1643  ;;  %3863 = vmatprep.mubr.bf16.mxu0 %v6610_v16  ;;  %6348 = vmatpush3.bf16.msra.mxu0 %v6619_v21  ;;  %1659 = vst.msk [vmem:[#allocation3 + $0x150] sm:$0xf] %vm644_vm4, %v1642_v1  ;;  %1729 = vst.msk [vmem:[#allocation3 + $0xfc] sm:$0xf] %vm644_vm4, %v1642_v1  ;;  %v2112_v43 = vld [vmem:[#allocation3 + $0x17c] sm:$0xff]  ;;  %v5622_v18 = vcombine.low %v2120_v50, %v2127_v34 }
 0x1d3   :  { %1660 = vst.msk [vmem:[#allocation3 + $0x184] sm:$0xf] %vm644_vm4, %v1644_v52  ;;  %1730 = vst.msk [vmem:[#allocation3 + $0x130] sm:$0xf] %vm644_vm4, %v1644_v52  ;;  %6286 = vmatpush3.bf16.msra.mxu1 %v6623_v14  ;;  %6349 = vmatprep.subr.bf16.mxu0 %v6628_v60  ;;  %v5607_v4 = vcombine.low %v2105_v45, %v2112_v43  ;;  %v2141_v14 = vld [vmem:[#allocation3 + $0x254] sm:$0xff] }
 0x1d4   :  { %6287 = vmatprep.subr.bf16.mxu1 %v6630_v31  ;;  %v6640_v16 = vld [vmem:[#allocation3 + $0x284] ss:$52 sps:$4 sm:$0xff]   ;;  %v6642_v1 = vld [vmem:[#allocation3 + $0x28c] ss:$52 sps:$4 sm:$0xff]  }
 0x1d5   :  { %v1910_v61 = vpop.permute.xlu0 %1909  ;;  %3767 = vmatmul.mubr.bf16.gmra.mxu1 %v5594_v3  ;;  %v2134_v31 = vld [vmem:[#allocation3 + $0x220] sm:$0xff]  ;;  %v6679_v50 = vld [vmem:[#allocation3 + $0xf8] ss:$52 sps:$4 sm:$0xff]  }
 0x1d6   :  { %v1912_v28 = vpop.permute.xlu1 %1911  ;;  %6350 = vmatpush3.bf16.msra.mxu0 %v6629_v36  ;;  %1949 = vst.msk [vmem:[#allocation3 + $0x1b0] sm:$0xf] %vm644_vm4, %v1910_v61  ;;  %3774 = vmatprep.mubr.bf16.mxu1 %v6616_v17  ;;  %v2155_v3 = vld [vmem:[#allocation3 + $0x2bc] sm:$0xff]  ;;  %v6676_v34 = vld [vmem:[#allocation3 + $0xf0] ss:$52 sps:$4 sm:$0xff]  }
 0x1d7   :  { %1950 = vst.msk [vmem:[#allocation3 + $0x1e4] sm:$0xf] %vm644_vm4, %v1912_v28  ;;  %6288 = vmatpush3.bf16.msra.mxu1 %v6631_v24  ;;  %6351 = vmatprep.subr.bf16.mxu0 %v6636_v46  ;;  %v6620_v51 = vld [vmem:[#allocation3 + $0x154] ss:$52 sps:$4 sm:$0xff]   ;;  %v5648_v61 = vcombine.low %v2148_v6, %v2155_v3 }
 0x1d8   :  { %6289 = vmatprep.subr.bf16.mxu1 %v6638_v41 }
 0x1d9   :  { %3864 = vmatmul.mubr.bf16.gmra.mxu0 %v5596_v40  ;;  %v1914_v10 = vpop.permute.xlu0 %1913  ;;  %v2106_v19 = vld [vmem:[#allocation3 + $0x150] sm:$0xff] }
 0x1da   :  { %v1916_v26 = vpop.permute.xlu1 %1915  ;;  %6352 = vmatpush3.bf16.msra.mxu0 %v6637_v7  ;;  %1951 = vst.msk [vmem:[#allocation3 + $0x218] sm:$0xf] %vm644_vm4, %v1914_v10  ;;  %2021 = vst.msk [vmem:[#allocation3 + $0x1c4] sm:$0xf] %vm644_vm4, %v1914_v10  ;;  %v2113_v38 = vld [vmem:[#allocation3 + $0x184] sm:$0xff]  ;;  %3871 = vmatprep.mubr.bf16.mxu0 %v6620_v51 }
 0x1db   :  { %1952 = vst.msk [vmem:[#allocation3 + $0x24c] sm:$0xf] %vm644_vm4, %v1916_v26  ;;  %2022 = vst.msk [vmem:[#allocation3 + $0x1f8] sm:$0xf] %vm644_vm4, %v1916_v26  ;;  %6290 = vmatpush3.bf16.msra.mxu1 %v6639_v0  ;;  %6353 = vmatprep.subr.bf16.mxu0 %v6644_v2  ;;  %v5609_v8 = vcombine.low %v2106_v19, %v2113_v38  ;;  %v6658_v10 = vld [vmem:[#allocation3 + $0x24] ss:$52 sps:$4 sm:$0xff]  }
 0x1dc   :  { %6291 = vmatprep.subr.bf16.mxu1 %v6646_v12  ;;  %v6656_v38 = vld [vmem:[#allocation3 + $0x20] ss:$52 sps:$4 sm:$0xff]  }
 0x1dd   :  { %v1918_v20 = vpop.permute.xlu0 %1917  ;;  %3775 = vmatmul.mubr.bf16.gmra.mxu1 %v5607_v4  ;;  %v2119_v47 = vld [vmem:[#allocation3 + $0x1b0] sm:$0xff] }
 0x1de   :  { %v1920_v23 = vpop.permute.xlu1 %1919  ;;  %6354 = vmatpush3.bf16.msra.mxu0 %v6645_v29  ;;  %1953 = vst.msk [vmem:[#allocation3 + $0x280] sm:$0xf] %vm644_vm4, %v1918_v20  ;;  %2023 = vst.msk [vmem:[#allocation3 + $0x22c] sm:$0xf] %vm644_vm4, %v1918_v20  ;;  %3782 = vmatprep.mubr.bf16.mxu1 %v6624_v9  ;;  %v2126_v33 = vld [vmem:[#allocation3 + $0x1e4] sm:$0xff]  ;;  %v6675_v4 = vld [vmem:[%s9483_s5 + $0x310] sm:$0xff]  }
 0x1df   :  { %1954 = vst.msk [vmem:[#allocation3 + $0x2b4] sm:$0xf] %vm644_vm4, %v1920_v23  ;;  %2024 = vst.msk [vmem:[#allocation3 + $0x260] sm:$0xf] %vm644_vm4, %v1920_v23  ;;  %6292 = vmatpush3.bf16.msra.mxu1 %v6647_v54  ;;  %6355 = vmatprep.subr.bf16.mxu0 %v6652_v15  ;;  %v5620_v35 = vcombine.low %v2119_v47, %v2126_v33  ;;  %v6662_v54 = vld [vmem:[#allocation3 + $0x2c] ss:$52 sps:$4 sm:$0xff]  }
 0x1e0   :  { %6293 = vmatprep.subr.bf16.mxu1 %v6654_v25  ;;  %v6665_v25 = vld [vmem:[#allocation3 + $0x8c] ss:$52 sps:$4 sm:$0xff]   ;;  %v6660_v9 = vld [vmem:[#allocation3 + $0x28] ss:$52 sps:$4 sm:$0xff]  }
 0x1e1   :  { %3872 = vmatmul.mubr.bf16.gmra.mxu0 %v5609_v8  ;;  %v998_v22 = vpop.permute.xlu0 %997  ;;  %v2133_v39 = vld [vmem:[#allocation3 + $0x218] sm:$0xff]  ;;  %v6688_v8 = vld [vmem:[%s9483_s5 + $0x308] sm:$0xff]   ;;  %v6700_v47 = vld [vmem:[%s9483_s5 + $0x300] sm:$0xff]  }
 0x1e2   :  { %v1000_v49 = vpop.permute.xlu1 %999  ;;  %3879 = vmatprep.mubr.bf16.mxu0 %v6626_v59  ;;  %6356 = vmatpush3.bf16.msra.mxu0 %v6653_v58  ;;  %1019 = vst.msk [vmem:[#allocation3 + $0x2ec] sm:$0xf] %vm644_vm4, %v998_v22  ;;  %1089 = vst.msk [vmem:[#allocation3 + $0x298] sm:$0xf] %vm644_vm4, %v998_v22  ;;  %v2140_v13 = vld [vmem:[#allocation3 + $0x24c] sm:$0xff] }
 0x1e3   :  { %1020 = vst.msk [vmem:[#allocation3 + $0x320] sm:$0xf] %vm644_vm4, %v1000_v49  ;;  %1090 = vst.msk [vmem:[#allocation3 + $0x2cc] sm:$0xf] %vm644_vm4, %v1000_v49  ;;  %6294 = vmatpush3.bf16.msra.mxu1 %v6655_v53  ;;  %6357 = vmatprep.subr.bf16.mxu0 %v6659_v57  ;;  %v5633_v60 = vcombine.low %v2133_v39, %v2140_v13  ;;  %v6667_v58 = vld [vmem:[#allocation3 + $0x94] ss:$52 sps:$4 sm:$0xff]  }
 0x1e4   :  { %6465 = vmatprep.subr.bf16.mxu1 %v8432_v62  ;;  %v6669_v59 = vld [vmem:[#allocation3 + $0x88] ss:$52 sps:$4 sm:$0xff]   ;;  %v6689_v39 = vld [vmem:[#allocation3 + $0x1c0] ss:$52 sps:$4 sm:$0xff]  }
 0x1e5   :  { %v1922_v55 = vpop.permute.xlu0 %1921  ;;  %3783 = vmatmul.mubr.bf16.gmra.mxu1 %v5620_v35  ;;  %v2147_v52 = vld [vmem:[#allocation3 + $0x280] sm:$0xff]  ;;  %v6670_v33 = vld [vmem:[#allocation3 + $0xf4] ss:$52 sps:$4 sm:$0xff]  }
 0x1e6   :  { %v1924_v30 = vpop.permute.xlu1 %1923  ;;  %6358 = vmatpush3.bf16.msra.mxu0 %v6663_v27  ;;  %1955 = vst.msk [vmem:[#allocation3 + $0x2e8] sm:$0xf] %vm644_vm4, %v1922_v55  ;;  %2025 = vst.msk [vmem:[#allocation3 + $0x294] sm:$0xf] %vm644_vm4, %v1922_v55  ;;  %3790 = vmatprep.mubr.bf16.mxu1 %v6632_v48  ;;  %v6673_v27 = vld [vmem:[#allocation3 + $0xfc] ss:$52 sps:$4 sm:$0xff]  }
 0x1e7   :  { %1956 = vst.msk [vmem:[#allocation3 + $0x31c] sm:$0xf] %vm644_vm4, %v1924_v30  ;;  %2026 = vst.msk [vmem:[#allocation3 + $0x2c8] sm:$0xf] %vm644_vm4, %v1924_v30  ;;  %6441 = vmatprep.subr.bf16.mxu0 %v8432_v62  ;;  %v6681_v30 = vld [vmem:[#allocation3 + $0x1c4] ss:$52 sps:$4 sm:$0xff]  }
 0x1e8   :  { %v6690_v13 = vld [vmem:[#allocation3 + $0x22c] ss:$52 sps:$4 sm:$0xff]  }
 0x1e9   :  { %3880 = vmatmul.mubr.bf16.gmra.mxu0 %v5622_v18  ;;  %v710_v21 = vpop.permute.xlu0 %709 }
 0x1ea   :  { %v712_v42 = vpop.permute.xlu1 %711  ;;  %3887 = vmatprep.mubr.bf16.mxu0 %v6634_v32  ;;  %731 = vst.msk [vmem:[#allocation3 + $0x2f4] sm:$0xf] %vm644_vm4, %v710_v21  ;;  %v6648_v41 = vld [vmem:[#allocation3 + $0x2ec] ss:$52 sps:$4 sm:$0xff]   ;;  %v6042_v21 = vpop.f32.mrf.mxu1 }
 0x1eb   :  { %732 = vst.msk [vmem:[#allocation3 + $0x328] sm:$0xf] %vm644_vm4, %v712_v42  ;;  %v6686_v32 = vld [vmem:[#allocation3 + $0x1cc] ss:$52 sps:$4 sm:$0xff]   ;;  %v6692_v42 = vld [vmem:[#allocation3 + $0x1c8] ss:$52 sps:$4 sm:$0xff]  }
 0x1ec   :  { %1987 = vst.msk [vmem:[#allocation3 + $0x2f4] sm:$0xf] %vm297_vm3, %v7718_v11  ;;  %1988 = vst.msk [vmem:[#allocation3 + $0x328] sm:$0xf] %vm297_vm3, %v7788_v44  ;;  %v5635_v11 = vcombine.low %v2134_v31, %v2141_v14  ;;  %v2154_v44 = vld [vmem:[#allocation3 + $0x2b4] sm:$0xff] }
 0x1ed   :  { %v1646_v5 = vpop.permute.xlu0 %1645  ;;  %3791 = vmatmul.mubr.bf16.gmra.mxu1 %v5633_v60  ;;  %v5646_v46 = vcombine.low %v2147_v52, %v2154_v44  ;;  %v2161_v7 = vld [vmem:[#allocation3 + $0x2e8] sm:$0xff]  ;;  %v8487_v60 = vld [vmem:[%s9484_s6] ss:$0 sm:$0xff] }
 0x1ee   :  { %v1648_v56 = vpop.permute.xlu1 %1647  ;;  %1667 = vst.msk [vmem:[#allocation3 + $0x2f0] sm:$0xf] %vm644_vm4, %v1646_v5  ;;  %1737 = vst.msk [vmem:[#allocation3 + $0x29c] sm:$0xf] %vm644_vm4, %v1646_v5  ;;  %3798 = vmatprep.mubr.bf16.mxu1 %v6640_v16  ;;  %v2168_v40 = vld [vmem:[#allocation3 + $0x31c] sm:$0xff]  ;;  %v6043_v16 = vpop.f32.mrf.mxu1  ;;  %v2143_v5 = vld [vmem:[#allocation3 + $0x264] sm:$0xff] }
 0x1ef   :  { %1668 = vst.msk [vmem:[#allocation3 + $0x324] sm:$0xf] %vm644_vm4, %v1648_v56  ;;  %1738 = vst.msk [vmem:[#allocation3 + $0x2d0] sm:$0xf] %vm644_vm4, %v1648_v56  ;;  %v5659_v43 = vcombine.low %v2161_v7, %v2168_v40  ;;  %v6693_v14 = vld [vmem:[#allocation3 + $0x234] ss:$52 sps:$4 sm:$0xff]   ;;  %v6044_v52 = vadd.f32 %v6043_v16, %v6042_v21 }
 0x1f1   :  { %3888 = vmatmul.mubr.bf16.gmra.mxu0 %v5635_v11  ;;  %v1354_v36 = vpop.permute.xlu0 %1353  ;;  %v6695_v11 = vld [vmem:[#allocation3 + $0x228] ss:$52 sps:$4 sm:$0xff]  }
 0x1f2   :  { %v1356_v24 = vpop.permute.xlu1 %1355  ;;  %3895 = vmatprep.mubr.bf16.mxu0 %v6642_v1  ;;  %1371 = vst.msk [vmem:[#allocation3 + $0x158] sm:$0xf] %vm644_vm4, %v1354_v36  ;;  %v3559_v1 = vadd.f32 %v8156_v37, %v8487_v60  ;;  %v6696_v36 = vld [vmem:[#allocation3 + $0x294] ss:$52 sps:$4 sm:$0xff]  }
 0x1f3   :  { %1372 = vst.msk [vmem:[#allocation3 + $0x18c] sm:$0xf] %vm644_vm4, %v1356_v24  ;;  %v6650_v28 = vld [vmem:[#allocation3 + $0x2f4] ss:$52 sps:$4 sm:$0xff]  }
 0x1f4   :  { %v2136_v24 = vld [vmem:[#allocation3 + $0x230] sm:$0xff] }
 0x1f5   :  { %v2002_v17 = vpop.permute.xlu0 %2001  ;;  %3799 = vmatmul.mubr.bf16.gmra.mxu1 %v5646_v46  ;;  %v2162_v12 = vld [vmem:[#allocation3 + $0x2f0] sm:$0xff]  ;;  %v5639_v46 = vcombine.low %v2136_v24, %v2143_v5 }
 0x1f6   :  { %v2004_v63 = vpop.permute.xlu1 %2003  ;;  %2019 = vst.msk [vmem:[#allocation3 + $0x15c] sm:$0xf] %vm644_vm4, %v2002_v17  ;;  %3806 = vmatprep.mubr.bf16.mxu1 %v6648_v41  ;;  %v2169_v45 = vld [vmem:[#allocation3 + $0x324] sm:$0xff]  ;;  %v6698_v17 = vld [vmem:[#allocation3 + $0x29c] ss:$52 sps:$4 sm:$0xff]  }
 0x1f7   :  { %2020 = vst.msk [vmem:[#allocation3 + $0x190] sm:$0xf] %vm644_vm4, %v2004_v63  ;;  %v5661_v29 = vcombine.low %v2162_v12, %v2169_v45  ;;  %v3562_v63 = vadd.f32 %v6044_v52, %v8487_v60 }
 0x1f9   :  { %3896 = vmatmul.mubr.bf16.gmra.mxu0 %v5648_v61  ;;  %v1066_v0 = vpop.permute.xlu0 %1065  ;;  %v2149_v61 = vld [vmem:[#allocation3 + $0x290] sm:$0xff] }
 0x1fa   :  { %v1068_v2 = vpop.permute.xlu1 %1067  ;;  %3903 = vmatprep.mubr.bf16.mxu0 %v6650_v28  ;;  %1083 = vst.msk [vmem:[#allocation3 + $0x160] sm:$0xf] %vm644_vm4, %v1066_v0  ;;  %v6680_v55 = vld [vmem:[#allocation3 + $0x158] ss:$52 sps:$4 sm:$0xff]   ;;  %v2156_v28 = vld [vmem:[#allocation3 + $0x2c4] sm:$0xff] }
 0x1fb   :  { %1084 = vst.msk [vmem:[#allocation3 + $0x194] sm:$0xf] %vm644_vm4, %v1068_v2  ;;  %v2150_v0 = vld [vmem:[#allocation3 + $0x298] sm:$0xff]  ;;  %v2157_v2 = vld [vmem:[#allocation3 + $0x2cc] sm:$0xff]  ;;  %v5650_v45 = vcombine.low %v2149_v61, %v2156_v28 }
 0x1fd   :  { %v1714_v26 = vpop.permute.xlu0 %1713  ;;  %3807 = vmatmul.mubr.bf16.gmra.mxu1 %v5659_v43 }
 0x1fe   :  { %v1716_v51 = vpop.permute.xlu1 %1715  ;;  %1731 = vst.msk [vmem:[#allocation3 + $0x164] sm:$0xf] %vm644_vm4, %v1714_v26  ;;  %3944 = vmatprep.mubr.bf16.mxu1 %v6658_v10  ;;  %v6677_v35 = vld [vmem:[#allocation3 + $0x15c] ss:$52 sps:$4 sm:$0xff]  }
 0x1ff   :  { %1732 = vst.msk [vmem:[#allocation3 + $0x198] sm:$0xf] %vm644_vm4, %v1716_v51 }
 0x201   :  { %3904 = vmatmul.mubr.bf16.gmra.mxu0 %v5661_v29  ;;  %v1358_v15 = vpop.permute.xlu0 %1357  ;;  %v5652_v29 = vcombine.low %v2150_v0, %v2157_v2 }
 0x202   :  { %v1360_v19 = vpop.permute.xlu1 %1359  ;;  %4041 = vmatprep.mubr.bf16.mxu0 %v6662_v54  ;;  %1379 = vst.msk [vmem:[#allocation3 + $0x2f8] sm:$0xf] %vm644_vm4, %v1358_v15  ;;  %v6685_v18 = vld [vmem:[#allocation3 + $0x160] ss:$52 sps:$4 sm:$0xff]  }
 0x203   :  { %1380 = vst.msk [vmem:[#allocation3 + $0x32c] sm:$0xf] %vm644_vm4, %v1360_v19 }
 0x205   :  { %v2006_v20 = vpop.permute.xlu0 %2005  ;;  %3945 = vmatmul.mubr.bf16.vlgmr.msra.gmra.mxu1 %v6656_v38  ;;  %v6706_v38 = vld [vmem:[#allocation3 + $0x100] ss:$52 sps:$4 sm:$0xff]  }
 0x206   :  { %v2008_v23 = vpop.permute.xlu1 %2007  ;;  %2027 = vst.msk [vmem:[#allocation3 + $0x2fc] sm:$0xf] %vm644_vm4, %v2006_v20  ;;  %6469 = vmatpush3.bf16.msra.mxu1 %v8432_v62  ;;  %3952 = vmatprep.mubr.bf16.mxu1 %v6665_v25  ;;  %v6683_v48 = vld [vmem:[#allocation3 + $0x164] ss:$52 sps:$4 sm:$0xff]  }
 0x207   :  { %2028 = vst.msk [vmem:[#allocation3 + $0x330] sm:$0xf] %vm644_vm4, %v2008_v23  ;;  %6466 = vmatprep.subr.bf16.mxu1 %v6675_v4  ;;  %v6708_v25 = vld [vmem:[#allocation3 + $0x30] ss:$52 sps:$4 sm:$0xff]  }
 0x209   :  { %4042 = vmatmul.mubr.bf16.vlgmr.msra.gmra.mxu0 %v6660_v9  ;;  %v1070_v53 = vpop.permute.xlu0 %1069  ;;  %v6709_v9 = vld [vmem:[#allocation3 + $0x168] ss:$52 sps:$4 sm:$0xff]  }
 0x20a   :  { %4049 = vmatprep.mubr.bf16.mxu0 %v6667_v58  ;;  %6442 = vmatpush3.bf16.msra.mxu0 %v8432_v62  ;;  %1091 = vst.msk [vmem:[#allocation3 + $0x300] sm:$0xf] %vm644_vm4, %v1070_v53  ;;  %v1072_v57 = vpop.permute.xlu1 %1071  ;;  %v6672_v62 = vld [vmem:[#allocation3 + $0x90] ss:$52 sps:$4 sm:$0xff]   ;;  %v6703_v19 = vld [vmem:[#allocation3 + $0x2f8] ss:$52 sps:$4 sm:$0xff]  }
 0x20b   :  { %6470 = vmatpush3.bf16.msra.mxu1 %v6675_v4  ;;  %6443 = vmatprep.subr.bf16.mxu0 %v6675_v4  ;;  %1092 = vst.msk [vmem:[#allocation3 + $0x334] sm:$0xf] %vm644_vm4, %v1072_v57 }
 0x20c   :  { %6467 = vmatprep.subr.bf16.mxu1 %v6688_v8 }
 0x20d   :  { %3953 = vmatmul.mubr.bf16.gmra.mxu1 %v6669_v59  ;;  %v1718_v22 = vpop.permute.xlu0 %1717  ;;  %v6710_v59 = vld [vmem:[#allocation3 + $0x1d0] ss:$52 sps:$4 sm:$0xff]  }
 0x20e   :  { %6444 = vmatpush3.bf16.msra.mxu0 %v6675_v4  ;;  %3960 = vmatprep.mubr.bf16.mxu1 %v6670_v33  ;;  %1739 = vst.msk [vmem:[#allocation3 + $0x304] sm:$0xf] %vm644_vm4, %v1718_v22  ;;  %v1720_v49 = vpop.permute.xlu1 %1719  ;;  %v6701_v10 = vld [vmem:[#allocation3 + $0x2fc] ss:$52 sps:$4 sm:$0xff]  }
 0x20f   :  { %6471 = vmatpush3.bf16.msra.mxu1 %v6688_v8  ;;  %6445 = vmatprep.subr.bf16.mxu0 %v6688_v8  ;;  %1740 = vst.msk [vmem:[#allocation3 + $0x338] sm:$0xf] %vm644_vm4, %v1720_v49 }
 0x210   :  { %6468 = vmatprep.subr.bf16.mxu1 %v6700_v47 }
 0x211   :  { %4050 = vmatmul.mubr.bf16.gmra.mxu0 %v6672_v62  ;;  %v6711_v62 = vld [vmem:[#allocation3 + $0x98] ss:$52 sps:$4 sm:$0xff]  }
 0x212   :  { %4057 = vmatprep.mubr.bf16.mxu0 %v6673_v27  ;;  %6446 = vmatpush3.bf16.msra.mxu0 %v6688_v8  ;;  %v6707_v4 = vld [vmem:[#allocation3 + $0x300] ss:$52 sps:$4 sm:$0xff]  }
 0x213   :  { %6472 = vmatpush3.bf16.msra.mxu1 %v6700_v47  ;;  %6447 = vmatprep.subr.bf16.mxu0 %v6700_v47 }
 0x215   :  { %3961 = vmatmul.mubr.bf16.gmra.mxu1 %v6676_v34 }
 0x216   :  { %6448 = vmatpush3.bf16.msra.mxu0 %v6700_v47  ;;  %3968 = vmatprep.mubr.bf16.mxu1 %v6677_v35  ;;  %v6704_v51 = vld [vmem:[#allocation3 + $0x304] ss:$52 sps:$4 sm:$0xff]  }
 0x219   :  { %4058 = vmatmul.mubr.bf16.gmra.mxu0 %v6679_v50 }
 0x21a   :  { %4065 = vmatprep.mubr.bf16.mxu0 %v6683_v48 }
 0x21d   :  { %3969 = vmatmul.mubr.bf16.gmra.mxu1 %v6680_v55 }
 0x21e   :  { %3976 = vmatprep.mubr.bf16.mxu1 %v6681_v30 }
 0x221   :  { %4066 = vmatmul.mubr.bf16.gmra.mxu0 %v6685_v18  ;;  %v6712_v18 = vld [vmem:[#allocation3 + $0x238] ss:$52 sps:$4 sm:$0xff]  }
 0x222   :  { %4073 = vmatprep.mubr.bf16.mxu0 %v6686_v32 }
 0x225   :  { %3977 = vmatmul.mubr.bf16.gmra.mxu1 %v6689_v39  ;;  %v6713_v39 = vld [vmem:[#allocation3 + $0x2a0] ss:$52 sps:$4 sm:$0xff]  }
 0x226   :  { %3984 = vmatprep.mubr.bf16.mxu1 %v6690_v13 }
 0x227   :  { %v6103_v31 = vpop.f32.mrf.mxu0 }
 0x229   :  { %4074 = vmatmul.mubr.bf16.gmra.mxu0 %v6692_v42  ;;  %v6104_v56 = vpop.f32.mrf.mxu0 }
 0x22a   :  { %4081 = vmatprep.mubr.bf16.mxu0 %v6693_v14  ;;  %v6105_v44 = vadd.f32 %v6104_v56, %v6103_v31 }
 0x22b   :  { %v6106_v6 = vpop.f32.mrf.mxu0 }
 0x22c   :  { %v8491_v3 = vadd.f32 %v6105_v44, %v3559_v1 }
 0x22d   :  { %3985 = vmatmul.mubr.bf16.gmra.mxu1 %v6695_v11  ;;  %v6107_v41 = vpop.f32.mrf.mxu0  ;;  %v6714_v11 = vld [vmem:[#allocation3 + $0x308] ss:$52 sps:$4 sm:$0xff]  }
 0x22e   :  { %3992 = vmatprep.mubr.bf16.mxu1 %v6696_v36  ;;  %v6108_v7 = vadd.f32 %v6107_v41, %v6106_v6 }
 0x22f   :  { %v6109_v40 = vpop.f32.mrf.mxu0 }
 0x230   :  { %v8494_v37 = vadd.f32 %v6108_v7, %v3562_v63 }
 0x231   :  { %4082 = vmatmul.mubr.bf16.gmra.mxu0 %v5639_v46  ;;  %v6110_v12 = vpop.f32.mrf.mxu0 }
 0x232   :  { %4089 = vmatprep.mubr.bf16.mxu0 %v6698_v17  ;;  %v6111_v43 = vadd.f32 %v6110_v12, %v6109_v40 }
 0x233   :  { %v6112_v26 = vpop.f32.mrf.mxu0 }
 0x235   :  { %3993 = vmatmul.mubr.bf16.gmra.mxu1 %v5650_v45  ;;  %v6113_v54 = vpop.f32.mrf.mxu0 }
 0x236   :  { %4000 = vmatprep.mubr.bf16.mxu1 %v6701_v10  ;;  %v6114_v15 = vadd.f32 %v6113_v54, %v6112_v26 }
 0x239   :  { %4090 = vmatmul.mubr.bf16.gmra.mxu0 %v5652_v29 }
 0x23a   :  { %4097 = vmatprep.mubr.bf16.mxu0 %v6704_v51 }
 0x23d   :  { %4001 = vmatmul.mubr.bf16.gmra.mxu1 %v6703_v19 }
 0x23e   :  { %6453 = vmatprep.mubr.msk.bf16.mxu1 %vm295_vm2, %v6706_v38 }
 0x241   :  { %4098 = vmatmul.mubr.bf16.gmra.mxu0 %v6707_v4  ;;  %v6045_v20 = vpop.f32.mrf.mxu1  ;;  %v6115_v23 = vpop.f32.mrf.mxu0 }
 0x242   :  { %6449 = vmatprep.mubr.msk.bf16.mxu0 %vm295_vm2, %v6708_v25 }
 0x243   :  { %v6046_v58 = vpop.f32.mrf.mxu1  ;;  %v6116_v8 = vpop.f32.mrf.mxu0 }
 0x244   :  { %v6047_v53 = vadd.f32 %v6046_v58, %v6045_v20  ;;  %v6117_v57 = vadd.f32 %v6116_v8, %v6115_v23 }
 0x245   :  { %v6048_v47 = vpop.f32.mrf.mxu1  ;;  %v6118_v33 = vpop.f32.mrf.mxu0  ;;  %6454 = vmatmul.mubr.msk.bf16.vlgmr.msra.gmra.mxu1 %vm295_vm2, %v6709_v9 }
 0x246   :  { %v3567_v22 = vadd.f32 %v6047_v53, %v8487_v60  ;;  %6457 = vmatprep.mubr.msk.bf16.mxu1 %vm295_vm2, %v6710_v59 }
 0x247   :  { %v6049_v49 = vpop.f32.mrf.mxu1  ;;  %v6119_v27 = vpop.f32.mrf.mxu0 }
 0x248   :  { %v6050_v34 = vadd.f32 %v6049_v49, %v6048_v47  ;;  %v6120_v35 = vadd.f32 %v6119_v27, %v6118_v33  ;;  %v8502_v48 = vadd.f32 %v6111_v43, %v3567_v22 }
 0x249   :  { %6450 = vmatmul.mubr.msk.bf16.vlgmr.msra.gmra.mxu0 %vm295_vm2, %v6711_v62  ;;  %v6051_v50 = vpop.f32.mrf.mxu1 }
 0x24a   :  { %v3570_v55 = vadd.f32 %v6050_v34, %v8487_v60 }
 0x24b   :  { %v6052_v30 = vpop.f32.mrf.mxu1 }
 0x24c   :  { %v6053_v32 = vadd.f32 %v6052_v30, %v6051_v50  ;;  %v8505_v13 = vadd.f32 %v6114_v15, %v3570_v55 }
 0x24d   :  { %v6054_v21 = vpop.f32.mrf.mxu1  ;;  %6458 = vmatmul.mubr.msk.bf16.gmra.mxu1 %vm295_vm2, %v6712_v18 }
 0x24e   :  { %v3575_v42 = vadd.f32 %v6053_v32, %v8487_v60  ;;  %6461 = vmatprep.mubr.msk.bf16.mxu1 %vm295_vm2, %v6713_v39 }
 0x24f   :  { %v6055_v14 = vpop.f32.mrf.mxu1 }
 0x250   :  { %v6056_v16 = vadd.f32 %v6055_v14, %v6054_v21  ;;  %v8510_v31 = vadd.f32 %v6117_v57, %v3575_v42  ;;  %v6121_v56 = vpop.f32.mrf.mxu0 }
 0x251   :  { %v6057_v5 = vpop.f32.mrf.mxu1 }
 0x252   :  { %v3578_v1 = vadd.f32 %v6056_v16, %v8487_v60  ;;  %v6122_v44 = vpop.f32.mrf.mxu0 }
 0x253   :  { %v6058_v52 = vpop.f32.mrf.mxu1  ;;  %v6123_v24 = vadd.f32 %v6122_v44, %v6121_v56 }
 0x254   :  { %v6059_v36 = vadd.f32 %v6058_v52, %v6057_v5  ;;  %v8513_v6 = vadd.f32 %v6120_v35, %v3578_v1  ;;  %v6124_v41 = vpop.f32.mrf.mxu0 }
 0x255   :  { %v6060_v46 = vpop.f32.mrf.mxu1  ;;  %6462 = vmatmul.mubr.msk.bf16.gmra.mxu1 %vm295_vm2, %v6714_v11 }
 0x256   :  { %v3583_v17 = vadd.f32 %v6059_v36, %v8487_v60  ;;  %v6125_v61 = vpop.f32.mrf.mxu0 }
 0x257   :  { %v6061_v63 = vpop.f32.mrf.mxu1  ;;  %v6126_v40 = vadd.f32 %v6125_v61, %v6124_v41 }
 0x258   :  { %v8517_v28 = vadd.f32 %v6123_v24, %v3583_v17  ;;  %v6062_v7 = vadd.f32 %v6061_v63, %v6060_v46  ;;  %v6127_v2 = vpop.f32.mrf.mxu0 }
 0x259   :  { %v6063_v0 = vpop.f32.mrf.mxu1 }
 0x25a   :  { %v3586_v12 = vadd.f32 %v6062_v7, %v8487_v60  ;;  %v6128_v43 = vpop.f32.mrf.mxu0 }
 0x25b   :  { %v6064_v45 = vpop.f32.mrf.mxu1  ;;  %v6129_v51 = vadd.f32 %v6128_v43, %v6127_v2 }
 0x25c   :  { %v8520_v10 = vadd.f32 %v6126_v40, %v3586_v12  ;;  %v6065_v26 = vadd.f32 %v6064_v45, %v6063_v0  ;;  %v6130_v54 = vpop.f32.mrf.mxu0 }
 0x25d   :  { %v6066_v29 = vpop.f32.mrf.mxu1 }
 0x25e   :  { %v3591_v15 = vadd.f32 %v6065_v26, %v8487_v60  ;;  %v6131_v38 = vpop.f32.mrf.mxu0 }
 0x25f   :  { %v6067_v19 = vpop.f32.mrf.mxu1  ;;  %v6132_v20 = vadd.f32 %v6131_v38, %v6130_v54 }
 0x260   :  { %v8523_v4 = vadd.f32 %v6129_v51, %v3591_v15  ;;  %v6068_v25 = vadd.f32 %v6067_v19, %v6066_v29 }
 0x262   :  { %v3594_v23 = vadd.f32 %v6068_v25, %v8487_v60 }
 0x264   :  { %v8526_v9 = vadd.f32 %v6132_v20, %v3594_v23 }
 0x269   :  { %v6133_v58 = vpop.f32.mrf.mxu0 }
 0x26b   :  { %v6134_v8 = vpop.f32.mrf.mxu0 }
 0x26c   :  { %v6135_v53 = vadd.f32 %v6134_v8, %v6133_v58  ;;  %v6069_v57 = vpop.f32.mrf.mxu1 }
 0x26d   :  { %v6136_v59 = vpop.f32.mrf.mxu0 }
 0x26e   :  { %v6070_v47 = vpop.f32.mrf.mxu1 }
 0x26f   :  { %v6137_v33 = vpop.f32.mrf.mxu0  ;;  %v6071_v22 = vadd.f32 %v6070_v47, %v6069_v57 }
 0x270   :  { %v6138_v62 = vadd.f32 %v6137_v33, %v6136_v59  ;;  %v6072_v49 = vpop.f32.mrf.mxu1 }
 0x271   :  { %v3599_v27 = vadd.f32 %v6071_v22, %v8487_v60 }
 0x272   :  { %v6073_v34 = vpop.f32.mrf.mxu1 }
 0x273   :  { %v6074_v35 = vadd.f32 %v6073_v34, %v6072_v49  ;;  %v8529_v50 = vadd.f32 %v6135_v53, %v3599_v27 }
 0x274   :  { %v6075_v55 = vpop.f32.mrf.mxu1 }
 0x275   :  { %v6139_v30 = vpop.f32.mrf.mxu0  ;;  %v3602_v18 = vadd.f32 %v6074_v35, %v8487_v60 }
 0x276   :  { %v6076_v32 = vpop.f32.mrf.mxu1 }
 0x277   :  { %v6140_v39 = vpop.f32.mrf.mxu0  ;;  %v6077_v21 = vadd.f32 %v6076_v32, %v6075_v55  ;;  %v8532_v14 = vadd.f32 %v6138_v62, %v3602_v18 }
 0x278   :  { %v6141_v42 = vadd.f32 %v6140_v39, %v6139_v30  ;;  %v6078_v16 = vpop.f32.mrf.mxu1 }
 0x279   :  { %v6142_v5 = vpop.f32.mrf.mxu0  ;;  %v3607_v56 = vadd.f32 %v6077_v21, %v8487_v60 }
 0x27a   :  { %v6079_v11 = vpop.f32.mrf.mxu1 }
 0x27b   :  { %v6143_v1 = vpop.f32.mrf.mxu0  ;;  %v8535_v52 = vadd.f32 %v6141_v42, %v3607_v56  ;;  %v6080_v44 = vadd.f32 %v6079_v11, %v6078_v16 }
 0x27c   :  { %v6144_v36 = vadd.f32 %v6143_v1, %v6142_v5 }
 0x27d   :  { %v6081_v24 = vpop.f32.mrf.mxu1  ;;  %v3610_v46 = vadd.f32 %v6080_v44, %v8487_v60 }
 0x27f   :  { %v6082_v41 = vpop.f32.mrf.mxu1  ;;  %v8538_v17 = vadd.f32 %v6144_v36, %v3610_v46 }
 0x280   :  { %v6083_v63 = vadd.f32 %v6082_v41, %v6081_v24 }
 0x281   :  { %v6084_v61 = vpop.f32.mrf.mxu1  ;;  %v6145_v7 = vpop.f32.mrf.mxu0 }
 0x282   :  { %v3615_v2 = vadd.f32 %v6083_v63, %v8487_v60 }
 0x283   :  { %v6085_v40 = vpop.f32.mrf.mxu1  ;;  %v6146_v0 = vpop.f32.mrf.mxu0 }
 0x284   :  { %v6086_v12 = vadd.f32 %v6085_v40, %v6084_v61  ;;  %v6147_v45 = vadd.f32 %v6146_v0, %v6145_v7 }
 0x285   :  { %v6148_v43 = vpop.f32.mrf.mxu0  ;;  %v6167_v51 = vpop.f32.mrf.mxu1 }
 0x286   :  { %v8541_v26 = vadd.f32 %v6147_v45, %v3615_v2  ;;  %v3618_v54 = vadd.f32 %v6086_v12, %v8487_v60 }
 0x287   :  { %v6149_v29 = vpop.f32.mrf.mxu0  ;;  %v6168_v19 = vpop.f32.mrf.mxu1 }
 0x288   :  { %v6150_v15 = vadd.f32 %v6149_v29, %v6148_v43  ;;  %v6169_v38 = vadd.f32 %v6168_v19, %v6167_v51 }
 0x289   :  { %v6231_v25 = vpop.f32.mrf.mxu0  ;;  %v6170_v23 = vpop.f32.mrf.mxu1 }
 0x28a   :  { %v8544_v20 = vadd.f32 %v6150_v15, %v3618_v54  ;;  %v3753_v58 = vadd.f32 %v6169_v38, %v8491_v3 }
 0x28b   :  { %v6232_v8 = vpop.f32.mrf.mxu0  ;;  %v6171_v53 = vpop.f32.mrf.mxu1 }
 0x28c   :  { %v6233_v57 = vadd.f32 %v6232_v8, %v6231_v25  ;;  %v6172_v59 = vadd.f32 %v6171_v53, %v6170_v23 }
 0x28d   :  { %v6234_v47 = vpop.f32.mrf.mxu0  ;;  %v6173_v22 = vpop.f32.mrf.mxu1 }
 0x28e   :  { %v8547_v33 = vadd.f32 %v6233_v57, %v3753_v58  ;;  %v3756_v62 = vadd.f32 %v6172_v59, %v8494_v37 }
 0x28f   :  { %v6235_v60 = vpop.f32.mrf.mxu0  ;;  %v6174_v49 = vpop.f32.mrf.mxu1 }
 0x290   :  { %v6236_v27 = vadd.f32 %v6235_v60, %v6234_v47  ;;  %v6175_v34 = vadd.f32 %v6174_v49, %v6173_v22 }
 0x291   :  { %v6237_v35 = vpop.f32.mrf.mxu0  ;;  %v6176_v30 = vpop.f32.mrf.mxu1 }
 0x292   :  { %v8550_v55 = vadd.f32 %v6236_v27, %v3756_v62  ;;  %v3761_v3 = vadd.f32 %v6175_v34, %v8502_v48 }
 0x293   :  { %v6238_v18 = vpop.f32.mrf.mxu0  ;;  %v6177_v32 = vpop.f32.mrf.mxu1 }
 0x294   :  { %v6239_v39 = vadd.f32 %v6238_v18, %v6237_v35  ;;  %v6178_v21 = vadd.f32 %v6177_v32, %v6176_v30 }
 0x295   :  { %v6240_v42 = vpop.f32.mrf.mxu0  ;;  %v6179_v5 = vpop.f32.mrf.mxu1 }
 0x296   :  { %v8553_v16 = vadd.f32 %v6239_v39, %v3761_v3  ;;  %v3764_v37 = vadd.f32 %v6178_v21, %v8505_v13 }
 0x297   :  { %v6241_v56 = vpop.f32.mrf.mxu0  ;;  %v6180_v11 = vpop.f32.mrf.mxu1 }
 0x298   :  { %v6242_v1 = vadd.f32 %v6241_v56, %v6240_v42  ;;  %v6181_v44 = vadd.f32 %v6180_v11, %v6179_v5 }
 0x299   :  { %v6243_v36 = vpop.f32.mrf.mxu0  ;;  %v6182_v46 = vpop.f32.mrf.mxu1 }
 0x29a   :  { %v8556_v24 = vadd.f32 %v6242_v1, %v3764_v37  ;;  %v3769_v48 = vadd.f32 %v6181_v44, %v8510_v31 }
 0x29b   :  { %v6244_v41 = vpop.f32.mrf.mxu0  ;;  %v6183_v63 = vpop.f32.mrf.mxu1 }
 0x29c   :  { %v6245_v61 = vadd.f32 %v6244_v41, %v6243_v36  ;;  %v6184_v7 = vadd.f32 %v6183_v63, %v6182_v46 }
 0x29d   :  { %v6246_v40 = vpop.f32.mrf.mxu0  ;;  %v6185_v2 = vpop.f32.mrf.mxu1 }
 0x29e   :  { %v8559_v0 = vadd.f32 %v6245_v61, %v3769_v48  ;;  %v3772_v13 = vadd.f32 %v6184_v7, %v8513_v6 }
 0x29f   :  { %v6247_v12 = vpop.f32.mrf.mxu0  ;;  %v6186_v45 = vpop.f32.mrf.mxu1 }
 0x2a0   :  { %v6248_v43 = vadd.f32 %v6247_v12, %v6246_v40  ;;  %v6187_v51 = vadd.f32 %v6186_v45, %v6185_v2 }
 0x2a1   :  { %v6249_v29 = vpop.f32.mrf.mxu0  ;;  %v6188_v15 = vpop.f32.mrf.mxu1 }
 0x2a2   :  { %v8562_v54 = vadd.f32 %v6248_v43, %v3772_v13  ;;  %v3777_v31 = vadd.f32 %v6187_v51, %v8517_v28 }
 0x2a3   :  { %v6250_v19 = vpop.f32.mrf.mxu0  ;;  %v6189_v38 = vpop.f32.mrf.mxu1 }
 0x2a4   :  { %v6251_v25 = vadd.f32 %v6250_v19, %v6249_v29  ;;  %v6190_v23 = vadd.f32 %v6189_v38, %v6188_v15 }
 0x2a5   :  { %v6252_v58 = vpop.f32.mrf.mxu0  ;;  %v6191_v53 = vpop.f32.mrf.mxu1 }
 0x2a6   :  { %v8565_v8 = vadd.f32 %v6251_v25, %v3777_v31  ;;  %v3780_v6 = vadd.f32 %v6190_v23, %v8520_v10 }
 0x2a7   :  { %v6253_v57 = vpop.f32.mrf.mxu0  ;;  %v6192_v59 = vpop.f32.mrf.mxu1 }
 0x2a8   :  { %v6254_v47 = vadd.f32 %v6253_v57, %v6252_v58  ;;  %v6193_v22 = vadd.f32 %v6192_v59, %v6191_v53 }
 0x2a9   :  { %v6255_v62 = vpop.f32.mrf.mxu0  ;;  %v6194_v49 = vpop.f32.mrf.mxu1 }
 0x2aa   :  { %v8568_v60 = vadd.f32 %v6254_v47, %v3780_v6  ;;  %v3785_v28 = vadd.f32 %v6193_v22, %v8523_v4 }
 0x2ab   :  { %v6256_v27 = vpop.f32.mrf.mxu0  ;;  %v6195_v34 = vpop.f32.mrf.mxu1 }
 0x2ac   :  { %v6257_v35 = vadd.f32 %v6256_v27, %v6255_v62  ;;  %v6196_v30 = vadd.f32 %v6195_v34, %v6194_v49 }
 0x2ad   :  { %v6258_v3 = vpop.f32.mrf.mxu0  ;;  %v6197_v32 = vpop.f32.mrf.mxu1 }
 0x2ae   :  { %v8571_v18 = vadd.f32 %v6257_v35, %v3785_v28  ;;  %v3788_v10 = vadd.f32 %v6196_v30, %v8526_v9 }
 0x2af   :  { %v6259_v39 = vpop.f32.mrf.mxu0  ;;  %v6198_v21 = vpop.f32.mrf.mxu1 }
 0x2b0   :  { %v6260_v42 = vadd.f32 %v6259_v39, %v6258_v3  ;;  %v6199_v5 = vadd.f32 %v6198_v21, %v6197_v32 }
 0x2b1   :  { %v6261_v37 = vpop.f32.mrf.mxu0  ;;  %v6200_v11 = vpop.f32.mrf.mxu1 }
 0x2b2   :  { %v8574_v56 = vadd.f32 %v6260_v42, %v3788_v10  ;;  %v3793_v4 = vadd.f32 %v6199_v5, %v8529_v50 }
 0x2b3   :  { %v6262_v1 = vpop.f32.mrf.mxu0  ;;  %v6201_v44 = vpop.f32.mrf.mxu1 }
 0x2b4   :  { %v6263_v36 = vadd.f32 %v6262_v1, %v6261_v37  ;;  %v6202_v46 = vadd.f32 %v6201_v44, %v6200_v11 }
 0x2b5   :  { %v6264_v48 = vpop.f32.mrf.mxu0  ;;  %v6203_v63 = vpop.f32.mrf.mxu1 }
 0x2b6   :  { %v8577_v41 = vadd.f32 %v6263_v36, %v3793_v4  ;;  %v3796_v9 = vadd.f32 %v6202_v46, %v8532_v14 }
 0x2b7   :  { %v6265_v61 = vpop.f32.mrf.mxu0  ;;  %v6204_v7 = vpop.f32.mrf.mxu1 }
 0x2b8   :  { %v6266_v40 = vadd.f32 %v6265_v61, %v6264_v48  ;;  %v6205_v2 = vadd.f32 %v6204_v7, %v6203_v63 }
 0x2b9   :  { %v6267_v13 = vpop.f32.mrf.mxu0  ;;  %v6206_v45 = vpop.f32.mrf.mxu1 }
 0x2ba   :  { %v8580_v12 = vadd.f32 %v6266_v40, %v3796_v9  ;;  %v3801_v50 = vadd.f32 %v6205_v2, %v8535_v52 }
 0x2bb   :  { %v6268_v43 = vpop.f32.mrf.mxu0  ;;  %v6207_v51 = vpop.f32.mrf.mxu1 }
 0x2bc   :  { %v6269_v29 = vadd.f32 %v6268_v43, %v6267_v13  ;;  %v6208_v15 = vadd.f32 %v6207_v51, %v6206_v45 }
 0x2bd   :  { %v6270_v31 = vpop.f32.mrf.mxu0  ;;  %v6209_v38 = vpop.f32.mrf.mxu1 }
 0x2be   :  { %v8583_v19 = vadd.f32 %v6269_v29, %v3801_v50  ;;  %v3804_v14 = vadd.f32 %v6208_v15, %v8538_v17 }
 0x2bf   :  { %v6271_v25 = vpop.f32.mrf.mxu0  ;;  %v6210_v23 = vpop.f32.mrf.mxu1 }
 0x2c0   :  { %9503 = vst [vmem:[#allocation13_spill] sm:$0xff] %v8583_v19  ;;  %v6272_v58 = vadd.f32 %v6271_v25, %v6270_v31  ;;  %v6211_v53 = vadd.f32 %v6210_v23, %v6209_v38 }
 0x2c1   :  { %v6273_v6 = vpop.f32.mrf.mxu0  ;;  %v6212_v59 = vpop.f32.mrf.mxu1 }
 0x2c2   :  { %v8586_v57 = vadd.f32 %v6272_v58, %v3804_v14  ;;  %v3809_v52 = vadd.f32 %v6211_v53, %v8541_v26 }
 0x2c3   :  { %v6274_v47 = vpop.f32.mrf.mxu0  ;;  %v6213_v22 = vpop.f32.mrf.mxu1 }
 0x2c4   :  { %9504 = vst [vmem:[#allocation14_spill] sm:$0xff] %v8586_v57  ;;  %v6275_v62 = vadd.f32 %v6274_v47, %v6273_v6  ;;  %v6214_v49 = vadd.f32 %v6213_v22, %v6212_v59 }
 0x2c5   :  { %v6276_v28 = vpop.f32.mrf.mxu0  ;;  %v6295_v34 = vpop.f32.mrf.mxu1 }
 0x2c6   :  { %v8589_v27 = vadd.f32 %v6275_v62, %v3809_v52  ;;  %v3812_v17 = vadd.f32 %v6214_v49, %v8544_v20 }
 0x2c7   :  { %v6277_v35 = vpop.f32.mrf.mxu0  ;;  %v6296_v3 = vpop.f32.mrf.mxu1 }
 0x2c8   :  { %9505 = vst [vmem:[#allocation11_spill] sm:$0xff] %v8589_v27  ;;  %v6278_v30 = vadd.f32 %v6277_v35, %v6276_v28  ;;  %v6297_v32 = vadd.f32 %v6296_v3, %v6295_v34 }
 0x2c9   :  { %v6359_v10 = vpop.f32.mrf.mxu0  ;;  %v6298_v21 = vpop.f32.mrf.mxu1 }
 0x2ca   :  { %v8592_v39 = vadd.f32 %v6278_v30, %v3812_v17  ;;  %v3947_v26 = vadd.f32 %v6297_v32, %v8547_v33 }
 0x2cb   :  { %v6360_v42 = vpop.f32.mrf.mxu0  ;;  %v6299_v5 = vpop.f32.mrf.mxu1 }
 0x2cc   :  { %9506 = vst [vmem:[#allocation12_spill] sm:$0xff] %v8592_v39  ;;  %v6361_v37 = vadd.f32 %v6360_v42, %v6359_v10  ;;  %v6300_v11 = vadd.f32 %v6299_v5, %v6298_v21 }
 0x2cd   :  { %v6362_v4 = vpop.f32.mrf.mxu0  ;;  %v6301_v1 = vpop.f32.mrf.mxu1 }
 0x2ce   :  { %v8595_v44 = vadd.f32 %v6361_v37, %v3947_v26  ;;  %v3950_v20 = vadd.f32 %v6300_v11, %v8550_v55 }
 0x2cf   :  { %v6363_v36 = vpop.f32.mrf.mxu0  ;;  %v6302_v46 = vpop.f32.mrf.mxu1 }
 0x2d0   :  { %v6364_v48 = vadd.f32 %v6363_v36, %v6362_v4 }
 0x2d1   :  { %v6365_v63 = vpop.f32.mrf.mxu0  ;;  %v6304_v9 = vpop.f32.mrf.mxu1 }
 0x2d2   :  { %v8598_v61 = vadd.f32 %v6364_v48, %v3950_v20 }
 0x2d3   :  { %v6366_v7 = vpop.f32.mrf.mxu0  ;;  %v6305_v40 = vpop.f32.mrf.mxu1 }
 0x2d4   :  { %v6306_v33 = vadd.f32 %v6305_v40, %v6304_v9 }
 0x2d5   :  { %v8600_v2 = vpop.f32.mrf.mxu0  ;;  %v6307_v13 = vpop.f32.mrf.mxu1 }
 0x2d6   :  { %v8603_v45 = vadd.f32 %v6306_v33, %v8556_v24 }
 0x2d7   :  { %v8605_v50 = vpop.f32.mrf.mxu0  ;;  %v6308_v43 = vpop.f32.mrf.mxu1 }
 0x2d8   :  { %v6309_v57 = vadd.f32 %v6308_v43, %v6307_v13 }
 0x2d9   :  { %v6371_v55 = vpop.f32.mrf.mxu0  ;;  %v6310_v51 = vpop.f32.mrf.mxu1 }
 0x2db   :  { %v6372_v29 = vpop.f32.mrf.mxu0  ;;  %v6311_v15 = vpop.f32.mrf.mxu1 }
 0x2dd   :  { %v6374_v31 = vpop.f32.mrf.mxu0  ;;  %v8607_v38 = vpop.f32.mrf.mxu1 }
 0x2df   :  { %v6375_v14 = vpop.f32.mrf.mxu0  ;;  %v8609_v25 = vpop.f32.mrf.mxu1 }
 0x2e1   :  { %v8611_v23 = vpop.f32.mrf.mxu0  ;;  %v8613_v58 = vpop.f32.mrf.mxu1 }
 0x2e3   :  { %v8615_v53 = vpop.f32.mrf.mxu0  ;;  %v8617_v24 = vpop.f32.mrf.mxu1 }
 0x2e5   :  { %v8619_v6 = vpop.f32.mrf.mxu0  ;;  %v8621_v59 = vpop.f32.mrf.mxu1 }
 0x2e7   :  { %v8623_v52 = vpop.f32.mrf.mxu0  ;;  %v6320_v47 = vpop.f32.mrf.mxu1 }
 0x2e9   :  { %v8625_v22 = vpop.f32.mrf.mxu0  ;;  %v8627_v62 = vpop.f32.mrf.mxu1 }
 0x2eb   :  { %v8629_v49 = vpop.f32.mrf.mxu0  ;;  %v8631_v28 = vpop.f32.mrf.mxu1 }
 0x2ed   :  { %v8633_v34 = vpop.f32.mrf.mxu0  ;;  %v6325_v17 = vpop.f32.mrf.mxu1 }
 0x2ef   :  { %v8635_v35 = vpop.f32.mrf.mxu0  ;;  %v6326_v30 = vpop.f32.mrf.mxu1 }
 0x2f1   :  { %v6389_v3 = vpop.f32.mrf.mxu0  ;;  %v8637_v32 = vpop.f32.mrf.mxu1 }
 0x2f3   :  { %v6390_v10 = vpop.f32.mrf.mxu0  ;;  %v6329_v21 = vpop.f32.mrf.mxu1 }
 0x2f5   :  { %v8639_v26 = vpop.f32.mrf.mxu0  ;;  %v8641_v42 = vpop.f32.mrf.mxu1 }
 0x2f6   :  { %9507 = vst [vmem:[#allocation15_spill] sm:$0xff] %v8641_v42 }
 0x2f7   :  { %v8643_v5 = vpop.f32.mrf.mxu0  ;;  %v8645_v37 = vpop.f32.mrf.mxu1 }
 0x2f8   :  { %9508 = vst [vmem:[#allocation16_spill] sm:$0xff] %v8645_v37  ;;  %v6367_v37 = vadd.f32 %v6366_v7, %v6365_v63  ;;  %v6327_v63 = vadd.f32 %v6326_v30, %v6325_v17  ;;  %v6385_v30 = vadd.f32 %v8629_v49, %v8625_v22  ;;  %v6379_v22 = vadd.f32 %v8615_v53, %v8611_v23 }
 0x2f9   :  { %v8647_v11 = vpop.f32.mrf.mxu0  ;;  %v8649_v4 = vpop.f32.mrf.mxu1 }
 0x2fa   :  { %9509 = vst [vmem:[#allocation17_spill] sm:$0xff] %v8647_v11  ;;  %9510 = vst [vmem:[#allocation18_spill] sm:$0xff] %v8649_v4  ;;  %v6373_v11 = vadd.f32 %v6372_v29, %v6371_v55  ;;  %v6303_v4 = vadd.f32 %v6302_v46, %v6301_v1  ;;  %v6376_v46 = vadd.f32 %v6375_v14, %v6374_v31 }
 0x2fb   :  { %v8651_v20 = vpop.f32.mrf.mxu0  ;;  %v8653_v36 = vpop.f32.mrf.mxu1  ;;  %v6370_v31 = vadd.f32 %v8605_v50, %v8600_v2  ;;  %v6315_v2 = vadd.f32 %v8609_v25, %v8607_v38  ;;  %v6394_v38 = vadd.f32 %v8643_v5, %v8639_v26 }
 0x2fc   :  { %9511 = vst [vmem:[#allocation19_spill] sm:$0xff] %v8651_v20  ;;  %9512 = vst [vmem:[#allocation20_spill] sm:$0xff] %v8653_v36  ;;  %v3963_v36 = vadd.f32 %v6309_v57, %v8559_v0  ;;  %v3955_v13 = vadd.f32 %v6303_v4, %v8553_v16 }
 0x2fd   :  { %v8655_v48 = vpop.f32.mrf.mxu0  ;;  %v8657_v9 = vpop.f32.mrf.mxu1  ;;  %v4055_v17 = vadd.f32 %v6370_v31, %v8603_v45  ;;  %v9525_v31 = vld [vmem:[#allocation13_spill] sm:$0xff] }
 0x2fe   :  { %9513 = vst [vmem:[#allocation21_spill] sm:$0xff] %v8655_v48  ;;  %v4052_v29 = vadd.f32 %v6367_v37, %v3955_v13 }
 0x2ff   :  { %v8659_v40 = vpop.f32.mrf.mxu0  ;;  %v8661_v33 = vpop.f32.mrf.mxu1 }
 0x300   :  { %9514 = vst [vmem:[#allocation22_spill] sm:$0xff] %v8659_v40  ;;  %9515 = vst [vmem:[#allocation23_spill] sm:$0xff] %v8661_v33  ;;  %v4060_v33 = vadd.f32 %v6373_v11, %v3963_v36  ;;  %v6391_v36 = vadd.f32 %v6390_v10, %v6389_v3  ;;  %v3971_v3 = vadd.f32 %v6315_v2, %v8565_v8 }
 0x301   :  { %v8663_v39 = vpop.f32.mrf.mxu0  ;;  %v8665_v19 = vpop.f32.mrf.mxu1  ;;  %v6382_v10 = vadd.f32 %v8623_v52, %v8619_v6 }
 0x302   :  { %9516 = vst [vmem:[#allocation24_spill] sm:$0xff] %v8663_v39  ;;  %9517 = vst [vmem:[#allocation25_spill] sm:$0xff] %v8665_v19  ;;  %v6312_v39 = vadd.f32 %v6311_v15, %v6310_v51  ;;  %v3987_v51 = vadd.f32 %v6327_v63, %v8577_v41 }
 0x303   :  { %v8667_v27 = vpop.f32.mrf.mxu0  ;;  %v8669_v20 = vpop.f32.mrf.mxu1 }
 0x304   :  { %v3966_v57 = vadd.f32 %v6312_v39, %v8562_v54  ;;  %v4084_v4 = vadd.f32 %v6391_v36, %v3987_v51  ;;  %v6321_v54 = vadd.f32 %v6320_v47, %v8621_v59  ;;  %v6330_v47 = vadd.f32 %v6329_v21, %v8637_v32  ;;  %v9524_v36 = vld [vmem:[#allocation19_spill] sm:$0xff] }
 0x305   :  { %v8672_v48 = vpop.f32.mrf.mxu0  ;;  %v6455_v42 = vpop.f32.mrf.mxu1  ;;  %v4068_v21 = vadd.f32 %v6379_v22, %v3971_v3  ;;  %v9529_v22 = vld [vmem:[#allocation12_spill] sm:$0xff]  ;;  %v9530_v3 = vld [vmem:[#allocation21_spill] sm:$0xff] }
 0x306   :  { %v4063_v16 = vadd.f32 %v6376_v46, %v3966_v57  ;;  %v3979_v59 = vadd.f32 %v6321_v54, %v8571_v18  ;;  %v6318_v18 = vadd.f32 %v8617_v24, %v8613_v58  ;;  %v3990_v23 = vadd.f32 %v6330_v47, %v8580_v12  ;;  %v9522_v46 = vld [vmem:[#allocation11_spill] sm:$0xff] }
 0x307   :  { %v8674_v40 = vpop.f32.mrf.mxu0  ;;  %v4156_v43 = vpop.f32.mrf.mxu1  ;;  %v6388_v58 = vadd.f32 %v8635_v35, %v8633_v34 }
 0x308   :  { %v8677_v19 = vadd.f32 %v4156_v43, %v4060_v33  ;;  %v4076_v25 = vadd.f32 %v6385_v30, %v3979_v59  ;;  %v4087_v24 = vadd.f32 %v6394_v38, %v3990_v23  ;;  %v3974_v26 = vadd.f32 %v6318_v18, %v8568_v60  ;;  %v9528_v59 = vld [vmem:[#allocation20_spill] sm:$0xff]  ;;  %v9531_v18 = vld [vmem:[#allocation22_spill] sm:$0xff] }
 0x309   :  { %v6451_v55 = vpop.f32.mrf.mxu0  ;;  %v8679_v1 = vpop.f32.mrf.mxu1  ;;  %v6406_v30 = vadd.f32 %v8674_v40, %v8672_v48 }
 0x30a   :  { %6715 = vtanh.f32 %v8677_v19  ;;  %v8682_v0 = vadd.f32 %v6451_v55, %v4052_v29  ;;  %v4071_v13 = vadd.f32 %v6382_v10, %v3974_v26  ;;  %v9519_v55 = vld [vmem:[#allocation24_spill] sm:$0xff] }
 0x30b   :  { %v4140_v7 = vpop.f32.mrf.mxu0  ;;  %v4159_v11 = vpop.f32.mrf.mxu1  ;;  %v6403_v34 = vadd.f32 %v8667_v27, %v9519_v55 }
 0x30c   :  { %6717 = vtanh.f32 %v8682_v0  ;;  %v8687_v15 = vadd.f32 %v4159_v11, %v4063_v16  ;;  %v8692_v33 = vadd.f32 %v4140_v7, %v8595_v44  ;;  %v8746_v60 = vadd.f32 %v8679_v1, %v4071_v13  ;;  %v9523_v11 = vld [vmem:[#allocation17_spill] sm:$0xff] }
 0x30d   :  { %v6452_v14 = vpop.f32.mrf.mxu0  ;;  %v6459_v37 = vpop.f32.mrf.mxu1  ;;  %v6397_v16 = vadd.f32 %v9524_v36, %v9523_v11  ;;  %v83_v11 = vld [vmem:[%s9480_s2 + $0x68] sm:$0xff]  ;;  %v84_v36 = vld [vmem:[%s9480_s2 + $0x70] sm:$0xff] }
 0x30e   :  { %6719 = vtanh.f32 %v8687_v15  ;;  %v8696_v39 = vadd.f32 %v6459_v37, %v4084_v4  ;;  %v8704_v50 = vadd.f32 %v6452_v14, %v4055_v17  ;;  %v9526_v37 = vld [vmem:[#allocation25_spill] sm:$0xff] }
 0x30f   :  { %v4143_v41 = vpop.f32.mrf.mxu0  ;;  %6721 = vtanh.f32 %v8692_v33  ;;  %v4172_v49 = vpop.f32.mrf.mxu1  ;;  %v6342_v4 = vadd.f32 %v8669_v20, %v9526_v37 }
 0x310   :  { %6723 = vtanh.f32 %v8696_v39  ;;  %v8710_v45 = vadd.f32 %v4143_v41, %v8598_v61  ;;  %v6324_v61 = vadd.f32 %v8631_v28, %v8627_v62  ;;  %v8725_v53 = vadd.f32 %v4172_v49, %v4076_v25  ;;  %v9518_v28 = vld [vmem:[#allocation23_spill] sm:$0xff] }
 0x311   :  { %6725 = vtanh.f32 %v8704_v50  ;;  %v6460_v8 = vpop.f32.mrf.mxu1  ;;  %v8733_v62 = vadd.f32 %v6455_v42, %v4068_v21  ;;  %v6339_v5 = vadd.f32 %v9518_v28, %v8657_v9  ;;  %v9520_v42 = vld [vmem:[#allocation15_spill] sm:$0xff]  ;;  %v9521_v9 = vld [vmem:[#allocation16_spill] sm:$0xff]  ;;  %v4006_v49 = vadd.f32 %v6342_v4, %v9529_v22 }
 0x312   :  { %6727 = vtanh.f32 %v8710_v45  ;;  %v3982_v12 = vadd.f32 %v6324_v61, %v8574_v56  ;;  %v8739_v6 = vadd.f32 %v6460_v8, %v4087_v24  ;;  %v6333_v29 = vadd.f32 %v9521_v9, %v9520_v42  ;;  %v9532_v61 = vld [vmem:[#allocation14_spill] sm:$0xff]  ;;  %v70_v28 = vld [vmem:[%s9480_s2] sm:$0xff]  ;;  %v79_v9 = vld [vmem:[%s9480_s2 + $0x48] sm:$0xff] }
 0x313   :  { %6729 = vtanh.f32 %v8725_v53  ;;  %v4175_v43 = vpop.f32.mrf.mxu1  ;;  %v4003_v57 = vadd.f32 %v6339_v5, %v9522_v46  ;;  %v4103_v48 = vadd.f32 %v6406_v30, %v4006_v49  ;;  %v74_v42 = vld [vmem:[%s9480_s2 + $0x20] sm:$0xff]  ;;  %v80_v46 = vld [vmem:[%s9480_s2 + $0x50] sm:$0xff]  ;;  %v5779_v37 = vmul.f32 -1.442695, %v8704_v50 }
 0x314   :  { %v4079_v35 = vadd.f32 %v6388_v58, %v3982_v12  ;;  %6731 = vtanh.f32 %v8733_v62  ;;  %v3995_v14 = vadd.f32 %v6333_v29, %v9525_v31  ;;  %v75_v29 = vld [vmem:[%s9480_s2 + $0x28] sm:$0xff]  ;;  %v5776_v31 = vmul.f32 -1.442695, %v8692_v33 }
 0x315   :  { %6733 = vtanh.f32 %v8739_v6  ;;  %v6463_v27 = vpop.f32.mrf.mxu1  ;;  %v4100_v51 = vadd.f32 %v6403_v34, %v4003_v57  ;;  %v73_v34 = vld [vmem:[%s9480_s2 + $0x18] sm:$0xff]  ;;  %v76_v57 = vld [vmem:[%s9480_s2 + $0x30] sm:$0xff]  ;;  %v5787_v33 = vmul.f32 -1.442695, %v8739_v6 }
 0x316   :  { %v8752_v63 = vadd.f32 %v4175_v43, %v4079_v35  ;;  %6735 = vtanh.f32 %v8746_v60  ;;  %v4092_v2 = vadd.f32 %v6397_v16, %v3995_v14  ;;  %v72_v43 = vld [vmem:[%s9480_s2 + $0x10] sm:$0xff]  ;;  %v5780_v16 = vmul.f32 -1.442695, %v8677_v19 }
 0x317   :  { %v6716_v44 = vpop.eup %6715  ;;  %v8763_v54 = vadd.f32 %v6463_v27, %v4100_v51  ;;  %v4188_v41 = vpop.f32.mrf.mxu1  ;;  %v82_v27 = vld [vmem:[%s9480_s2 + $0x60] sm:$0xff]  ;;  %v5778_v51 = vmul.f32 -1.442695, %v8682_v0  ;;  %v5786_v14 = vmul.f32 -1.442695, %v8696_v39 }
 0x318   :  { %4419 = vrot.lane.b32.xlu0 %v6716_v44, %s6912_s28  ;;  %6737 = vtanh.f32 %v8752_v63  ;;  %v9527_v44 = vld [vmem:[#allocation18_spill] sm:$0xff]  ;;  %v8773_v20 = vadd.f32 %v4188_v41, %v4092_v2  ;;  %v5784_v0 = vmul.f32 -1.442695, %v8725_v53  ;;  %v5782_v39 = vmul.f32 -1.442695, %v8733_v62 }
 0x319   :  { %v6718_v32 = vpop.eup %6717  ;;  %v6336_v47 = vadd.f32 %v9528_v59, %v9527_v44  ;;  %6739 = vtanh.f32 %v8763_v54  ;;  %v6464_v25 = vpop.f32.mrf.mxu1  ;;  %v5783_v59 = vmul.f32 -1.442695, %v8746_v60  ;;  %v5790_v49 = vmul.f32 -1.442695, %v8763_v54 }
 0x31a   :  { %6741 = vtanh.f32 %v8773_v20  ;;  %v8780_v10 = vadd.f32 %v6464_v25, %v4103_v48 }
 0x31b   :  { %v6720_v52 = vpop.eup %6719  ;;  %v3998_v23 = vadd.f32 %v6336_v47, %v9532_v61  ;;  %v4191_v8 = vpop.f32.mrf.mxu1 }
 0x31c   :  { %4415 = vrot.lane.b32.xlu0 %v6718_v32, %s6912_s28  ;;  %v6722_v56 = vpop.eup %6721  ;;  %v6400_v32 = vadd.f32 %v9531_v18, %v9530_v3  ;;  %6743 = vtanh.f32 %v8780_v10 }
 0x31d   :  { %v6724_v7 = vpop.eup %6723 }
 0x31e   :  { %4431 = vrot.lane.b32.xlu1 %v6724_v7, %s6912_s28  ;;  %v6726_v1 = vpop.eup %6725  ;;  %v4095_v58 = vadd.f32 %v6400_v32, %v3998_v23  ;;  %v81_v7 = vld [vmem:[%s9480_s2 + $0x58] sm:$0xff] }
 0x31f   :  { %v6728_v17 = vpop.eup %6727 }
 0x320   :  { %4421 = vrot.lane.b32.xlu0 %v6720_v52, %s6912_s28  ;;  %v6730_v38 = vpop.eup %6729  ;;  %v8785_v26 = vadd.f32 %v4191_v8, %v4095_v58  ;;  %v78_v52 = vld [vmem:[%s9480_s2 + $0x40] sm:$0xff] }
 0x321   :  { %v6732_v40 = vpop.eup %6731 }
 0x322   :  { %4413 = vrot.lane.b32.xlu1 %v6728_v17, %s6912_s28  ;;  %v6734_v21 = vpop.eup %6733  ;;  %6745 = vtanh.f32 %v8785_v26  ;;  %v5777_v17 = vmul.f32 -1.442695, %v8710_v45  ;;  %v5785_v45 = vmul.f32 -1.442695, %v8752_v63  ;;  %v5788_v63 = vmul.f32 -1.442695, %v8773_v20 }
 0x323   :  { %v6736_v24 = vpop.eup %6735  ;;  %6747 = vpow2.f32 %v5780_v16  ;;  %v5789_v20 = vmul.f32 -1.442695, %v8785_v26 }
 0x324   :  { %4411 = vrot.lane.b32.xlu0 %v6722_v56, %s6912_s28  ;;  %v71_v56 = vld [vmem:[%s9480_s2 + $0x8] sm:$0xff]  ;;  %6749 = vpow2.f32 %v5778_v51 }
 0x325   :  { %v6738_v12 = vpop.eup %6737 }
 0x326   :  { %4433 = vrot.lane.b32.xlu1 %v6734_v21, %s6912_s28  ;;  %v6740_v5 = vpop.eup %6739 }
 0x327   :  { %v6742_v13 = vpop.eup %6741 }
 0x328   :  { %4417 = vrot.lane.b32.xlu0 %v6726_v1, %s6912_s28  ;;  %v5781_v1 = vmul.f32 -1.442695, %v8687_v15 }
 0x329   :  { %v6744_v55 = vpop.eup %6743 }
 0x32a   :  { %4429 = vrot.lane.b32.xlu1 %v6738_v12, %s6912_s28  ;;  %6751 = vpow2.f32 %v5781_v1 }
 0x32b   :  { %6753 = vpow2.f32 %v5776_v31 }
 0x32c   :  { %4427 = vrot.lane.b32.xlu0 %v6730_v38, %s6912_s28  ;;  %6755 = vpow2.f32 %v5786_v14 }
 0x32d   :  { %6757 = vpow2.f32 %v5779_v37 }
 0x32e   :  { %4439 = vrot.lane.b32.xlu1 %v6740_v5, %s6912_s28  ;;  %6759 = vpow2.f32 %v5777_v17 }
 0x32f   :  { %v6746_v35 = vpop.eup %6745 }
 0x330   :  { %4423 = vrot.lane.b32.xlu0 %v6732_v40, %s6912_s28  ;;  %v6748_v4 = vpop.eup %6747 }
 0x331   :  { %v4255_v41 = vadd.f32 1.0, %v6748_v4  ;;  %v6750_v19 = vpop.eup %6749 }
 0x332   :  { %4435 = vrot.lane.b32.xlu1 %v6742_v13, %s6912_s28  ;;  %v4253_v15 = vadd.f32 1.0, %v6750_v19  ;;  %v5791_v13 = vmul.f32 -1.442695, %v8780_v10  ;;  %v77_v19 = vld [vmem:[%s9480_s2 + $0x38] sm:$0xff] }
 0x333   :  { %6761 = vrcp.f32 %v4255_v41 }
 0x334   :  { %4425 = vrot.lane.b32.xlu0 %v6736_v24, %s6912_s28  ;;  %6763 = vpow2.f32 %v5784_v0 }
 0x335   :  { %6765 = vrcp.f32 %v4253_v15 }
 0x336   :  { %4441 = vrot.lane.b32.xlu1 %v6744_v55, %s6912_s28  ;;  %6767 = vpow2.f32 %v5787_v33 }
 0x337   :  { %v6752_v30 = vpop.eup %6751  ;;  %6769 = vpow2.f32 %v5782_v39 }
 0x338   :  { %4331 = vrot.lane.b32.xlu0 %v70_v28, %s6912_s28  ;;  %v6754_v2 = vpop.eup %6753  ;;  %v4256_v50 = vadd.f32 1.0, %v6752_v30 }
 0x339   :  { %v6756_v44 = vpop.eup %6755  ;;  %v4251_v53 = vadd.f32 1.0, %v6754_v2 }
 0x33a   :  { %4437 = vrot.lane.b32.xlu1 %v6746_v35, %s6912_s28  ;;  %6771 = vrcp.f32 %v4256_v50  ;;  %v4261_v47 = vadd.f32 1.0, %v6756_v44  ;;  %v6758_v22 = vpop.eup %6757 }
 0x33b   :  { %6773 = vpow2.f32 %v5785_v45  ;;  %v6760_v62 = vpop.eup %6759  ;;  %v4254_v6 = vadd.f32 1.0, %v6758_v22 }
 0x33c   :  { %4347 = vrot.lane.b32.xlu0 %v78_v52, %s6912_s28  ;;  %6775 = vpow2.f32 %v5783_v59  ;;  %v4252_v18 = vadd.f32 1.0, %v6760_v62 }
 0x33d   :  { %6777 = vrcp.f32 %v4251_v53 }
 0x33e   :  { %4333 = vrot.lane.b32.xlu1 %v71_v56, %s6912_s28  ;;  %6779 = vrcp.f32 %v4261_v47 }
 0x33f   :  { %6781 = vpow2.f32 %v5790_v49 }
 0x340   :  { %4335 = vrot.lane.b32.xlu0 %v72_v43, %s6912_s28  ;;  %v8863_v38 = vpop.eup %6761  ;;  %6783 = vrcp.f32 %v4254_v6 }
 0x341   :  { %v6764_v60 = vpop.eup %6763  ;;  %6785 = vpow2.f32 %v5788_v63 }
 0x342   :  { %4349 = vrot.lane.b32.xlu1 %v79_v9, %s6912_s28  ;;  %v8868_v32 = vpop.eup %6765  ;;  %v4259_v54 = vadd.f32 1.0, %v6764_v60  ;;  %6787 = vrcp.f32 %v4252_v18 }
 0x343   :  { %v6768_v40 = vpop.eup %6767 }
 0x344   :  { %4337 = vrot.lane.b32.xlu0 %v73_v34, %s6912_s28  ;;  %v6770_v23 = vpop.eup %6769  ;;  %6789 = vrcp.f32 %v4259_v54  ;;  %v4262_v8 = vadd.f32 1.0, %v6768_v40 }
 0x345   :  { %v4257_v28 = vadd.f32 1.0, %v6770_v23  ;;  %6791 = vpow2.f32 %v5789_v20  ;;  %v4988_v23 = vld [vmem:[%s9485_s7] sm:$0xff]  ;;  %v4990_v20 = vld [vmem:[%s9485_s7 + $0x10] sm:$0xff] }
 0x346   :  { %4351 = vrot.lane.b32.xlu1 %v80_v46, %s6912_s28  ;;  %6793 = vrcp.f32 %v4262_v8 }
 0x347   :  { %v8873_v21 = vpop.eup %6771  ;;  %6795 = vrcp.f32 %v4257_v28 }
 0x348   :  { %4339 = vrot.lane.b32.xlu0 %v74_v42, %s6912_s28  ;;  %v6774_v58 = vpop.eup %6773  ;;  %6797 = vpow2.f32 %v5791_v13 }
 0x349   :  { %v6776_v12 = vpop.eup %6775  ;;  %v4260_v26 = vadd.f32 1.0, %v6774_v58 }
 0x34a   :  { %4353 = vrot.lane.b32.xlu1 %v81_v7, %s6912_s28  ;;  %v8876_v52 = vpop.eup %6777  ;;  %v4258_v9 = vadd.f32 1.0, %v6776_v12 }
 0x34b   :  { %v8879_v43 = vpop.eup %6779  ;;  %6799 = vrcp.f32 %v4260_v26 }
 0x34c   :  { %4341 = vrot.lane.b32.xlu0 %v75_v29, %s6912_s28  ;;  %v6782_v55 = vpop.eup %6781  ;;  %6801 = vrcp.f32 %v4258_v9 }
 0x34d   :  { %v8884_v29 = vpop.eup %6783  ;;  %v4265_v10 = vadd.f32 1.0, %v6782_v55 }
 0x34e   :  { %4355 = vrot.lane.b32.xlu1 %v82_v27, %s6912_s28  ;;  %v6786_v46 = vpop.eup %6785 }
 0x34f   :  { %6803 = vrcp.f32 %v4265_v10  ;;  %v4263_v16 = vadd.f32 1.0, %v6786_v46 }
 0x350   :  { %4343 = vrot.lane.b32.xlu0 %v76_v57, %s6912_s28  ;;  %v85_v57 = vld [vmem:[%s9480_s2 + $0x78] sm:$0xff] }
 0x351   :  { %6805 = vrcp.f32 %v4263_v16 }
 0x352   :  { %4357 = vrot.lane.b32.xlu1 %v83_v11, %s6912_s28 }
 0x356   :  { %4359 = vrot.lane.b32.xlu1 %v84_v36, %s6912_s28  ;;  %v8892_v36 = vpop.eup %6787 }
 0x357   :  { %v8896_v51 = vpop.eup %6789 }
 0x358   :  { %v6792_v37 = vpop.eup %6791 }
 0x359   :  { %v8902_v4 = vpop.eup %6793  ;;  %v4264_v33 = vadd.f32 1.0, %v6792_v37 }
 0x35a   :  { %v8908_v15 = vpop.eup %6795 }
 0x35b   :  { %v6798_v30 = vpop.eup %6797  ;;  %6807 = vrcp.f32 %v4264_v33 }
 0x35c   :  { %v8912_v39 = vpop.eup %6799  ;;  %v4266_v53 = vadd.f32 1.0, %v6798_v30 }
 0x35d   :  { %v8916_v59 = vpop.eup %6801 }
 0x35e   :  { %v8920_v47 = vpop.eup %6803  ;;  %6809 = vrcp.f32 %v4266_v53 }
 0x35f   :  { %v8926_v6 = vpop.eup %6805 }
 0x368   :  { %v8934_v18 = vpop.eup %6807 }
 0x36b   :  { %v8938_v40 = vpop.eup %6809 }
 0x38a   :  { %v4420_v25 = vpop.permute.xlu0 %4419 }
 0x38b   :  { %v4463_v3 = vmul.f32 %v8863_v38, %v4420_v25 }
 0x38d   :  { %4499 = vrot.lane.b32.xlu0 %v4463_v3, %s6912_s28  ;;  %v4989_v3 = vld [vmem:[%s9485_s7 + $0x8] sm:$0xff] }
 0x38e   :  { %v4416_v48 = vpop.permute.xlu0 %4415 }
 0x38f   :  { %v4461_v61 = vmul.f32 %v8868_v32, %v4416_v48 }
 0x390   :  { %v4432_v34 = vpop.permute.xlu1 %4431 }
 0x391   :  { %4495 = vrot.lane.b32.xlu0 %v4461_v61, %s6912_s28  ;;  %v4469_v56 = vmul.f32 %v8879_v43, %v4432_v34 }
 0x392   :  { %v4422_v24 = vpop.permute.xlu0 %4421 }
 0x393   :  { %v4464_v5 = vmul.f32 %v8873_v21, %v4422_v24  ;;  %4511 = vrot.lane.b32.xlu1 %v4469_v56, %s6912_s28 }
 0x394   :  { %v4414_v11 = vpop.permute.xlu1 %4413 }
 0x395   :  { %4501 = vrot.lane.b32.xlu0 %v4464_v5, %s6912_s28  ;;  %v4460_v31 = vmul.f32 %v8892_v36, %v4414_v11 }
 0x396   :  { %v4412_v35 = vpop.permute.xlu0 %4411 }
 0x397   :  { %v4459_v42 = vmul.f32 %v8876_v52, %v4412_v35  ;;  %4361 = vrot.lane.b32.xlu1 %v85_v57, %s6912_s28 }
 0x398   :  { %v4434_v17 = vpop.permute.xlu1 %4433 }
 0x399   :  { %4491 = vrot.lane.b32.xlu0 %v4459_v42, %s6912_s28  ;;  %v4470_v0 = vmul.f32 %v8902_v4, %v4434_v17 }
 0x39a   :  { %v4418_v7 = vpop.permute.xlu0 %4417 }
 0x39b   :  { %v4462_v27 = vmul.f32 %v8884_v29, %v4418_v7  ;;  %4493 = vrot.lane.b32.xlu1 %v4460_v31, %s6912_s28 }
 0x39c   :  { %v4430_v2 = vpop.permute.xlu1 %4429 }
 0x39d   :  { %4497 = vrot.lane.b32.xlu0 %v4462_v27, %s6912_s28  ;;  %v4468_v50 = vmul.f32 %v8912_v39, %v4430_v2 }
 0x39e   :  { %v4428_v1 = vpop.permute.xlu0 %4427 }
 0x39f   :  { %v4467_v14 = vmul.f32 %v8896_v51, %v4428_v1  ;;  %4513 = vrot.lane.b32.xlu1 %v4470_v0, %s6912_s28 }
 0x3a0   :  { %v4440_v22 = vpop.permute.xlu1 %4439 }
 0x3a1   :  { %4507 = vrot.lane.b32.xlu0 %v4467_v14, %s6912_s28  ;;  %v4473_v49 = vmul.f32 %v8920_v47, %v4440_v22 }
 0x3a2   :  { %v4424_v41 = vpop.permute.xlu0 %4423 }
 0x3a3   :  { %v4465_v44 = vmul.f32 %v8908_v15, %v4424_v41  ;;  %4509 = vrot.lane.b32.xlu1 %v4468_v50, %s6912_s28 }
 0x3a4   :  { %v4436_v63 = vpop.permute.xlu1 %4435 }
 0x3a5   :  { %4345 = vrot.lane.b32.xlu0 %v77_v19, %s6912_s28  ;;  %v4471_v25 = vmul.f32 %v8926_v6, %v4436_v63 }
 0x3a6   :  { %v4426_v45 = vpop.permute.xlu0 %4425 }
 0x3a7   :  { %v4466_v62 = vmul.f32 %v8916_v59, %v4426_v45  ;;  %4519 = vrot.lane.b32.xlu1 %v4473_v49, %s6912_s28 }
 0x3a8   :  { %v4442_v60 = vpop.permute.xlu1 %4441 }
 0x3a9   :  { %4503 = vrot.lane.b32.xlu0 %v4465_v44, %s6912_s28  ;;  %v4474_v61 = vmul.f32 %v8938_v40, %v4442_v60 }
 0x3aa   :  { %v8950_v8 = vpop.permute.xlu0 %4331 }
 0x3ab   :  { %4515 = vrot.lane.b32.xlu1 %v4471_v25, %s6912_s28 }
 0x3ac   :  { %v4438_v54 = vpop.permute.xlu1 %4437 }
 0x3ad   :  { %4505 = vrot.lane.b32.xlu0 %v4466_v62, %s6912_s28  ;;  %v4472_v48 = vmul.f32 %v8934_v18, %v4438_v54 }
 0x3ae   :  { %v8952_v58 = vpop.permute.xlu0 %4347 }
 0x3af   :  { %4517 = vrot.lane.b32.xlu1 %v4472_v48, %s6912_s28 }
 0x3b0   :  { %v4334_v12 = vpop.permute.xlu1 %4333 }
 0x3b1   :  { %5006 = vrot.lane.b32.xlu0 %v4989_v3, %s6913_s29  ;;  %v4380_v14 = vmul.f32 %v8892_v36, %v4334_v12 }
 0x3b2   :  { %v4336_v24 = vpop.permute.xlu0 %4335 }
 0x3b3   :  { %4521 = vrot.lane.b32.xlu1 %v4474_v61, %s6912_s28 }
 0x3b4   :  { %v4350_v5 = vpop.permute.xlu1 %4349 }
 0x3b5   :  { %v4388_v2 = vmul.f32 %v8912_v39, %v4350_v5 }
 0x3b6   :  { %v8954_v28 = vpop.permute.xlu0 %4337 }
 0x3b7   :  { %5004 = vrot.lane.b32.xlu1 %v4988_v23, %s6913_s29 }
 0x3b8   :  { %v4352_v26 = vpop.permute.xlu1 %4351 }
 0x3b9   :  { %v4389_v7 = vmul.f32 %v8879_v43, %v4352_v26 }
 0x3ba   :  { %v4340_v13 = vpop.permute.xlu0 %4339 }
 0x3bb   :  { %5008 = vrot.lane.b32.xlu1 %v4990_v20, %s6913_s29  ;;  %v4383_v62 = vmul.f32 %v8863_v38, %v4340_v13  ;;  %v4381_v13 = vmul.f32 %v8868_v32, %v4336_v24  ;;  %v4379_v24 = vmul.f32 %v8876_v52, %v8950_v8  ;;  %v4382_v8 = vmul.f32 %v8884_v29, %v8954_v28 }
 0x3bc   :  { %v4354_v34 = vpop.permute.xlu1 %4353 }
 0x3bd   :  { %v4390_v19 = vmul.f32 %v8902_v4, %v4354_v34 }
 0x3be   :  { %v4342_v55 = vpop.permute.xlu0 %4341 }
 0x3c0   :  { %v4356_v56 = vpop.permute.xlu1 %4355 }
 0x3c1   :  { %v4391_v61 = vmul.f32 %v8926_v6, %v4356_v56 }
 0x3c2   :  { %v4344_v35 = vpop.permute.xlu0 %4343 }
 0x3c3   :  { %v4385_v50 = vmul.f32 %v8908_v15, %v4344_v35  ;;  %v4384_v35 = vmul.f32 %v8873_v21, %v4342_v55 }
 0x3c4   :  { %v8956_v9 = vpop.permute.xlu1 %4357 }
 0x3c8   :  { %v4360_v46 = vpop.permute.xlu1 %4359 }
 0x3c9   :  { %v4393_v63 = vmul.f32 %v8920_v47, %v4360_v46 }
 0x3ff   :  { %v4500_v42 = vpop.permute.xlu0 %4499 }
 0x400   :  { %v8984_v25 = vadd.f32 %v4500_v42, %v4383_v62 }
 0x403   :  { %v4496_v10 = vpop.permute.xlu0 %4495 }
 0x404   :  { %v9000_v34 = vadd.f32 %v4496_v10, %v4381_v13 }
 0x405   :  { %v4512_v27 = vpop.permute.xlu1 %4511 }
 0x406   :  { %v8959_v16 = vadd.f32 %v4512_v27, %v4389_v7 }
 0x407   :  { %v4502_v57 = vpop.permute.xlu0 %4501 }
 0x408   :  { %6811 = vtanh.f32 %v8959_v16  ;;  %v9006_v42 = vadd.f32 %v4502_v57, %v4384_v35  ;;  %v4392_v57 = vmul.f32 %v8934_v18, %v8956_v9 }
 0x409   :  { %v4362_v1 = vpop.permute.xlu1 %4361 }
 0x40a   :  { %v4394_v10 = vmul.f32 %v8938_v40, %v4362_v1 }
 0x40b   :  { %v4492_v11 = vpop.permute.xlu0 %4491 }
 0x40c   :  { %v9014_v55 = vadd.f32 %v4492_v11, %v4379_v24 }
 0x40d   :  { %v4494_v37 = vpop.permute.xlu1 %4493 }
 0x40e   :  { %v8967_v41 = vadd.f32 %v4494_v37, %v4380_v14 }
 0x40f   :  { %v8962_v31 = vpop.permute.xlu0 %4497 }
 0x410   :  { %6813 = vtanh.f32 %v8967_v41 }
 0x411   :  { %v4514_v0 = vpop.permute.xlu1 %4513 }
 0x412   :  { %v8971_v33 = vadd.f32 %v4514_v0, %v4390_v19  ;;  %v9029_v0 = vadd.f32 %v8962_v31, %v4382_v8 }
 0x413   :  { %v8965_v17 = vpop.permute.xlu0 %4507 }
 0x414   :  { %6815 = vtanh.f32 %v8971_v33 }
 0x415   :  { %v6812_v44 = vpop.eup %6811  ;;  %v4510_v45 = vpop.permute.xlu1 %4509 }
 0x416   :  { %v8976_v22 = vadd.f32 %v4510_v45, %v4388_v2  ;;  %4607 = vrot.lane.b32.xlu1 %v6812_v44, %s6912_s28 }
 0x417   :  { %v4346_v30 = vpop.permute.xlu0 %4345 }
 0x418   :  { %6817 = vtanh.f32 %v8976_v22  ;;  %v4386_v48 = vmul.f32 %v8916_v59, %v4346_v30  ;;  %v4387_v30 = vmul.f32 %v8896_v51, %v8952_v58 }
 0x419   :  { %v4520_v60 = vpop.permute.xlu1 %4519 }
 0x41a   :  { %v8987_v3 = vadd.f32 %v4520_v60, %v4393_v63  ;;  %v9038_v28 = vadd.f32 %v8965_v17, %v4387_v30 }
 0x41b   :  { %v4504_v53 = vpop.permute.xlu0 %4503 }
 0x41c   :  { %v8979_v49 = vadd.f32 %v4504_v53, %v4385_v50 }
 0x41d   :  { %v6814_v23 = vpop.eup %6813  ;;  %v4516_v20 = vpop.permute.xlu1 %4515 }
 0x41e   :  { %6819 = vtanh.f32 %v8979_v49  ;;  %v8995_v5 = vadd.f32 %v4516_v20, %v4391_v61  ;;  %4589 = vrot.lane.b32.xlu1 %v6814_v23, %s6912_s28 }
 0x41f   :  { %v4506_v54 = vpop.permute.xlu0 %4505  ;;  %6821 = vtanh.f32 %v8987_v3 }
 0x420   :  { %6823 = vtanh.f32 %v8984_v25  ;;  %v8993_v12 = vadd.f32 %v4506_v54, %v4386_v48 }
 0x421   :  { %6825 = vtanh.f32 %v8995_v5  ;;  %v6816_v26 = vpop.eup %6815  ;;  %v4518_v46 = vpop.permute.xlu1 %4517 }
 0x422   :  { %6827 = vtanh.f32 %v8993_v12  ;;  %4609 = vrot.lane.b32.xlu1 %v6816_v26, %s6912_s28  ;;  %v9024_v1 = vadd.f32 %v4518_v46, %v4392_v57 }
 0x423   :  { %6829 = vtanh.f32 %v9000_v34  ;;  %v9048_v53 = vpop.permute.xlu0 %5006 }
 0x424   :  { %6831 = vtanh.f32 %v9006_v42 }
 0x425   :  { %v6818_v56 = vpop.eup %6817  ;;  %v4522_v14 = vpop.permute.xlu1 %4521 }
 0x426   :  { %4605 = vrot.lane.b32.xlu1 %v6818_v56, %s6912_s28  ;;  %v9018_v19 = vadd.f32 %v4522_v14, %v4394_v10 }
 0x428   :  { %6833 = vtanh.f32 %v9018_v19 }
 0x429   :  { %6835 = vtanh.f32 %v9014_v55  ;;  %v9055_v60 = vpop.permute.xlu1 %5004 }
 0x42a   :  { %6837 = vtanh.f32 %v9024_v1 }
 0x42b   :  { %v6820_v7 = vpop.eup %6819  ;;  %6839 = vtanh.f32 %v9029_v0 }
 0x42c   :  { %4599 = vrot.lane.b32.xlu0 %v6820_v7, %s6912_s28  ;;  %v6822_v27 = vpop.eup %6821  ;;  %6841 = vtanh.f32 %v9038_v28 }
 0x42d   :  { %v6824_v37 = vpop.eup %6823  ;;  %4615 = vrot.lane.b32.xlu1 %v6822_v27, %s6912_s28 }
 0x42e   :  { %v6826_v11 = vpop.eup %6825 }
 0x42f   :  { %v6828_v9 = vpop.eup %6827 }
 0x430   :  { %4595 = vrot.lane.b32.xlu0 %v6824_v37, %s6912_s28  ;;  %v6830_v2 = vpop.eup %6829 }
 0x431   :  { %4611 = vrot.lane.b32.xlu1 %v6826_v11, %s6912_s28  ;;  %v6832_v31 = vpop.eup %6831 }
 0x434   :  { %4601 = vrot.lane.b32.xlu0 %v6828_v9, %s6912_s28 }
 0x435   :  { %v6834_v50 = vpop.eup %6833 }
 0x436   :  { %v6836_v44 = vpop.eup %6835  ;;  %4617 = vrot.lane.b32.xlu1 %v6834_v50, %s6912_s28 }
 0x437   :  { %v6838_v58 = vpop.eup %6837 }
 0x438   :  { %4591 = vrot.lane.b32.xlu0 %v6830_v2, %s6912_s28  ;;  %v6840_v45 = vpop.eup %6839 }
 0x439   :  { %v6842_v17 = vpop.eup %6841 }
 0x43a   :  { %4613 = vrot.lane.b32.xlu1 %v6838_v58, %s6912_s28 }
 0x43c   :  { %4597 = vrot.lane.b32.xlu0 %v6832_v31, %s6912_s28 }
 0x440   :  { %4587 = vrot.lane.b32.xlu0 %v6836_v44, %s6912_s28 }
 0x444   :  { %4593 = vrot.lane.b32.xlu0 %v6840_v45, %s6912_s28 }
 0x448   :  { %4603 = vrot.lane.b32.xlu0 %v6842_v17, %s6912_s28 }
 0x49e   :  { %v4600_v62 = vpop.permute.xlu0 %4599 }
 0x49f   :  { %v9051_v63 = vmul.f32 %v8908_v15, %v4600_v62  ;;  %v9067_v15 = vpop.permute.xlu1 %5008 }
 0x4a1   :  { %4679 = vrot.lane.b32.xlu0 %v9051_v63, %s6913_s29  ;;  %v4795_v23 = vmul.f32 %v9051_v63, %v9051_v63 }
 0x4a2   :  { %v4596_v54 = vpop.permute.xlu0 %4595 }
 0x4a3   :  { %v9058_v48 = vmul.f32 %v8863_v38, %v4596_v54 }
 0x4a5   :  { %4675 = vrot.lane.b32.xlu0 %v9058_v48, %s6913_s29  ;;  %v4793_v38 = vmul.f32 %v9058_v48, %v9058_v48 }
 0x4a6   :  { %v4602_v61 = vpop.permute.xlu0 %4601 }
 0x4a7   :  { %v9065_v20 = vmul.f32 %v8916_v59, %v4602_v61  ;;  %v4608_v59 = vpop.permute.xlu1 %4607 }
 0x4a8   :  { %v9097_v27 = vmul.f32 %v8879_v43, %v4608_v59 }
 0x4a9   :  { %4681 = vrot.lane.b32.xlu1 %v9065_v20, %s6913_s29  ;;  %4833 = vrot.lane.b32.xlu0 %v4795_v23, %s6913_s29  ;;  %v4796_v56 = vmul.f32 %v9065_v20, %v9065_v20 }
 0x4aa   :  { %v4592_v13 = vpop.permute.xlu0 %4591  ;;  %v4799_v11 = vmul.f32 %v9097_v27, %v9097_v27 }
 0x4ab   :  { %v9075_v26 = vmul.f32 %v8868_v32, %v4592_v13  ;;  %v4590_v32 = vpop.permute.xlu1 %4589 }
 0x4ac   :  { %v9117_v9 = vmul.f32 %v8892_v36, %v4590_v32 }
 0x4ad   :  { %4829 = vrot.lane.b32.xlu1 %v4793_v38, %s6913_s29  ;;  %4671 = vrot.lane.b32.xlu0 %v9075_v26, %s6913_s29  ;;  %v4791_v24 = vmul.f32 %v9075_v26, %v9075_v26 }
 0x4ae   :  { %v4598_v35 = vpop.permute.xlu0 %4597 }
 0x4af   :  { %v9083_v46 = vmul.f32 %v8873_v21, %v4598_v35  ;;  %v4610_v37 = vpop.permute.xlu1 %4609 }
 0x4b0   :  { %v9126_v30 = vmul.f32 %v8902_v4, %v4610_v37 }
 0x4b1   :  { %4835 = vrot.lane.b32.xlu0 %v4796_v56, %s6913_s29  ;;  %4677 = vrot.lane.b32.xlu1 %v9083_v46, %s6913_s29  ;;  %v4794_v14 = vmul.f32 %v9083_v46, %v9083_v46 }
 0x4b2   :  { %v4588_v7 = vpop.permute.xlu0 %4587  ;;  %v4800_v36 = vmul.f32 %v9126_v30, %v9126_v30 }
 0x4b3   :  { %v9091_v10 = vmul.f32 %v8876_v52, %v4588_v7  ;;  %v4606_v43 = vpop.permute.xlu1 %4605 }
 0x4b4   :  { %v9138_v4 = vmul.f32 %v8912_v39, %v4606_v43 }
 0x4b5   :  { %4825 = vrot.lane.b32.xlu1 %v4791_v24, %s6913_s29  ;;  %4667 = vrot.lane.b32.xlu0 %v9091_v10, %s6913_s29 }
 0x4b6   :  { %v4594_v21 = vpop.permute.xlu0 %4593  ;;  %v4798_v45 = vmul.f32 %v9138_v4, %v9138_v4 }
 0x4b7   :  { %v9105_v57 = vmul.f32 %v8884_v29, %v4594_v21  ;;  %v4789_v29 = vmul.f32 %v9091_v10, %v9091_v10  ;;  %v4616_v2 = vpop.permute.xlu1 %4615 }
 0x4b8   :  { %v9141_v44 = vmul.f32 %v8920_v47, %v4616_v2 }
 0x4b9   :  { %4831 = vrot.lane.b32.xlu1 %v4794_v14, %s6913_s29  ;;  %4687 = vrot.lane.b32.xlu0 %v9097_v27, %s6913_s29  ;;  %v4792_v31 = vmul.f32 %v9105_v57, %v9105_v57 }
 0x4ba   :  { %v4604_v52 = vpop.permute.xlu0 %4603  ;;  %v4803_v62 = vmul.f32 %v9141_v44, %v9141_v44 }
 0x4bb   :  { %v9108_v8 = vmul.f32 %v8896_v51, %v4604_v52  ;;  %v4790_v51 = vmul.f32 %v9117_v9, %v9117_v9  ;;  %v4612_v50 = vpop.permute.xlu1 %4611 }
 0x4bc   :  { %v9154_v39 = vmul.f32 %v8926_v6, %v4612_v50 }
 0x4bd   :  { %4673 = vrot.lane.b32.xlu1 %v9105_v57, %s6913_s29  ;;  %4683 = vrot.lane.b32.xlu0 %v9108_v8, %s6913_s29  ;;  %v4797_v17 = vmul.f32 %v9108_v8, %v9108_v8 }
 0x4be   :  { %v4801_v54 = vmul.f32 %v9154_v39, %v9154_v39 }
 0x4bf   :  { %v4618_v58 = vpop.permute.xlu1 %4617 }
 0x4c0   :  { %v9170_v6 = vmul.f32 %v8938_v40, %v4618_v58 }
 0x4c1   :  { %4821 = vrot.lane.b32.xlu1 %v4789_v29, %s6913_s29  ;;  %4841 = vrot.lane.b32.xlu0 %v4799_v11, %s6913_s29 }
 0x4c3   :  { %v4614_v47 = vpop.permute.xlu1 %4613 }
 0x4c4   :  { %v9165_v61 = vmul.f32 %v8934_v18, %v4614_v47  ;;  %v4804_v18 = vmul.f32 %v9170_v6, %v9170_v6 }
 0x4c5   :  { %4669 = vrot.lane.b32.xlu1 %v9117_v9, %s6913_s29  ;;  %4823 = vrot.lane.b32.xlu0 %v4790_v51, %s6913_s29 }
 0x4c6   :  { %v4802_v23 = vmul.f32 %v9165_v61, %v9165_v61 }
 0x4c9   :  { %4827 = vrot.lane.b32.xlu1 %v4792_v31, %s6913_s29  ;;  %4843 = vrot.lane.b32.xlu0 %v4800_v36, %s6913_s29 }
 0x4cd   :  { %4689 = vrot.lane.b32.xlu1 %v9126_v30, %s6913_s29  ;;  %4695 = vrot.lane.b32.xlu0 %v9141_v44, %s6913_s29 }
 0x4d1   :  { %4839 = vrot.lane.b32.xlu0 %v4798_v45, %s6913_s29  ;;  %4837 = vrot.lane.b32.xlu1 %v4797_v17, %s6913_s29 }
 0x4d5   :  { %4691 = vrot.lane.b32.xlu0 %v9154_v39, %s6913_s29  ;;  %4685 = vrot.lane.b32.xlu1 %v9138_v4, %s6913_s29 }
 0x4d9   :  { %4845 = vrot.lane.b32.xlu0 %v4801_v54, %s6913_s29  ;;  %4849 = vrot.lane.b32.xlu1 %v4803_v62, %s6913_s29 }
 0x4dd   :  { %4847 = vrot.lane.b32.xlu0 %v4802_v23, %s6913_s29  ;;  %4697 = vrot.lane.b32.xlu1 %v9170_v6, %s6913_s29 }
 0x4e1   :  { %4693 = vrot.lane.b32.xlu1 %v9165_v61, %s6913_s29 }
 0x4e5   :  { %4851 = vrot.lane.b32.xlu1 %v4804_v18, %s6913_s29 }
 0x513   :  { %v4680_v13 = vpop.permute.xlu0 %4679 }
 0x514   :  { %5186 = vst.msk [vmem:[#allocation6 + $0x30] sm:$0xff] %vm346_vm5, %v4680_v13  ;;  %v4733_v40 = vsel %vm346_vm5, %v4680_v13, 0.0 }
 0x515   :  { %4734 = vadd.xlane.f32.xlu1 %v4733_v40 }
 0x517   :  { %v4676_v38 = vpop.permute.xlu0 %4675 }
 0x518   :  { %5184 = vst.msk [vmem:[#allocation6 + $0x20] sm:$0xff] %vm346_vm5, %v4676_v38  ;;  %v4727_v59 = vsel %vm346_vm5, %v4676_v38, 0.0 }
 0x519   :  { %4728 = vadd.xlane.f32.xlu1 %v4727_v59 }
 0x51b   :  { %v4682_v35 = vpop.permute.xlu1 %4681  ;;  %v4834_v56 = vpop.permute.xlu0 %4833 }
 0x51c   :  { %5187 = vst.msk [vmem:[#allocation6 + $0x38] sm:$0xff] %vm346_vm5, %v4682_v35  ;;  %v4887_v32 = vsel %vm346_vm5, %v4834_v56, 0.0  ;;  %v4736_v43 = vsel %vm346_vm5, %v4682_v35, 0.0 }
 0x51d   :  { %4888 = vadd.xlane.f32.xlu1 %v4887_v32 }
 0x51f   :  { %v4830_v7 = vpop.permute.xlu1 %4829  ;;  %v4672_v24 = vpop.permute.xlu0 %4671 }
 0x520   :  { %5182 = vst.msk [vmem:[#allocation6 + $0x10] sm:$0xff] %vm346_vm5, %v4672_v24  ;;  %v4881_v21 = vsel %vm346_vm5, %v4830_v7, 0.0  ;;  %v4721_v14 = vsel %vm346_vm5, %v4672_v24, 0.0 }
 0x521   :  { %4882 = vadd.xlane.f32.xlu1 %v4881_v21  ;;  %4722 = vadd.xlane.f32.xlu0 %v4721_v14 }
 0x523   :  { %v4678_v37 = vpop.permute.xlu1 %4677  ;;  %v4836_v52 = vpop.permute.xlu0 %4835 }
 0x524   :  { %5185 = vst.msk [vmem:[#allocation6 + $0x28] sm:$0xff] %vm346_vm5, %v4678_v37  ;;  %v4730_v51 = vsel %vm346_vm5, %v4678_v37, 0.0  ;;  %v4890_v50 = vsel %vm346_vm5, %v4836_v52, 0.0 }
 0x525   :  { %4737 = vadd.xlane.f32.xlu1 %v4736_v43 }
 0x527   :  { %v4826_v11 = vpop.permute.xlu1 %4825  ;;  %v4668_v29 = vpop.permute.xlu0 %4667 }
 0x528   :  { %5180 = vst.msk [vmem:[#allocation6] sm:$0xff] %vm346_vm5, %v4668_v29  ;;  %v4715_v2 = vsel %vm346_vm5, %v4668_v29, 0.0  ;;  %v4875_v58 = vsel %vm346_vm5, %v4826_v11, 0.0 }
 0x529   :  { %4731 = vadd.xlane.f32.xlu1 %v4730_v51  ;;  %4716 = vadd.xlane.f32.xlu0 %v4715_v2 }
 0x52b   :  { %v4832_v36 = vpop.permute.xlu1 %4831  ;;  %v4688_v31 = vpop.permute.xlu0 %4687 }
 0x52c   :  { %5190 = vst.msk [vmem:[#allocation6 + $0x50] sm:$0xff] %vm346_vm5, %v4688_v31  ;;  %v4884_v47 = vsel %vm346_vm5, %v4832_v36, 0.0  ;;  %v4745_v62 = vsel %vm346_vm5, %v4688_v31, 0.0 }
 0x52d   :  { %4891 = vadd.xlane.f32.xlu1 %v4890_v50  ;;  %4876 = vadd.xlane.f32.xlu0 %v4875_v58 }
 0x52f   :  { %v4674_v45 = vpop.permute.xlu1 %4673  ;;  %v4684_v17 = vpop.permute.xlu0 %4683 }
 0x530   :  { %5183 = vst.msk [vmem:[#allocation6 + $0x18] sm:$0xff] %vm346_vm5, %v4674_v45  ;;  %5188 = vst.msk [vmem:[#allocation6 + $0x40] sm:$0xff] %vm346_vm5, %v4684_v17  ;;  %v4724_v13 = vsel %vm346_vm5, %v4674_v45, 0.0  ;;  %v4739_v35 = vsel %vm346_vm5, %v4684_v17, 0.0 }
 0x531   :  { %4885 = vadd.xlane.f32.xlu1 %v4884_v47  ;;  %4746 = vadd.xlane.f32.xlu0 %v4745_v62 }
 0x533   :  { %v4822_v54 = vpop.permute.xlu1 %4821  ;;  %v4842_v23 = vpop.permute.xlu0 %4841 }
 0x534   :  { %v4869_v18 = vsel %vm346_vm5, %v4822_v54, 0.0  ;;  %v4899_v59 = vsel %vm346_vm5, %v4842_v23, 0.0 }
 0x535   :  { %4870 = vadd.xlane.f32.xlu1 %v4869_v18  ;;  %4725 = vadd.xlane.f32.xlu0 %v4724_v13 }
 0x537   :  { %v4670_v40 = vpop.permute.xlu1 %4669  ;;  %v4824_v38 = vpop.permute.xlu0 %4823 }
 0x538   :  { %5181 = vst.msk [vmem:[#allocation6 + $0x8] sm:$0xff] %vm346_vm5, %v4670_v40  ;;  %v4872_v7 = vsel %vm346_vm5, %v4824_v38, 0.0  ;;  %v4718_v24 = vsel %vm346_vm5, %v4670_v40, 0.0  ;;  %v4991_v40 = vld [vmem:[%s9485_s7 + $0x18] sm:$0xff] }
 0x539   :  { %4740 = vadd.xlane.f32.xlu0 %v4739_v35  ;;  %4900 = vadd.xlane.f32.xlu1 %v4899_v59  ;;  %v4993_v35 = vld [vmem:[%s9485_s7 + $0x28] sm:$0xff] }
 0x53b   :  { %v4828_v56 = vpop.permute.xlu1 %4827  ;;  %v4844_v32 = vpop.permute.xlu0 %4843 }
 0x53c   :  { %v4878_v37 = vsel %vm346_vm5, %v4828_v56, 0.0  ;;  %v4902_v52 = vsel %vm346_vm5, %v4844_v32, 0.0 }
 0x53d   :  { %4719 = vadd.xlane.f32.xlu1 %v4718_v24  ;;  %4873 = vadd.xlane.f32.xlu0 %v4872_v7  ;;  %v4995_v7 = vld [vmem:[%s9485_s7 + $0x38] sm:$0xff] }
 0x53f   :  { %v4690_v21 = vpop.permute.xlu1 %4689  ;;  %v4696_v14 = vpop.permute.xlu0 %4695 }
 0x540   :  { %5191 = vst.msk [vmem:[#allocation6 + $0x58] sm:$0xff] %vm346_vm5, %v4690_v21  ;;  %5194 = vst.msk [vmem:[#allocation6 + $0x70] sm:$0xff] %vm346_vm5, %v4696_v14  ;;  %v4748_v31 = vsel %vm346_vm5, %v4690_v21, 0.0  ;;  %v4757_v50 = vsel %vm346_vm5, %v4696_v14, 0.0  ;;  %v5045_v21 = vld [vmem:[%s9486_s8 + $0x8] sm:$0xff]  ;;  %v5047_v14 = vld [vmem:[%s9486_s8 + $0x18] sm:$0xff] }
 0x541   :  { %4879 = vadd.xlane.f32.xlu1 %v4878_v37  ;;  %4903 = vadd.xlane.f32.xlu0 %v4902_v52  ;;  %v5049_v37 = vld [vmem:[%s9486_s8 + $0x28] sm:$0xff]  ;;  %v5051_v52 = vld [vmem:[%s9486_s8 + $0x38] sm:$0xff] }
 0x543   :  { %v4838_v43 = vpop.permute.xlu1 %4837  ;;  %v4840_v11 = vpop.permute.xlu0 %4839 }
 0x544   :  { %v4893_v29 = vsel %vm346_vm5, %v4838_v43, 0.0  ;;  %v4896_v51 = vsel %vm346_vm5, %v4840_v11, 0.0  ;;  %v4992_v43 = vld [vmem:[%s9485_s7 + $0x20] sm:$0xff]  ;;  %v4994_v11 = vld [vmem:[%s9485_s7 + $0x30] sm:$0xff] }
 0x545   :  { %4894 = vadd.xlane.f32.xlu1 %v4893_v29  ;;  %4897 = vadd.xlane.f32.xlu0 %v4896_v51  ;;  %v5044_v29 = vld [vmem:[%s9486_s8] sm:$0xff] }
 0x547   :  { %v4686_v2 = vpop.permute.xlu1 %4685  ;;  %v4692_v36 = vpop.permute.xlu0 %4691 }
 0x548   :  { %5189 = vst.msk [vmem:[#allocation6 + $0x48] sm:$0xff] %vm346_vm5, %v4686_v2  ;;  %5192 = vst.msk [vmem:[#allocation6 + $0x60] sm:$0xff] %vm346_vm5, %v4692_v36  ;;  %v4742_v45 = vsel %vm346_vm5, %v4686_v2, 0.0  ;;  %v4751_v17 = vsel %vm346_vm5, %v4692_v36, 0.0 }
 0x549   :  { %4749 = vadd.xlane.f32.xlu1 %v4748_v31  ;;  %4758 = vadd.xlane.f32.xlu0 %v4757_v50 }
 0x54b   :  { %v4850_v58 = vpop.permute.xlu1 %4849  ;;  %v4846_v54 = vpop.permute.xlu0 %4845 }
 0x54c   :  { %v4911_v62 = vsel %vm346_vm5, %v4850_v58, 0.0  ;;  %v4905_v18 = vsel %vm346_vm5, %v4846_v54, 0.0 }
 0x54d   :  { %4743 = vadd.xlane.f32.xlu1 %v4742_v45  ;;  %4752 = vadd.xlane.f32.xlu0 %v4751_v17 }
 0x54f   :  { %v4698_v47 = vpop.permute.xlu1 %4697  ;;  %v4848_v32 = vpop.permute.xlu0 %4847 }
 0x550   :  { %5195 = vst.msk [vmem:[#allocation6 + $0x78] sm:$0xff] %vm346_vm5, %v4698_v47  ;;  %v4760_v13 = vsel %vm346_vm5, %v4698_v47, 0.0  ;;  %v4908_v24 = vsel %vm346_vm5, %v4848_v32, 0.0 }
 0x551   :  { %4912 = vadd.xlane.f32.xlu0 %v4911_v62 }
 0x553   :  { %v4694_v23 = vpop.permute.xlu1 %4693 }
 0x554   :  { %5193 = vst.msk [vmem:[#allocation6 + $0x68] sm:$0xff] %vm346_vm5, %v4694_v23  ;;  %v4754_v38 = vsel %vm346_vm5, %v4694_v23, 0.0 }
 0x555   :  { %4906 = vadd.xlane.f32.xlu0 %v4905_v18 }
 0x557   :  { %v4852_v59 = vpop.permute.xlu1 %4851 }
 0x558   :  { %v4914_v56 = vsel %vm346_vm5, %v4852_v59, 0.0 }
 0x559   :  { %4761 = vadd.xlane.f32.xlu0 %v4760_v13 }
 0x55d   :  { %4755 = vadd.xlane.f32.xlu0 %v4754_v38 }
 0x55e   :  { %5010 = vrot.lane.b32.xlu1 %v4991_v40, %s6913_s29 }
 0x561   :  { %4915 = vadd.xlane.f32.xlu0 %v4914_v56 }
 0x562   :  { %5014 = vrot.lane.b32.xlu1 %v4993_v35, %s6913_s29 }
 0x565   :  { %4909 = vadd.xlane.f32.xlu0 %v4908_v24 }
 0x566   :  { %5018 = vrot.lane.b32.xlu1 %v4995_v7, %s6913_s29 }
 0x56a   :  { %5062 = vrot.lane.b32.xlu1 %v5045_v21, %s6913_s29 }
 0x56e   :  { %5066 = vrot.lane.b32.xlu1 %v5047_v14, %s6913_s29 }
 0x572   :  { %5070 = vrot.lane.b32.xlu1 %v5049_v37, %s6913_s29 }
 0x576   :  { %5074 = vrot.lane.b32.xlu1 %v5051_v52, %s6913_s29 }
 0x57a   :  { %5214 = vrot.lane.b32.xlu1 %v8967_v41, %s6914_s1  ;;  %v5046_v41 = vld [vmem:[%s9486_s8 + $0x10] sm:$0xff] }
 0x57b   :  { %5012 = vrot.lane.b32.xlu0 %v4992_v43, %s6913_s29 }
 0x57e   :  { %5218 = vrot.lane.b32.xlu1 %v9029_v0, %s6914_s1  ;;  %v5048_v0 = vld [vmem:[%s9486_s8 + $0x20] sm:$0xff] }
 0x57f   :  { %5016 = vrot.lane.b32.xlu0 %v4994_v11, %s6913_s29 }
 0x582   :  { %5222 = vrot.lane.b32.xlu1 %v9006_v42, %s6914_s1  ;;  %v5050_v42 = vld [vmem:[%s9486_s8 + $0x30] sm:$0xff]  ;;  %s6915_s8 = smov [#allocation6]  }
 0x583   :  { %5060 = vrot.lane.b32.xlu0 %v5044_v29, %s6913_s29  ;;  %s5293_s20 = sshll.u32 %s6915_s8, 4  ;;  %s5294_s20 = int_to_ptr.vmem [resolvable:$true] %s5293_s20 }
 0x584   :  { %s6847_s21 = scalar_lea.vmem %s5294_s20, 2048  ;;  %p6852_p1 = scmp.lt.s32.totalorder %s5294_s20, %s5294_s20 }
 0x585   :  { %p6848_p0 = scmp.ne.s32.totalorder %s5294_s20, %s6847_s21  ;;  %p6853_p2 = scmp.lt.s32.totalorder %s6847_s21, %s6847_s21 }
 0x586   :  { %5226 = vrot.lane.b32.xlu1 %v8993_v12, %s6914_s1 }
 0x587   :  { %5064 = vrot.lane.b32.xlu0 %v5046_v41, %s6913_s29  ;;  %p6854_p3 = por %p6853_p2, %p6852_p1 }
 0x589   :  { %p6855_p4 = pnand %p6854_p3, %p6848_p0 }
 0x58a   :  { %5230 = vrot.lane.b32.xlu1 %v8976_v22, %s6914_s1 }
 0x58b   :  { %5068 = vrot.lane.b32.xlu0 %v5048_v0, %s6913_s29 }
 0x58e   :  { %5234 = vrot.lane.b32.xlu1 %v8971_v33, %s6914_s1 }
 0x58f   :  { %5072 = vrot.lane.b32.xlu0 %v5050_v42, %s6913_s29 }
 0x592   :  { %5238 = vrot.lane.b32.xlu1 %v9024_v1, %s6914_s1 }
 0x593   :  { %5212 = vrot.lane.b32.xlu0 %v9014_v55, %s6914_s1 }
 0x597   :  { %5216 = vrot.lane.b32.xlu0 %v9000_v34, %s6914_s1 }
 0x59b   :  { %5220 = vrot.lane.b32.xlu0 %v8984_v25, %s6914_s1 }
 0x59e   :  { %v4735_v22 = vpop.xlane.xlu1 %4734 }
 0x59f   :  { %5224 = vrot.lane.b32.xlu0 %v8979_v49, %s6914_s1 }
 0x5a2   :  { %v4729_v12 = vpop.xlane.xlu1 %4728 }
 0x5a3   :  { %5228 = vrot.lane.b32.xlu0 %v9038_v28, %s6914_s1 }
 0x5a6   :  { %v4889_v33 = vpop.xlane.xlu1 %4888 }
 0x5a7   :  { %5232 = vrot.lane.b32.xlu0 %v8959_v16, %s6914_s1 }
 0x5aa   :  { %v4883_v1 = vpop.xlane.xlu1 %4882  ;;  %v4723_v34 = vpop.xlane.xlu0 %4722 }
 0x5ab   :  { %5236 = vrot.lane.b32.xlu0 %v8995_v5, %s6914_s1 }
 0x5ae   :  { %v4738_v55 = vpop.xlane.xlu1 %4737 }
 0x5b2   :  { %v4732_v51 = vpop.xlane.xlu1 %4731  ;;  %v4717_v25 = vpop.xlane.xlu0 %4716 }
 0x5b6   :  { %v4892_v2 = vpop.xlane.xlu1 %4891  ;;  %v4877_v36 = vpop.xlane.xlu0 %4876 }
 0x5ba   :  { %v4886_v31 = vpop.xlane.xlu1 %4885  ;;  %v4747_v49 = vpop.xlane.xlu0 %4746 }
 0x5be   :  { %v4871_v50 = vpop.xlane.xlu1 %4870  ;;  %v4726_v58 = vpop.xlane.xlu0 %4725 }
 0x5c2   :  { %v4901_v45 = vpop.xlane.xlu1 %4900  ;;  %v4741_v28 = vpop.xlane.xlu0 %4740 }
 0x5c6   :  { %v4720_v17 = vpop.xlane.xlu1 %4719  ;;  %v4874_v47 = vpop.xlane.xlu0 %4873 }
 0x5c7   :  { %v4763_v62 = vadd.f32 %v4720_v17, %v4717_v25  ;;  %v4917_v16 = vadd.f32 %v4874_v47, %v4871_v50 }
 0x5c9   :  { %v4764_v54 = vadd.f32 %v4763_v62, %v4723_v34  ;;  %v4918_v23 = vadd.f32 %v4917_v16, %v4877_v36 }
 0x5ca   :  { %v4880_v18 = vpop.xlane.xlu1 %4879  ;;  %v4904_v5 = vpop.xlane.xlu0 %4903 }
 0x5cb   :  { %v4765_v13 = vadd.f32 %v4764_v54, %v4726_v58  ;;  %v4919_v40 = vadd.f32 %v4918_v23, %v4880_v18 }
 0x5cd   :  { %v4766_v38 = vadd.f32 %v4765_v13, %v4729_v12  ;;  %v4920_v59 = vadd.f32 %v4919_v40, %v4883_v1 }
 0x5ce   :  { %v4895_v35 = vpop.xlane.xlu1 %4894  ;;  %v4898_v56 = vpop.xlane.xlu0 %4897 }
 0x5cf   :  { %v4767_v32 = vadd.f32 %v4766_v38, %v4732_v51  ;;  %v4921_v7 = vadd.f32 %v4920_v59, %v4886_v31  ;;  %v4930_v13 = vadd.f32 %v4898_v56, %v4895_v35 }
 0x5d1   :  { %v4768_v24 = vadd.f32 %v4767_v32, %v4735_v22  ;;  %v4922_v21 = vadd.f32 %v4921_v7, %v4889_v33  ;;  %v4931_v7 = vadd.f32 %v4930_v13, %v4901_v45 }
 0x5d2   :  { %v4750_v14 = vpop.xlane.xlu1 %4749  ;;  %v4759_v37 = vpop.xlane.xlu0 %4758 }
 0x5d3   :  { %v4769_v52 = vadd.f32 %v4768_v24, %v4738_v55  ;;  %v4923_v43 = vadd.f32 %v4922_v21, %v4892_v2 }
 0x5d5   :  { %v4770_v11 = vrot.slane %v4769_v52, 4  ;;  %v4924_v29 = vrot.slane %v4923_v43, 4 }
 0x5d6   :  { %v4744_v41 = vpop.xlane.xlu1 %4743  ;;  %v4753_v0 = vpop.xlane.xlu0 %4752 }
 0x5d7   :  { %v4771_v42 = vadd.f32 %v4770_v11, %v4769_v52  ;;  %v4925_v34 = vadd.f32 %v4924_v29, %v4923_v43  ;;  %v4776_v12 = vadd.f32 %v4744_v41, %v4741_v28  ;;  %v4932_v43 = vadd.f32 %v4931_v7, %v4904_v5 }
 0x5d9   :  { %v4772_v25 = vrot.slane %v4771_v42, 2  ;;  %v4926_v36 = vrot.slane %v4925_v34, 2  ;;  %v4777_v58 = vadd.f32 %v4776_v12, %v4747_v49 }
 0x5da   :  { %v9310_v1 = vpop.permute.xlu1 %5010  ;;  %v4913_v50 = vpop.xlane.xlu0 %4912 }
 0x5db   :  { %v4773_v51 = vadd.f32 %v4772_v25, %v4771_v42  ;;  %v4927_v31 = vadd.f32 %v4926_v36, %v4925_v34  ;;  %v4778_v16 = vadd.f32 %v4777_v58, %v4750_v14 }
 0x5dd   :  { %v4774_v22 = vrot.slane %v4773_v51, 1  ;;  %v4928_v33 = vrot.slane %v4927_v31, 1  ;;  %v4779_v38 = vadd.f32 %v4778_v16, %v4753_v0 }
 0x5de   :  { %v9312_v17 = vpop.permute.xlu1 %5014  ;;  %v4907_v55 = vpop.xlane.xlu0 %4906 }
 0x5df   :  { %v4775_v2 = vadd.f32 %v4774_v22, %v4773_v51  ;;  %v4929_v47 = vadd.f32 %v4928_v33, %v4927_v31  ;;  %v4933_v29 = vadd.f32 %v4932_v43, %v4907_v55 }
 0x5e1   :  { %v9314_v62 = vmul.f32 0.00048828125, %v4775_v2  ;;  %v4946_v28 = vmul.f32 0.00048828125, %v4929_v47 }
 0x5e2   :  { %v9316_v54 = vpop.permute.xlu1 %5018  ;;  %v4762_v23 = vpop.xlane.xlu0 %4761 }
 0x5e3   :  { %v4948_v18 = vmul.f32 %v9314_v62, %v9314_v62  ;;  %v4959_v51 = vsub.f32 %v9105_v57, %v9314_v62  ;;  %v4957_v5 = vsub.f32 %v9117_v9, %v9314_v62  ;;  %v4961_v16 = vsub.f32 %v9083_v46, %v9314_v62 }
 0x5e4   :  { %v4958_v46 = vsub.f32 %v9075_v26, %v9314_v62  ;;  %v4963_v7 = vsub.f32 %v9065_v20, %v9314_v62  ;;  %v4960_v43 = vsub.f32 %v9058_v48, %v9314_v62 }
 0x5e5   :  { %v4950_v40 = vsub.f32 %v4946_v28, %v4948_v18 }
 0x5e6   :  { %v9320_v59 = vpop.permute.xlu1 %5062  ;;  %v4756_v49 = vpop.xlane.xlu0 %4755 }
 0x5e7   :  { %v4952_v32 = vadd.f32 1e-05, %v4950_v40  ;;  %v4780_v24 = vadd.f32 %v4779_v38, %v4756_v49  ;;  %v4956_v49 = vsub.f32 %v9091_v10, %v9314_v62 }
 0x5e9   :  { %6843 = vrsqrt.f32 %v4952_v32  ;;  %v4781_v21 = vadd.f32 %v4780_v24, %v4759_v37 }
 0x5ea   :  { %v9322_v52 = vpop.permute.xlu1 %5066  ;;  %v4916_v14 = vpop.xlane.xlu0 %4915 }
 0x5eb   :  { %v4782_v11 = vadd.f32 %v4781_v21, %v4762_v23 }
 0x5ed   :  { %v4783_v41 = vrot.slane %v4782_v11, 4 }
 0x5ee   :  { %v9324_v42 = vpop.permute.xlu1 %5070  ;;  %v4910_v35 = vpop.xlane.xlu0 %4909 }
 0x5ef   :  { %v4784_v56 = vadd.f32 %v4783_v41, %v4782_v11  ;;  %v4934_v0 = vadd.f32 %v4933_v29, %v4910_v35 }
 0x5f1   :  { %v4785_v34 = vrot.slane %v4784_v56, 2  ;;  %v4935_v25 = vadd.f32 %v4934_v0, %v4913_v50 }
 0x5f2   :  { %v9326_v36 = vpop.permute.xlu1 %5074  ;;  %v9328_v45 = vpop.permute.xlu0 %5012 }
 0x5f3   :  { %v4786_v12 = vadd.f32 %v4785_v34, %v4784_v56  ;;  %v4936_v37 = vadd.f32 %v4935_v25, %v4916_v14 }
 0x5f5   :  { %v4937_v31 = vrot.slane %v4936_v37, 4  ;;  %v4787_v33 = vrot.slane %v4786_v12, 1 }
 0x5f6   :  { %v6844_v22 = vpop.eup %6843  ;;  %v5215_v58 = vpop.permute.xlu1 %5214 }
 0x5f7   :  { %v9334_v55 = vpop.permute.xlu0 %5016  ;;  %v4975_v2 = vmul.f32 %v6844_v22, %v4959_v51  ;;  %v4973_v50 = vmul.f32 %v6844_v22, %v4957_v5  ;;  %5261 = vst.msk [vmem:[#allocation8 + $0x8] sm:$0xff] %vm346_vm5, %v5215_v58  ;;  %v4938_v47 = vadd.f32 %v4937_v31, %v4936_v37  ;;  %v4788_v57 = vadd.f32 %v4787_v33, %v4786_v12 }
 0x5f8   :  { %v4977_v40 = vmul.f32 %v6844_v22, %v4961_v16  ;;  %v4972_v24 = vmul.f32 %v6844_v22, %v4956_v49  ;;  %v4974_v29 = vmul.f32 %v6844_v22, %v4958_v46  ;;  %v4979_v35 = vmul.f32 %v6844_v22, %v4963_v7 }
 0x5f9   :  { %v5029_v23 = vmul.f32 %v9048_v53, %v4973_v50  ;;  %v4939_v28 = vrot.slane %v4938_v47, 2  ;;  %v5031_v13 = vmul.f32 %v9310_v1, %v4975_v2  ;;  %v9352_v21 = vmul.f32 0.00048828125, %v4788_v57 }
 0x5fa   :  { %v5219_v18 = vpop.permute.xlu1 %5218  ;;  %v5033_v10 = vmul.f32 %v9312_v17, %v4977_v40  ;;  %v5028_v20 = vmul.f32 %v9055_v60, %v4972_v24  ;;  %v4976_v0 = vmul.f32 %v6844_v22, %v4960_v43  ;;  %v5030_v25 = vmul.f32 %v9067_v15, %v4974_v29 }
 0x5fb   :  { %v9340_v9 = vpop.permute.xlu0 %5060  ;;  %v5085_v38 = vadd.f32 %v9320_v59, %v5029_v23  ;;  %5263 = vst.msk [vmem:[#allocation8 + $0x18] sm:$0xff] %vm346_vm5, %v5219_v18  ;;  %v4940_v32 = vadd.f32 %v4939_v28, %v4938_v47  ;;  %v5087_v26 = vadd.f32 %v9322_v52, %v5031_v13  ;;  %v4949_v48 = vmul.f32 %v9352_v21, %v9352_v21 }
 0x5fc   :  { %v5084_v34 = vadd.f32 %v9340_v9, %v5028_v20  ;;  %v5035_v5 = vmul.f32 %v9316_v54, %v4979_v35  ;;  %v5089_v31 = vadd.f32 %v9324_v42, %v5033_v10  ;;  %v4962_v33 = vsub.f32 %v9051_v63, %v9314_v62 }
 0x5fd   :  { %5118 = vrot.lane.b32.xlu1 %v5085_v38, %s6913_s29  ;;  %v4941_v14 = vrot.slane %v4940_v32, 1  ;;  %v5032_v50 = vmul.f32 %v9328_v45, %v4976_v0  ;;  %v4966_v7 = vsub.f32 %v9097_v27, %v9352_v21  ;;  %v4965_v24 = vsub.f32 %v9138_v4, %v9352_v21 }
 0x5fe   :  { %v5223_v11 = vpop.permute.xlu1 %5222  ;;  %5116 = vrot.lane.b32.xlu0 %v5084_v34, %s6913_s29  ;;  %v4978_v47 = vmul.f32 %v6844_v22, %v4962_v33  ;;  %v5091_v28 = vadd.f32 %v9326_v36, %v5035_v5  ;;  %v4969_v4 = vsub.f32 %v9165_v61, %v9352_v21 }
 0x5ff   :  { %v9356_v41 = vpop.permute.xlu0 %5064  ;;  %5265 = vst.msk [vmem:[#allocation8 + $0x28] sm:$0xff] %vm346_vm5, %v5223_v11  ;;  %v4942_v56 = vadd.f32 %v4941_v14, %v4940_v32  ;;  %v4964_v32 = vsub.f32 %v9108_v8, %v9352_v21  ;;  %v4967_v14 = vsub.f32 %v9126_v30, %v9352_v21  ;;  %v4968_v8 = vsub.f32 %v9154_v39, %v9352_v21 }
 0x600   :  { %v5086_v58 = vadd.f32 %v9356_v41, %v5030_v25  ;;  %v5034_v62 = vmul.f32 %v9334_v55, %v4978_v47 }
 0x601   :  { %5122 = vrot.lane.b32.xlu1 %v5087_v26, %s6913_s29  ;;  %v4947_v12 = vmul.f32 0.00048828125, %v4942_v56 }
 0x602   :  { %v5227_v37 = vpop.permute.xlu1 %5226  ;;  %5120 = vrot.lane.b32.xlu0 %v5086_v58, %s6913_s29 }
 0x603   :  { %v9367_v51 = vpop.permute.xlu0 %5068  ;;  %5267 = vst.msk [vmem:[#allocation8 + $0x38] sm:$0xff] %vm346_vm5, %v5227_v37  ;;  %v4951_v2 = vsub.f32 %v4947_v12, %v4949_v48 }
 0x604   :  { %v5088_v63 = vadd.f32 %v9367_v51, %v5032_v50 }
 0x605   :  { %5126 = vrot.lane.b32.xlu1 %v5089_v31, %s6913_s29  ;;  %v4953_v16 = vadd.f32 1e-05, %v4951_v2 }
 0x606   :  { %v5231_v23 = vpop.permute.xlu1 %5230  ;;  %5124 = vrot.lane.b32.xlu0 %v5088_v63, %s6913_s29 }
 0x607   :  { %v9378_v57 = vpop.permute.xlu0 %5072  ;;  %5269 = vst.msk [vmem:[#allocation8 + $0x48] sm:$0xff] %vm346_vm5, %v5231_v23  ;;  %6845 = vrsqrt.f32 %v4953_v16 }
 0x608   :  { %v5090_v13 = vadd.f32 %v9378_v57, %v5034_v62 }
 0x609   :  { %5130 = vrot.lane.b32.xlu1 %v5091_v28, %s6913_s29 }
 0x60a   :  { %v5235_v22 = vpop.permute.xlu1 %5234  ;;  %5128 = vrot.lane.b32.xlu0 %v5090_v13, %s6913_s29 }
 0x60b   :  { %v5213_v18 = vpop.permute.xlu0 %5212  ;;  %5271 = vst.msk [vmem:[#allocation8 + $0x58] sm:$0xff] %vm346_vm5, %v5235_v22 }
 0x60c   :  { %5260 = vst.msk [vmem:[#allocation8] sm:$0xff] %vm346_vm5, %v5213_v18 }
 0x60e   :  { %v5239_v40 = vpop.permute.xlu1 %5238 }
 0x60f   :  { %v5217_v38 = vpop.permute.xlu0 %5216  ;;  %5273 = vst.msk [vmem:[#allocation8 + $0x68] sm:$0xff] %vm346_vm5, %v5239_v40 }
 0x610   :  { %5262 = vst.msk [vmem:[#allocation8 + $0x10] sm:$0xff] %vm346_vm5, %v5217_v38 }
 0x613   :  { %v5221_v49 = vpop.permute.xlu0 %5220 }
 0x614   :  { %5264 = vst.msk [vmem:[#allocation8 + $0x20] sm:$0xff] %vm346_vm5, %v5221_v49  ;;  %v6846_v46 = vpop.eup %6845 }
 0x615   :  { %v4980_v43 = vmul.f32 %v6846_v46, %v4964_v32  ;;  %v4982_v29 = vmul.f32 %v6846_v46, %v4966_v7  ;;  %v4981_v10 = vmul.f32 %v6846_v46, %v4965_v24  ;;  %v4983_v35 = vmul.f32 %v6846_v46, %v4967_v14 }
 0x616   :  { %v4984_v20 = vmul.f32 %v6846_v46, %v4968_v8  ;;  %v4985_v39 = vmul.f32 %v6846_v46, %v4969_v4 }
 0x617   :  { %v5225_v11 = vpop.permute.xlu0 %5224  ;;  %v5036_v26 = vmul.f32 %v9055_v60, %v4980_v43  ;;  %v5037_v27 = vmul.f32 %v9048_v53, %v4981_v10  ;;  %v5038_v56 = vmul.f32 %v9067_v15, %v4982_v29  ;;  %v5039_v25 = vmul.f32 %v9310_v1, %v4983_v35 }
 0x618   :  { %5266 = vst.msk [vmem:[#allocation8 + $0x30] sm:$0xff] %vm346_vm5, %v5225_v11  ;;  %v4970_v60 = vsub.f32 %v9141_v44, %v9352_v21  ;;  %v4971_v53 = vsub.f32 %v9170_v6, %v9352_v21  ;;  %v5040_v15 = vmul.f32 %v9328_v45, %v4984_v20  ;;  %v5041_v44 = vmul.f32 %v9312_v17, %v4985_v39 }
 0x619   :  { %v5092_v30 = vadd.f32 %v9340_v9, %v5036_v26  ;;  %v5093_v34 = vadd.f32 %v9320_v59, %v5037_v27  ;;  %v5094_v9 = vadd.f32 %v9356_v41, %v5038_v56  ;;  %v5095_v1 = vadd.f32 %v9322_v52, %v5039_v25 }
 0x61a   :  { %v4986_v61 = vmul.f32 %v6846_v46, %v4970_v60  ;;  %v4987_v59 = vmul.f32 %v6846_v46, %v4971_v53  ;;  %v5096_v21 = vadd.f32 %v9367_v51, %v5040_v15  ;;  %v5097_v12 = vadd.f32 %v9324_v42, %v5041_v44 }
 0x61b   :  { %v5229_v0 = vpop.permute.xlu0 %5228  ;;  %5132 = vrot.lane.b32.xlu0 %v5092_v30, %s6913_s29  ;;  %5134 = vrot.lane.b32.xlu1 %v5093_v34, %s6913_s29 }
 0x61c   :  { %5268 = vst.msk [vmem:[#allocation8 + $0x40] sm:$0xff] %vm346_vm5, %v5229_v0  ;;  %v5042_v6 = vmul.f32 %v9334_v55, %v4986_v61  ;;  %v5043_v41 = vmul.f32 %v9316_v54, %v4987_v59 }
 0x61e   :  { %v5098_v17 = vadd.f32 %v9378_v57, %v5042_v6 }
 0x61f   :  { %v5233_v48 = vpop.permute.xlu0 %5232  ;;  %5136 = vrot.lane.b32.xlu0 %v5094_v9, %s6913_s29  ;;  %5138 = vrot.lane.b32.xlu1 %v5095_v1, %s6913_s29 }
 0x620   :  { %5270 = vst.msk [vmem:[#allocation8 + $0x50] sm:$0xff] %vm346_vm5, %v5233_v48 }
 0x623   :  { %v5237_v45 = vpop.permute.xlu0 %5236  ;;  %5140 = vrot.lane.b32.xlu0 %v5096_v21, %s6913_s29  ;;  %5142 = vrot.lane.b32.xlu1 %v5097_v12, %s6913_s29 }
 0x624   :  { %5272 = vst.msk [vmem:[#allocation8 + $0x60] sm:$0xff] %vm346_vm5, %v5237_v45 }
 0x625   :  { %6858 = shalt.err (!%p6855_p4)
}
 0x626   :  { %s6916_s22 = smov 128   ;;  %s6917_s23 = smov 8   ;;  %v5099_v54 = vadd.f32 %v9326_v36, %v5043_v41 }
 0x627   :  { %5299 = dma.vmem_to_hbm [thread:$0]  %s5294_s20, 2048, %s9488_s10, [#allocation7], %s6916_s22, %s6916_s22, %s6917_s23  }
 0x628   :  { %5144 = vrot.lane.b32.xlu0 %v5098_v17, %s6913_s29  ;;  %5146 = vrot.lane.b32.xlu1 %v5099_v54, %s6913_s29  ;;  %s6918_s10 = smov [#allocation4]   ;;  %s6919_s25 = smov [#allocation8]  }
 0x629   :  { %s5281_s29 = sshll.u32 %s6918_s10, 4  ;;  %s5305_s5 = sshll.u32 %s6919_s25, 4  ;;  %s5282_s29 = int_to_ptr.vmem [resolvable:$true] %s5281_s29  ;;  %s5306_s5 = int_to_ptr.vmem [resolvable:$true] %s5305_s5 }
 0x62a   :  { %s6867_s26 = scalar_lea.vmem %s5282_s29, 2048  ;;  %p6872_p6 = scmp.lt.s32.totalorder %s5282_s29, %s5282_s29 }
 0x62b   :  { %p6868_p5 = scmp.ne.s32.totalorder %s5282_s29, %s6867_s26  ;;  %p6873_p7 = scmp.lt.s32.totalorder %s6867_s26, %s6867_s26 }
 0x62c   :  { %5240 = vrot.lane.b32.xlu0 %v8987_v3, %s6914_s1  ;;  %5242 = vrot.lane.b32.xlu1 %v9018_v19, %s6914_s1 }
 0x62d   :  { %p6874_p8 = por %p6873_p7, %p6872_p6 }
 0x62f   :  { %p6875_p9 = pnand %p6874_p8, %p6868_p5 }
 0x66f   :  { %v5119_v52 = vpop.permute.xlu1 %5118 }
 0x670   :  { %5165 = vst.msk [vmem:[#allocation4 + $0x8] sm:$0xff] %vm346_vm5, %v5119_v52  ;;  %v5117_v55 = vpop.permute.xlu0 %5116 }
 0x671   :  { %5164 = vst.msk [vmem:[#allocation4] sm:$0xff] %vm346_vm5, %v5117_v55 }
 0x673   :  { %v5123_v42 = vpop.permute.xlu1 %5122 }
 0x674   :  { %5167 = vst.msk [vmem:[#allocation4 + $0x18] sm:$0xff] %vm346_vm5, %v5123_v42  ;;  %v5121_v37 = vpop.permute.xlu0 %5120 }
 0x675   :  { %5166 = vst.msk [vmem:[#allocation4 + $0x10] sm:$0xff] %vm346_vm5, %v5121_v37 }
 0x677   :  { %v5127_v36 = vpop.permute.xlu1 %5126 }
 0x678   :  { %5169 = vst.msk [vmem:[#allocation4 + $0x28] sm:$0xff] %vm346_vm5, %v5127_v36  ;;  %v5125_v3 = vpop.permute.xlu0 %5124 }
 0x679   :  { %5168 = vst.msk [vmem:[#allocation4 + $0x20] sm:$0xff] %vm346_vm5, %v5125_v3 }
 0x67b   :  { %v5131_v51 = vpop.permute.xlu1 %5130 }
 0x67c   :  { %5171 = vst.msk [vmem:[#allocation4 + $0x38] sm:$0xff] %vm346_vm5, %v5131_v51  ;;  %v5129_v19 = vpop.permute.xlu0 %5128 }
 0x67d   :  { %5170 = vst.msk [vmem:[#allocation4 + $0x30] sm:$0xff] %vm346_vm5, %v5129_v19 }
 0x68d   :  { %v5133_v5 = vpop.permute.xlu0 %5132  ;;  %v5135_v31 = vpop.permute.xlu1 %5134 }
 0x68e   :  { %5172 = vst.msk [vmem:[#allocation4 + $0x40] sm:$0xff] %vm346_vm5, %v5133_v5  ;;  %5173 = vst.msk [vmem:[#allocation4 + $0x48] sm:$0xff] %vm346_vm5, %v5135_v31 }
 0x691   :  { %v5137_v33 = vpop.permute.xlu0 %5136  ;;  %v5139_v58 = vpop.permute.xlu1 %5138 }
 0x692   :  { %5174 = vst.msk [vmem:[#allocation4 + $0x50] sm:$0xff] %vm346_vm5, %v5137_v33  ;;  %5175 = vst.msk [vmem:[#allocation4 + $0x58] sm:$0xff] %vm346_vm5, %v5139_v58 }
 0x695   :  { %v5141_v2 = vpop.permute.xlu0 %5140  ;;  %v5143_v50 = vpop.permute.xlu1 %5142 }
 0x696   :  { %5176 = vst.msk [vmem:[#allocation4 + $0x60] sm:$0xff] %vm346_vm5, %v5141_v2  ;;  %5177 = vst.msk [vmem:[#allocation4 + $0x68] sm:$0xff] %vm346_vm5, %v5143_v50 }
 0x69a   :  { %v5145_v47 = vpop.permute.xlu0 %5144  ;;  %v5147_v16 = vpop.permute.xlu1 %5146 }
 0x69b   :  { %5178 = vst.msk [vmem:[#allocation4 + $0x70] sm:$0xff] %vm346_vm5, %v5145_v47  ;;  %5179 = vst.msk [vmem:[#allocation4 + $0x78] sm:$0xff] %vm346_vm5, %v5147_v16 }
 0x69c   :  { %6878 = shalt.err (!%p6875_p9)
}
 0x69d   :  { %5287 = dma.vmem_to_hbm [thread:$0]  %s5282_s29, 2048, %s9487_s9, [#allocation5], %s6916_s22, %s6916_s22, %s6917_s23  }
 0x69e   :  { %v5241_v23 = vpop.permute.xlu0 %5240  ;;  %v5243_v57 = vpop.permute.xlu1 %5242  ;;  %s6887_s0 = scalar_lea.vmem %s5306_s5, 2048  ;;  %p6892_p11 = scmp.lt.s32.totalorder %s5306_s5, %s5306_s5 }
 0x69f   :  { %5274 = vst.msk [vmem:[#allocation8 + $0x70] sm:$0xff] %vm346_vm5, %v5241_v23  ;;  %5275 = vst.msk [vmem:[#allocation8 + $0x78] sm:$0xff] %vm346_vm5, %v5243_v57  ;;  %p6888_p10 = scmp.ne.s32.totalorder %s5306_s5, %s6887_s0  ;;  %p6893_p12 = scmp.lt.s32.totalorder %s6887_s0, %s6887_s0 }
 0x6a1   :  { %p6894_p13 = por %p6893_p12, %p6892_p11 }
 0x6a3   :  { %p6895_p0 = pnand %p6894_p13, %p6888_p10 }
 0x6a5   :  { %6898 = shalt.err (!%p6895_p0)
}
 0x6a6   :  { %5311 = dma.vmem_to_hbm [thread:$0]  %s5306_s5, 2048, %s9489_s11, [#allocation7], %s6916_s22, %s6916_s22, %s6917_s23  }
 0x6a7   :  { %6907 = dma.done.wait [#allocation5], 2048  }
 0x6a8   :  { %6908 = vsyncadd [#allocation5], 4294965248 }
 0x6a9   :  { %6909 = dma.done.wait [#allocation7], 4096  }
 0x6aa   :  { %6910 = vsyncadd [#allocation7], 4294963200 }
 0x6ab   :  { %5321 = vsyncpa [#allocation5], 1 }
 0x6ac   :  { %5322 = vsyncpa [#allocation7], 1 }

</bundles_post_ra>
